<compile_context>
chip_gen: v7x
topology: tpu7x:2x2x1
jax: 0.10.0
libtpu: 0.0.40
codegen_flags: <defaults>
</compile_context>

<pallas_src>
import functools

import jax
import jax.numpy as jnp
from jax.experimental import pallas as pl
from jax.experimental.pallas import tpu as pltpu


def _round_up(x, m):
    return ((x + m - 1) // m) * m


# ----------------------------------------------------------------------------
# Fused ChromBPNet kernel (one grid step = b_tile sequences, whole forward)
# ----------------------------------------------------------------------------
def _chrombpnet_kernel(x_ref, iw_ref, ib_ref, rw_ref, rb_ref, fw_ref, fb_ref,
                       lw_ref, lb_ref, prof_ref, cnt_ref, xbuf, hbuf, *,
                       b_tile, seq_len, halo, seg_w, c_in, n_filters,
                       k_i, k_r, dilations, k_f, trim_acc, trim_bias,
                       prof_lo, prof_w, matmul_dtype):
    L = seq_len
    W = seg_w                         # per-sequence segment stride (mult of 128)
    NW = b_tile * W                   # total scratch width
    NWc = NW - 2 * halo               # columns for which conv outputs exist
    C = n_filters                     # per-submodel filters; hbuf has 2C rows
    C2 = 2 * C

    # ---- Stage the batch tile into the zero-halo input buffer. ------------
    # xbuf is small (c_in_pad rows); zero it fully each step (the first step on
    # each core sees uninitialized VMEM), then drop each sequence at its
    # lane-aligned segment offset.  Columns outside each sequence's L valid
    # positions stay zero => exact torch Conv1d zero padding.
    xbuf[...] = jnp.zeros_like(xbuf)
    for b in range(b_tile):
        s = b * W + halo              # multiple of 128
        xbuf[:c_in, s:s + L] = x_ref[b]

    # Outer halo bands of hbuf are never written by the conv stores; zero them
    # once per step so the edge taps of the first/last sequence read true zeros.
    zc = jnp.zeros((C2, halo), jnp.float32)
    hbuf[:, 0:halo] = zc
    hbuf[:, NW - halo:NW] = zc

    # Inter-sequence gap bands (inside the computed region): garbage conv
    # output lands there every layer and must be re-zeroed so the next layer's
    # dilated taps see torch zero padding.  The bands are narrow (W - L
    # columns per boundary), so targeted zero-stores replace the old
    # full-width mask multiply.
    gap_bands = []
    for b in range(b_tile):
        s = b * W + halo + L
        e = (b + 1) * W + halo if b + 1 < b_tile else NW - halo
        if e > s:
            gap_bands.append((s, e))

    def zero_gaps():
        for s, e in gap_bands:
            hbuf[:, s:e] = jnp.zeros((C2, e - s), jnp.float32)

    def conv_cols(src_ref, K, d):
        # im2col: stack the K dilated tap windows (read straight from the ref)
        # along the contraction (sublane) axis.
        p = d * (K - 1) // 2
        return jnp.concatenate(
            [src_ref[:, halo - p + k * d: halo - p + k * d + NWc]
             for k in range(K)], axis=0).astype(matmul_dtype)

    # ---- Initial conv (both submodels fused along the output rows). -------
    h = jnp.dot(iw_ref[...], conv_cols(xbuf, k_i, 1),
                preferred_element_type=jnp.float32)
    h = jnp.maximum(h + ib_ref[...], 0.0)
    hbuf[:, halo:halo + NWc] = h      # lane-aligned, full-lane-width store
    zero_gaps()

    # ---- Dilated residual convs (block-diagonal fused weights). -----------
    for li, d in enumerate(dilations):
        y = jnp.dot(rw_ref[li], conv_cols(hbuf, k_r, d),
                    preferred_element_type=jnp.float32)
        y = jnp.maximum(y + rb_ref[li], 0.0)
        hbuf[:, halo:halo + NWc] = hbuf[:, halo:halo + NWc] + y
        zero_gaps()

    # ---- Profile heads (C_out == 1 each): accumulate the k_f taps into one
    # (2C, NWc) f32 buffer on the VPU and reduce across sublanes ONCE at the
    # end.  Summing over ALL 2C rows directly yields
    # acc_profile + bias_profile (the ChromBPNet combine); fb holds
    # fb_acc + fb_bias.
    p_f = (k_f - 1) // 2
    fw = fw_ref[...]                  # (2C, k_f) f32
    pacc = fw[:, 0:1] * hbuf[:, halo - p_f: halo - p_f + NWc]
    for k in range(1, k_f):
        s = halo - p_f + k
        pacc = pacc + fw[:, k:k + 1] * hbuf[:, s:s + NWc]
    prof = jnp.sum(pacc, axis=0, keepdims=True) + fb_ref[...]    # (1, NWc)

    # Profile output: lane-aligned window start (prof_lo) and 128-multiple
    # width (prof_w); the exact [trim_acc, L - trim_acc) crop happens in the
    # wrapper, so every kernel-side extract and output store is lane-dense.
    for b in range(b_tile):
        s = b * W + prof_lo
        prof_ref[b, :, :] = prof[:, s:s + prof_w]

    # ---- Counts heads + ChromBPNet logaddexp combine. ----------------------
    lw = lw_ref[...]                  # (2C, 1): [acc rows | bias rows]
    lb = lb_ref[...]                  # (2, 1):  [lb_acc, lb_bias]
    for b in range(b_tile):
        base = b * W + halo
        ma = jnp.mean(hbuf[:C, base + trim_acc: base + L - trim_acc],
                      axis=1, keepdims=True)
        mb = jnp.mean(hbuf[C:, base + trim_bias: base + L - trim_bias],
                      axis=1, keepdims=True)
        ca = jnp.sum(lw[:C] * ma, keepdims=True) + lb[0:1, 0:1]
        cb = jnp.sum(lw[C:] * mb, keepdims=True) + lb[1:2, 0:1]
        m = jnp.maximum(ca, cb)       # stable log(exp(ca) + exp(cb))
        cnt_ref[b, :, :] = m + jnp.log(jnp.exp(ca - m) + jnp.exp(cb - m))


# ----------------------------------------------------------------------------
# Wrapper: fused parameter re-layout + pallas_call
# ----------------------------------------------------------------------------
def _bcast_spec(arr):
    nd = arr.ndim
    return pl.BlockSpec(arr.shape, lambda i, nd=nd: (0,) * nd)


def _prep_fused_params(acc, bias, c_in_pad, matmul_dtype):
    """Fuse accessibility + bias BPNet params into stacked / block-diagonal
    im2col-layout operands so every conv layer is ONE MXU matmul."""
    C, c_in, k_i = acc["iconv_w"].shape
    assert bias["iconv_w"].shape == (C, c_in, k_i), \
        "submodels must share the BPNet architecture to be fused"
    n_layers = len(acc["rconv_w"])
    assert len(bias["rconv_w"]) == n_layers
    k_r = acc["rconv_w"][0].shape[-1]
    assert bias["rconv_w"][0].shape[-1] == k_r
    k_f = acc["fconv_w"].shape[-1]
    assert bias["fconv_w"].shape[-1] == k_f
    C2 = 2 * C

    def pad_cin(w):
        if c_in_pad == c_in:
            return w
        return jnp.pad(w, ((0, 0), (0, c_in_pad - c_in), (0, 0)))

    # Initial conv: stack output channels [acc | bias]; layout (2C, k_i*c_in_pad).
    iw = jnp.concatenate([pad_cin(acc["iconv_w"]), pad_cin(bias["iconv_w"])], 0)
    iw = jnp.transpose(iw, (0, 2, 1)).reshape(C2, k_i * c_in_pad)
    iw = iw.astype(matmul_dtype)
    ib = jnp.concatenate([acc["iconv_b"], bias["iconv_b"]]).reshape(C2, 1)
    ib = ib.astype(jnp.float32)

    # Residual convs: block-diagonal so the two submodels never mix;
    # layout (2C, k_r*2C), contraction index = tap*2C + channel.
    rw_l, rb_l = [], []
    for wa, wb in zip(acc["rconv_w"], bias["rconv_w"]):
        blk = jnp.zeros((C2, k_r, C2), jnp.float32)
        blk = blk.at[:C, :, :C].set(jnp.transpose(wa, (0, 2, 1)))
        blk = blk.at[C:, :, C:].set(jnp.transpose(wb, (0, 2, 1)))
        rw_l.append(blk.reshape(C2, k_r * C2))
    for ba, bb in zip(acc["rconv_b"], bias["rconv_b"]):
        rb_l.append(jnp.concatenate([ba, bb]).reshape(C2, 1))
    rw = jnp.stack(rw_l).astype(matmul_dtype)          # (n_layers, 2C, k_r*2C)
    rb = jnp.stack(rb_l).astype(jnp.float32)           # (n_layers, 2C, 1)

    fw = jnp.concatenate([acc["fconv_w"][0], bias["fconv_w"][0]], 0)
    fw = fw.astype(jnp.float32)                        # (2C, k_f)
    fb = (acc["fconv_b"] + bias["fconv_b"]).reshape(1, 1).astype(jnp.float32)
    lw = jnp.concatenate([acc["lin_w"].reshape(C, 1),
                          bias["lin_w"].reshape(C, 1)], 0).astype(jnp.float32)
    lb = jnp.concatenate([acc["lin_b"], bias["lin_b"]]).reshape(2, 1)
    lb = lb.astype(jnp.float32)

    dil = tuple(2 ** (i + 1) for i in range(n_layers))
    reach = max([(k_i - 1) // 2, (k_f - 1) // 2]
                + [d * (k_r - 1) // 2 for d in dil])
    cfg = dict(k_i=k_i, k_r=k_r, k_f=k_f, dilations=dil)
    return (iw, ib, rw, rb, fw, fb, lw, lb), cfg, reach


def _pick_b_tile(B, W, halo, C, c_in_pad, k_r):
    """Batch-tile heuristic: the biggest tile that fits a conservative VMEM
    budget; on 2-TensorCore chips (v7x) prefer an even number of grid steps so
    both cores get balanced work, otherwise minimize grid steps (single TC)."""
    try:
        kind = jax.devices()[0].device_kind.lower()
    except Exception:
        kind = ""
    two_tc = ("v7" in kind) or ("7x" in kind)
    budget = 40 * 1024 * 1024          # headroom under the 56 MiB scoped limit

    def footprint(t):
        nw = t * W
        nwc = nw - 2 * halo
        hbuf = 2 * C * nw * 4
        xbuf = c_in_pad * nw * 4
        cols = k_r * 2 * C * nwc * 2   # bf16 im2col operand
        temps = 3 * 2 * C * nwc * 4    # conv out / residual / profile acc
        return hbuf + xbuf + cols + temps

    cands = [t for t in range(1, B + 1) if B % t == 0 and footprint(t) <= budget]
    if not cands:
        cands = [1]
    if two_tc:
        even = [t for t in cands if (B // t) % 2 == 0]
        if even:
            cands = even
    return max(cands)


def chrombpnet_forward(X, acc_params, bias_params, trim_acc, trim_bias,
                       X_ctl=None, *, b_tile=None, matmul_dtype=jnp.bfloat16):
    """ChromBPNet.forward (X_ctl ignored, as in the PyTorch module)."""
    del X_ctl
    B, c_in, L = X.shape
    c_in_pad = _round_up(c_in, 8)
    C = acc_params["iconv_w"].shape[0]
    assert C % 8 == 0, "n_filters must be a multiple of 8 (sublane tiling)"
    assert trim_acc >= trim_bias, "bias profile must be at least as long"

    arrays, cfg, reach = _prep_fused_params(acc_params, bias_params, c_in_pad,
                                            matmul_dtype)

    # Lane-aligned scratch geometry: left halo and per-sequence stride are
    # multiples of 128, so the activation stores, staging copies and output
    # extracts are all unmasked, lane-aligned accesses.
    halo = _round_up(max(reach, 1), 128)
    out_len = L - 2 * trim_acc
    prof_lo = (trim_acc // 128) * 128                        # aligned crop start
    prof_w = _round_up(trim_acc + out_len - prof_lo, 128)    # lane-dense output
    W = _round_up(max(L, prof_lo + prof_w) + 2 * halo, 128)
    assert prof_lo + prof_w <= W - 2 * halo

    if b_tile is None:
        b_tile = _pick_b_tile(B, W, halo, C, c_in_pad, cfg["k_r"])
    assert B % b_tile == 0

    kernel = functools.partial(
        _chrombpnet_kernel, b_tile=b_tile, seq_len=L, halo=halo, seg_w=W,
        c_in=c_in, n_filters=C, k_i=cfg["k_i"], k_r=cfg["k_r"],
        dilations=cfg["dilations"], k_f=cfg["k_f"], trim_acc=trim_acc,
        trim_bias=trim_bias, prof_lo=prof_lo, prof_w=prof_w,
        matmul_dtype=matmul_dtype)

    in_specs = ([pl.BlockSpec((b_tile, c_in, L), lambda i: (i, 0, 0))]
                + [_bcast_spec(p) for p in arrays])
    # TODO(synk): at production ChromBPNet sizes, additionally single-buffer
    # the invariant weight inputs (pipeline_mode=pl.Buffered(1)) and switch the
    # residual convs to per-tap matmuls to stay inside v7x's 64 MiB VMEM.

    prof_pad, counts = pl.pallas_call(
        kernel,
        grid=(B // b_tile,),
        in_specs=in_specs,
        out_specs=(pl.BlockSpec((b_tile, 1, prof_w), lambda i: (i, 0, 0)),
                   pl.BlockSpec((b_tile, 1, 1), lambda i: (i, 0, 0))),
        out_shape=(jax.ShapeDtypeStruct((B, 1, prof_w), jnp.float32),
                   jax.ShapeDtypeStruct((B, 1, 1), jnp.float32)),
        scratch_shapes=[pltpu.VMEM((c_in_pad, b_tile * W), jnp.float32),
                        pltpu.VMEM((2 * C, b_tile * W), jnp.float32)],
        compiler_params=pltpu.CompilerParams(
            dimension_semantics=("parallel",),
            vmem_limit_bytes=56 * 1024 * 1024),
    )(X, *arrays)

    off = trim_acc - prof_lo
    y_profile = prof_pad[:, :, off:off + out_len]
    return y_profile, counts.reshape(B, 1)


# ----------------------------------------------------------------------------
# Pure-JAX reference (for verification)
# ----------------------------------------------------------------------------
def _ref_conv1d(x, w, b, dilation, pad):
    xp = jnp.pad(x, ((0, 0), (0, 0), (pad, pad)))
    y = jax.lax.conv_general_dilated(
        xp, w, window_strides=(1,), padding="VALID",
        rhs_dilation=(dilation,), dimension_numbers=("NCH", "OIH", "NCH"))
    return y + b[None, :, None]


def _ref_bpnet(X, params, trimming):
    L = X.shape[-1]
    k_i = params["iconv_w"].shape[-1]
    k_f = params["fconv_w"].shape[-1]
    h = jax.nn.relu(_ref_conv1d(X, params["iconv_w"], params["iconv_b"],
                                1, (k_i - 1) // 2))
    for i, (wr, br) in enumerate(zip(params["rconv_w"], params["rconv_b"])):
        d = 2 ** (i + 1)
        h = h + jax.nn.relu(_ref_conv1d(h, wr, br, d, d))
    prof = _ref_conv1d(h, params["fconv_w"], params["fconv_b"],
                       1, (k_f - 1) // 2)
    start, end = trimming, L - trimming
    y_profile = prof[:, :, start:end]
    xm = jnp.mean(h[:, :, start:end], axis=-1)                     # (B, F)
    y_counts = xm @ params["lin_w"].T + params["lin_b"][None, :]   # (B, 1)
    return y_profile, y_counts


def _ref_chrombpnet(X, acc_params, bias_params, trim_acc, trim_bias):
    ap, ac = _ref_bpnet(X, acc_params, trim_acc)
    bp, bc = _ref_bpnet(X, bias_params, trim_bias)
    n0, n1 = ap.shape[-1], bp.shape[-1]
    w = (n1 - n0) // 2
    yp = ap + bp[:, :, w:n1 - w]
    yc = jnp.log(jnp.exp(ac) + jnp.exp(bc))      # matches the torch combine
    return yp, yc


# ----------------------------------------------------------------------------
# Deterministic parameter initialization (synthetic mini-BPNet submodules)
# ----------------------------------------------------------------------------
def init_bpnet_params(key, n_filters=8, n_layers=2, k_iconv=7, k_fconv=15):
    ks = jax.random.split(key, 2 * n_layers + 6)
    p = {}
    p["iconv_w"] = 0.1 * jax.random.normal(ks[0], (n_filters, 4, k_iconv),
                                           jnp.float32)
    p["iconv_b"] = 0.05 * jax.random.normal(ks[1], (n_filters,), jnp.float32)
    p["rconv_w"] = [0.1 * jax.random.normal(ks[2 + 2 * i],
                                            (n_filters, n_filters, 3),
                                            jnp.float32)
                    for i in range(n_layers)]
    p["rconv_b"] = [0.05 * jax.random.normal(ks[3 + 2 * i], (n_filters,),
                                             jnp.float32)
                    for i in range(n_layers)]
    p["fconv_w"] = 0.1 * jax.random.normal(ks[2 + 2 * n_layers],
                                           (1, n_filters, k_fconv),
                                           jnp.float32)
    p["fconv_b"] = 0.05 * jax.random.normal(ks[3 + 2 * n_layers], (1,),
                                            jnp.float32)
    p["lin_w"] = 0.1 * jax.random.normal(ks[4 + 2 * n_layers], (1, n_filters),
                                         jnp.float32)
    p["lin_b"] = 0.05 * jax.random.normal(ks[5 + 2 * n_layers], (1,),
                                          jnp.float32)
    return p


# ----------------------------------------------------------------------------
if __name__ == "__main__":
    B, L = 4, 128
    TRIM_ACC, TRIM_BIAS = 32, 16     # acc profile len 64, bias profile len 96

    key = jax.random.PRNGKey(0)
    kx, kacc, kbias = jax.random.split(key, 3)

    # One-hot DNA, NCL layout (B, 4, L), like torch input (-1, 4, 2114).
    idx = jax.random.randint(kx, (B, L), 0, 4)
    X = jnp.transpose(jax.nn.one_hot(idx, 4, dtype=jnp.float32), (0, 2, 1))

    acc_params = init_bpnet_params(kacc)
    bias_params = init_bpnet_params(kbias)

    y_profile, y_counts = chrombpnet_forward(X, acc_params, bias_params,
                                             TRIM_ACC, TRIM_BIAS)
    jax.block_until_ready((y_profile, y_counts))

    assert y_profile.shape == (B, 1, L - 2 * TRIM_ACC), y_profile.shape
    assert y_counts.shape == (B, 1), y_counts.shape

    yp_ref, yc_ref = _ref_chrombpnet(X, acc_params, bias_params,
                                     TRIM_ACC, TRIM_BIAS)
    # Tolerance accounts for bf16 MXU operands (f32 accumulation).
    assert jnp.allclose(y_profile, yp_ref, atol=2e-2, rtol=2e-2), \
        float(jnp.max(jnp.abs(y_profile - yp_ref)))
    assert jnp.allclose(y_counts, yc_ref, atol=2e-2, rtol=2e-2), \
        float(jnp.max(jnp.abs(y_counts - yc_ref)))

    print("KERNEL_OK")
</pallas_src>

<mosaic_0001>
module attributes {stable_mosaic.version = 11 : i64} {
  func.func @_chrombpnet_kernel(%arg0: i32, %arg1: memref<4x4x128xf32, #tpu.memory_space<vmem>>, %arg2: memref<16x56xbf16, #tpu.memory_space<vmem>>, %arg3: memref<16x1xf32, #tpu.memory_space<vmem>>, %arg4: memref<2x16x48xbf16, #tpu.memory_space<vmem>>, %arg5: memref<2x16x1xf32, #tpu.memory_space<vmem>>, %arg6: memref<16x15xf32, #tpu.memory_space<vmem>>, %arg7: memref<1x1xf32, #tpu.memory_space<vmem>>, %arg8: memref<16x1xf32, #tpu.memory_space<vmem>>, %arg9: memref<2x1xf32, #tpu.memory_space<vmem>>, %arg10: memref<4x1x128xf32, #tpu.memory_space<vmem>>, %arg11: memref<4x1x1xf32, #tpu.memory_space<vmem>>, %arg12: memref<8x1536xf32, #tpu.memory_space<vmem>>, %arg13: memref<16x1536xf32, #tpu.memory_space<vmem>>) attributes {dimension_semantics = [#tpu.dimension_semantics<parallel>], iteration_bounds = array<i64: 1>, scalar_prefetch = 0 : i64, scratch_operands = 2 : i64, tpu.core_type = #tpu.core_type<tc>, window_params = [{transform_indices = @transform_0, window_bounds = array<i64: 4, 4, 128>}, {pipeline_mode = #tpu.pipeline_mode<synchronous>, transform_indices = @transform_1, window_bounds = array<i64: 16, 56>}, {pipeline_mode = #tpu.pipeline_mode<synchronous>, transform_indices = @transform_2, window_bounds = array<i64: 16, 1>}, {pipeline_mode = #tpu.pipeline_mode<synchronous>, transform_indices = @transform_3, window_bounds = array<i64: 2, 16, 48>}, {pipeline_mode = #tpu.pipeline_mode<synchronous>, transform_indices = @transform_4, window_bounds = array<i64: 2, 16, 1>}, {pipeline_mode = #tpu.pipeline_mode<synchronous>, transform_indices = @transform_5, window_bounds = array<i64: 16, 15>}, {pipeline_mode = #tpu.pipeline_mode<synchronous>, transform_indices = @transform_6, window_bounds = array<i64: 1, 1>}, {pipeline_mode = #tpu.pipeline_mode<synchronous>, transform_indices = @transform_7, window_bounds = array<i64: 16, 1>}, {pipeline_mode = #tpu.pipeline_mode<synchronous>, transform_indices = @transform_8, window_bounds = array<i64: 2, 1>}, {transform_indices = @transform_9, window_bounds = array<i64: 4, 1, 128>}, {transform_indices = @transform_10, window_bounds = array<i64: 4, 1, 1>}]} {
    %cst = arith.constant 0.000000e+00 : f32
    %0 = vector.broadcast %cst : f32 to vector<8x1536xf32>
    %c0 = arith.constant 0 : index
    %c0_0 = arith.constant 0 : index
    %1 = vector.load %arg12[%c0, %c0_0] : memref<8x1536xf32, #tpu.memory_space<vmem>>, vector<8x1536xf32>
    tpu.vector_store %arg12[%c0, %c0_0], %0 {strides = array<i32>} : memref<8x1536xf32, #tpu.memory_space<vmem>>, vector<8x1536xf32>,
    %c0_1 = arith.constant 0 : index
    %c0_2 = arith.constant 0 : index
    %c0_3 = arith.constant 0 : index
    %2 = vector.load %arg1[%c0_1, %c0_2, %c0_3] : memref<4x4x128xf32, #tpu.memory_space<vmem>>, vector<1x4x128xf32>
    %3 = vector.shape_cast %2 : vector<1x4x128xf32> to vector<4x128xf32>
    %c0_4 = arith.constant 0 : index
    %c128 = arith.constant 128 : index
    %4 = vector.load %arg12[%c0_4, %c128] : memref<8x1536xf32, #tpu.memory_space<vmem>>, vector<4x128xf32>
    tpu.vector_store %arg12[%c0_4, %c128], %3 {strides = array<i32>} : memref<8x1536xf32, #tpu.memory_space<vmem>>, vector<4x128xf32>,
    %c1 = arith.constant 1 : index
    %c0_5 = arith.constant 0 : index
    %c0_6 = arith.constant 0 : index
    %5 = vector.load %arg1[%c1, %c0_5, %c0_6] : memref<4x4x128xf32, #tpu.memory_space<vmem>>, vector<1x4x128xf32>
    %6 = vector.shape_cast %5 : vector<1x4x128xf32> to vector<4x128xf32>
    %c0_7 = arith.constant 0 : index
    %c512 = arith.constant 512 : index
    %7 = vector.load %arg12[%c0_7, %c512] : memref<8x1536xf32, #tpu.memory_space<vmem>>, vector<4x128xf32>
    tpu.vector_store %arg12[%c0_7, %c512], %6 {strides = array<i32>} : memref<8x1536xf32, #tpu.memory_space<vmem>>, vector<4x128xf32>,
    %c2 = arith.constant 2 : index
    %c0_8 = arith.constant 0 : index
    %c0_9 = arith.constant 0 : index
    %8 = vector.load %arg1[%c2, %c0_8, %c0_9] : memref<4x4x128xf32, #tpu.memory_space<vmem>>, vector<1x4x128xf32>
    %9 = vector.shape_cast %8 : vector<1x4x128xf32> to vector<4x128xf32>
    %c0_10 = arith.constant 0 : index
    %c896 = arith.constant 896 : index
    %10 = vector.load %arg12[%c0_10, %c896] : memref<8x1536xf32, #tpu.memory_space<vmem>>, vector<4x128xf32>
    tpu.vector_store %arg12[%c0_10, %c896], %9 {strides = array<i32>} : memref<8x1536xf32, #tpu.memory_space<vmem>>, vector<4x128xf32>,
    %c3 = arith.constant 3 : index
    %c0_11 = arith.constant 0 : index
    %c0_12 = arith.constant 0 : index
    %11 = vector.load %arg1[%c3, %c0_11, %c0_12] : memref<4x4x128xf32, #tpu.memory_space<vmem>>, vector<1x4x128xf32>
    %12 = vector.shape_cast %11 : vector<1x4x128xf32> to vector<4x128xf32>
    %c0_13 = arith.constant 0 : index
    %c1280 = arith.constant 1280 : index
    %13 = vector.load %arg12[%c0_13, %c1280] : memref<8x1536xf32, #tpu.memory_space<vmem>>, vector<4x128xf32>
    tpu.vector_store %arg12[%c0_13, %c1280], %12 {strides = array<i32>} : memref<8x1536xf32, #tpu.memory_space<vmem>>, vector<4x128xf32>,
    %cst_14 = arith.constant 0.000000e+00 : f32
    %14 = vector.broadcast %cst_14 : f32 to vector<16x128xf32>
    %c0_15 = arith.constant 0 : index
    %c0_16 = arith.constant 0 : index
    %15 = vector.load %arg13[%c0_15, %c0_16] : memref<16x1536xf32, #tpu.memory_space<vmem>>, vector<16x128xf32>
    tpu.vector_store %arg13[%c0_15, %c0_16], %14 {strides = array<i32>} : memref<16x1536xf32, #tpu.memory_space<vmem>>, vector<16x128xf32>,
    %c0_17 = arith.constant 0 : index
    %c1408 = arith.constant 1408 : index
    %16 = vector.load %arg13[%c0_17, %c1408] : memref<16x1536xf32, #tpu.memory_space<vmem>>, vector<16x128xf32>
    tpu.vector_store %arg13[%c0_17, %c1408], %14 {strides = array<i32>} : memref<16x1536xf32, #tpu.memory_space<vmem>>, vector<16x128xf32>,
    %c0_18 = arith.constant 0 : index
    %c0_19 = arith.constant 0 : index
    %17 = vector.load %arg2[%c0_18, %c0_19] : memref<16x56xbf16, #tpu.memory_space<vmem>>, vector<16x56xbf16>
    %c0_20 = arith.constant 0 : index
    %c125 = arith.constant 125 : index
    %18 = vector.load %arg12[%c0_20, %c125] : memref<8x1536xf32, #tpu.memory_space<vmem>>, vector<8x1280xf32>
    %c0_21 = arith.constant 0 : index
    %c126 = arith.constant 126 : index
    %19 = vector.load %arg12[%c0_21, %c126] : memref<8x1536xf32, #tpu.memory_space<vmem>>, vector<8x1280xf32>
    %c0_22 = arith.constant 0 : index
    %c127 = arith.constant 127 : index
    %20 = vector.load %arg12[%c0_22, %c127] : memref<8x1536xf32, #tpu.memory_space<vmem>>, vector<8x1280xf32>
    %c0_23 = arith.constant 0 : index
    %c128_24 = arith.constant 128 : index
    %21 = vector.load %arg12[%c0_23, %c128_24] : memref<8x1536xf32, #tpu.memory_space<vmem>>, vector<8x1280xf32>
    %c0_25 = arith.constant 0 : index
    %c129 = arith.constant 129 : index
    %22 = vector.load %arg12[%c0_25, %c129] : memref<8x1536xf32, #tpu.memory_space<vmem>>, vector<8x1280xf32>
    %c0_26 = arith.constant 0 : index
    %c130 = arith.constant 130 : index
    %23 = vector.load %arg12[%c0_26, %c130] : memref<8x1536xf32, #tpu.memory_space<vmem>>, vector<8x1280xf32>
    %c0_27 = arith.constant 0 : index
    %c131 = arith.constant 131 : index
    %24 = vector.load %arg12[%c0_27, %c131] : memref<8x1536xf32, #tpu.memory_space<vmem>>, vector<8x1280xf32>
    %25 = tpu.concatenate %18, %19, %20, %21, %22, %23, %24 in 0 : vector<8x1280xf32>, vector<8x1280xf32>, vector<8x1280xf32>, vector<8x1280xf32>, vector<8x1280xf32>, vector<8x1280xf32>, vector<8x1280xf32> -> vector<56x1280xf32>
    %26 = arith.truncf %25 : vector<56x1280xf32> to vector<56x1280xbf16>
    %cst_28 = arith.constant dense<0.000000e+00> : vector<16x1280xf32>
    %27 = tpu.matmul %17, %26, %cst_28 {dimension_numbers = #tpu.dot_dimension_numbers<[1], [0], [0], [1], [0, 0, 1, 1], [], []>} : vector<16x56xbf16>, vector<56x1280xbf16>, vector<16x1280xf32> -> vector<16x1280xf32>
    %c0_29 = arith.constant 0 : index
    %c0_30 = arith.constant 0 : index
    %28 = vector.load %arg3[%c0_29, %c0_30] : memref<16x1xf32, #tpu.memory_space<vmem>>, vector<16x1xf32>
    %29 = vector.broadcast %28 : vector<16x1xf32> to vector<16x1280xf32>
    %30 = arith.addf %27, %29 : vector<16x1280xf32>
    %cst_31 = arith.constant 0.000000e+00 : f32
    %31 = vector.broadcast %cst_31 : f32 to vector<16x1280xf32>
    %32 = arith.maximumf %30, %31 : vector<16x1280xf32>
    %c0_32 = arith.constant 0 : index
    %c128_33 = arith.constant 128 : index
    %33 = vector.load %arg13[%c0_32, %c128_33] : memref<16x1536xf32, #tpu.memory_space<vmem>>, vector<16x1280xf32>
    tpu.vector_store %arg13[%c0_32, %c128_33], %32 {strides = array<i32>} : memref<16x1536xf32, #tpu.memory_space<vmem>>, vector<16x1280xf32>,
    %cst_34 = arith.constant 0.000000e+00 : f32
    %34 = vector.broadcast %cst_34 : f32 to vector<16x256xf32>
    %c0_35 = arith.constant 0 : index
    %c256 = arith.constant 256 : index
    %35 = vector.load %arg13[%c0_35, %c256] : memref<16x1536xf32, #tpu.memory_space<vmem>>, vector<16x256xf32>
    tpu.vector_store %arg13[%c0_35, %c256], %34 {strides = array<i32>} : memref<16x1536xf32, #tpu.memory_space<vmem>>, vector<16x256xf32>,
    %cst_36 = arith.constant 0.000000e+00 : f32
    %36 = vector.broadcast %cst_36 : f32 to vector<16x256xf32>
    %c0_37 = arith.constant 0 : index
    %c640 = arith.constant 640 : index
    %37 = vector.load %arg13[%c0_37, %c640] : memref<16x1536xf32, #tpu.memory_space<vmem>>, vector<16x256xf32>
    tpu.vector_store %arg13[%c0_37, %c640], %36 {strides = array<i32>} : memref<16x1536xf32, #tpu.memory_space<vmem>>, vector<16x256xf32>,
    %cst_38 = arith.constant 0.000000e+00 : f32
    %38 = vector.broadcast %cst_38 : f32 to vector<16x256xf32>
    %c0_39 = arith.constant 0 : index
    %c1024 = arith.constant 1024 : index
    %39 = vector.load %arg13[%c0_39, %c1024] : memref<16x1536xf32, #tpu.memory_space<vmem>>, vector<16x256xf32>
    tpu.vector_store %arg13[%c0_39, %c1024], %38 {strides = array<i32>} : memref<16x1536xf32, #tpu.memory_space<vmem>>, vector<16x256xf32>,
    %c0_40 = arith.constant 0 : index
    %c0_41 = arith.constant 0 : index
    %c0_42 = arith.constant 0 : index
    %40 = vector.load %arg4[%c0_40, %c0_41, %c0_42] : memref<2x16x48xbf16, #tpu.memory_space<vmem>>, vector<1x16x48xbf16>
    %41 = vector.shape_cast %40 : vector<1x16x48xbf16> to vector<16x48xbf16>
    %c0_43 = arith.constant 0 : index
    %c126_44 = arith.constant 126 : index
    %42 = vector.load %arg13[%c0_43, %c126_44] : memref<16x1536xf32, #tpu.memory_space<vmem>>, vector<16x1280xf32>
    %c0_45 = arith.constant 0 : index
    %c128_46 = arith.constant 128 : index
    %43 = vector.load %arg13[%c0_45, %c128_46] : memref<16x1536xf32, #tpu.memory_space<vmem>>, vector<16x1280xf32>
    %c0_47 = arith.constant 0 : index
    %c130_48 = arith.constant 130 : index
    %44 = vector.load %arg13[%c0_47, %c130_48] : memref<16x1536xf32, #tpu.memory_space<vmem>>, vector<16x1280xf32>
    %45 = tpu.concatenate %42, %43, %44 in 0 : vector<16x1280xf32>, vector<16x1280xf32>, vector<16x1280xf32> -> vector<48x1280xf32>
    %46 = arith.truncf %45 : vector<48x1280xf32> to vector<48x1280xbf16>
    %cst_49 = arith.constant dense<0.000000e+00> : vector<16x1280xf32>
    %47 = tpu.matmul %41, %46, %cst_49 {dimension_numbers = #tpu.dot_dimension_numbers<[1], [0], [0], [1], [0, 0, 1, 1], [], []>} : vector<16x48xbf16>, vector<48x1280xbf16>, vector<16x1280xf32> -> vector<16x1280xf32>
    %c0_50 = arith.constant 0 : index
    %c0_51 = arith.constant 0 : index
    %c0_52 = arith.constant 0 : index
    %48 = vector.load %arg5[%c0_50, %c0_51, %c0_52] : memref<2x16x1xf32, #tpu.memory_space<vmem>>, vector<1x16x1xf32>
    %49 = vector.shape_cast %48 : vector<1x16x1xf32> to vector<16x1xf32>
    %50 = vector.broadcast %49 : vector<16x1xf32> to vector<16x1280xf32>
    %51 = arith.addf %47, %50 : vector<16x1280xf32>
    %cst_53 = arith.constant 0.000000e+00 : f32
    %52 = vector.broadcast %cst_53 : f32 to vector<16x1280xf32>
    %53 = arith.maximumf %51, %52 : vector<16x1280xf32>
    %c0_54 = arith.constant 0 : index
    %c128_55 = arith.constant 128 : index
    %54 = vector.load %arg13[%c0_54, %c128_55] : memref<16x1536xf32, #tpu.memory_space<vmem>>, vector<16x1280xf32>
    %55 = arith.addf %54, %53 : vector<16x1280xf32>
    %c0_56 = arith.constant 0 : index
    %c128_57 = arith.constant 128 : index
    %56 = vector.load %arg13[%c0_56, %c128_57] : memref<16x1536xf32, #tpu.memory_space<vmem>>, vector<16x1280xf32>
    tpu.vector_store %arg13[%c0_56, %c128_57], %55 {strides = array<i32>} : memref<16x1536xf32, #tpu.memory_space<vmem>>, vector<16x1280xf32>,
    %cst_58 = arith.constant 0.000000e+00 : f32
    %57 = vector.broadcast %cst_58 : f32 to vector<16x256xf32>
    %c0_59 = arith.constant 0 : index
    %c256_60 = arith.constant 256 : index
    %58 = vector.load %arg13[%c0_59, %c256_60] : memref<16x1536xf32, #tpu.memory_space<vmem>>, vector<16x256xf32>
    tpu.vector_store %arg13[%c0_59, %c256_60], %57 {strides = array<i32>} : memref<16x1536xf32, #tpu.memory_space<vmem>>, vector<16x256xf32>,
    %cst_61 = arith.constant 0.000000e+00 : f32
    %59 = vector.broadcast %cst_61 : f32 to vector<16x256xf32>
    %c0_62 = arith.constant 0 : index
    %c640_63 = arith.constant 640 : index
    %60 = vector.load %arg13[%c0_62, %c640_63] : memref<16x1536xf32, #tpu.memory_space<vmem>>, vector<16x256xf32>
    tpu.vector_store %arg13[%c0_62, %c640_63], %59 {strides = array<i32>} : memref<16x1536xf32, #tpu.memory_space<vmem>>, vector<16x256xf32>,
    %cst_64 = arith.constant 0.000000e+00 : f32
    %61 = vector.broadcast %cst_64 : f32 to vector<16x256xf32>
    %c0_65 = arith.constant 0 : index
    %c1024_66 = arith.constant 1024 : index
    %62 = vector.load %arg13[%c0_65, %c1024_66] : memref<16x1536xf32, #tpu.memory_space<vmem>>, vector<16x256xf32>
    tpu.vector_store %arg13[%c0_65, %c1024_66], %61 {strides = array<i32>} : memref<16x1536xf32, #tpu.memory_space<vmem>>, vector<16x256xf32>,
    %c1_67 = arith.constant 1 : index
    %c0_68 = arith.constant 0 : index
    %c0_69 = arith.constant 0 : index
    %63 = vector.load %arg4[%c1_67, %c0_68, %c0_69] : memref<2x16x48xbf16, #tpu.memory_space<vmem>>, vector<1x16x48xbf16>
    %64 = vector.shape_cast %63 : vector<1x16x48xbf16> to vector<16x48xbf16>
    %c0_70 = arith.constant 0 : index
    %c124 = arith.constant 124 : index
    %65 = vector.load %arg13[%c0_70, %c124] : memref<16x1536xf32, #tpu.memory_space<vmem>>, vector<16x1280xf32>
    %c0_71 = arith.constant 0 : index
    %c128_72 = arith.constant 128 : index
    %66 = vector.load %arg13[%c0_71, %c128_72] : memref<16x1536xf32, #tpu.memory_space<vmem>>, vector<16x1280xf32>
    %c0_73 = arith.constant 0 : index
    %c132 = arith.constant 132 : index
    %67 = vector.load %arg13[%c0_73, %c132] : memref<16x1536xf32, #tpu.memory_space<vmem>>, vector<16x1280xf32>
    %68 = tpu.concatenate %65, %66, %67 in 0 : vector<16x1280xf32>, vector<16x1280xf32>, vector<16x1280xf32> -> vector<48x1280xf32>
    %69 = arith.truncf %68 : vector<48x1280xf32> to vector<48x1280xbf16>
    %cst_74 = arith.constant dense<0.000000e+00> : vector<16x1280xf32>
    %70 = tpu.matmul %64, %69, %cst_74 {dimension_numbers = #tpu.dot_dimension_numbers<[1], [0], [0], [1], [0, 0, 1, 1], [], []>} : vector<16x48xbf16>, vector<48x1280xbf16>, vector<16x1280xf32> -> vector<16x1280xf32>
    %c1_75 = arith.constant 1 : index
    %c0_76 = arith.constant 0 : index
    %c0_77 = arith.constant 0 : index
    %71 = vector.load %arg5[%c1_75, %c0_76, %c0_77] : memref<2x16x1xf32, #tpu.memory_space<vmem>>, vector<1x16x1xf32>
    %72 = vector.shape_cast %71 : vector<1x16x1xf32> to vector<16x1xf32>
    %73 = vector.broadcast %72 : vector<16x1xf32> to vector<16x1280xf32>
    %74 = arith.addf %70, %73 : vector<16x1280xf32>
    %cst_78 = arith.constant 0.000000e+00 : f32
    %75 = vector.broadcast %cst_78 : f32 to vector<16x1280xf32>
    %76 = arith.maximumf %74, %75 : vector<16x1280xf32>
    %c0_79 = arith.constant 0 : index
    %c128_80 = arith.constant 128 : index
    %77 = vector.load %arg13[%c0_79, %c128_80] : memref<16x1536xf32, #tpu.memory_space<vmem>>, vector<16x1280xf32>
    %78 = arith.addf %77, %76 : vector<16x1280xf32>
    %c0_81 = arith.constant 0 : index
    %c128_82 = arith.constant 128 : index
    %79 = vector.load %arg13[%c0_81, %c128_82] : memref<16x1536xf32, #tpu.memory_space<vmem>>, vector<16x1280xf32>
    tpu.vector_store %arg13[%c0_81, %c128_82], %78 {strides = array<i32>} : memref<16x1536xf32, #tpu.memory_space<vmem>>, vector<16x1280xf32>,
    %cst_83 = arith.constant 0.000000e+00 : f32
    %80 = vector.broadcast %cst_83 : f32 to vector<16x256xf32>
    %c0_84 = arith.constant 0 : index
    %c256_85 = arith.constant 256 : index
    %81 = vector.load %arg13[%c0_84, %c256_85] : memref<16x1536xf32, #tpu.memory_space<vmem>>, vector<16x256xf32>
    tpu.vector_store %arg13[%c0_84, %c256_85], %80 {strides = array<i32>} : memref<16x1536xf32, #tpu.memory_space<vmem>>, vector<16x256xf32>,
    %cst_86 = arith.constant 0.000000e+00 : f32
    %82 = vector.broadcast %cst_86 : f32 to vector<16x256xf32>
    %c0_87 = arith.constant 0 : index
    %c640_88 = arith.constant 640 : index
    %83 = vector.load %arg13[%c0_87, %c640_88] : memref<16x1536xf32, #tpu.memory_space<vmem>>, vector<16x256xf32>
    tpu.vector_store %arg13[%c0_87, %c640_88], %82 {strides = array<i32>} : memref<16x1536xf32, #tpu.memory_space<vmem>>, vector<16x256xf32>,
    %cst_89 = arith.constant 0.000000e+00 : f32
    %84 = vector.broadcast %cst_89 : f32 to vector<16x256xf32>
    %c0_90 = arith.constant 0 : index
    %c1024_91 = arith.constant 1024 : index
    %85 = vector.load %arg13[%c0_90, %c1024_91] : memref<16x1536xf32, #tpu.memory_space<vmem>>, vector<16x256xf32>
    tpu.vector_store %arg13[%c0_90, %c1024_91], %84 {strides = array<i32>} : memref<16x1536xf32, #tpu.memory_space<vmem>>, vector<16x256xf32>,
    %c0_92 = arith.constant 0 : index
    %c0_93 = arith.constant 0 : index
    %86 = vector.load %arg6[%c0_92, %c0_93] : memref<16x15xf32, #tpu.memory_space<vmem>>, vector<16x15xf32>
    %87 = vector.extract_strided_slice %86 {offsets = [0, 0], sizes = [16, 1], strides = [1, 1]} : vector<16x15xf32> to vector<16x1xf32>
    %c0_94 = arith.constant 0 : index
    %c121 = arith.constant 121 : index
    %88 = vector.load %arg13[%c0_94, %c121] : memref<16x1536xf32, #tpu.memory_space<vmem>>, vector<16x1280xf32>
    %89 = vector.broadcast %87 : vector<16x1xf32> to vector<16x1280xf32>
    %90 = arith.mulf %89, %88 : vector<16x1280xf32>
    %91 = vector.extract_strided_slice %86 {offsets = [0, 1], sizes = [16, 1], strides = [1, 1]} : vector<16x15xf32> to vector<16x1xf32>
    %c0_95 = arith.constant 0 : index
    %c122 = arith.constant 122 : index
    %92 = vector.load %arg13[%c0_95, %c122] : memref<16x1536xf32, #tpu.memory_space<vmem>>, vector<16x1280xf32>
    %93 = vector.broadcast %91 : vector<16x1xf32> to vector<16x1280xf32>
    %94 = arith.mulf %93, %92 : vector<16x1280xf32>
    %95 = arith.addf %90, %94 : vector<16x1280xf32>
    %96 = vector.extract_strided_slice %86 {offsets = [0, 2], sizes = [16, 1], strides = [1, 1]} : vector<16x15xf32> to vector<16x1xf32>
    %c0_96 = arith.constant 0 : index
    %c123 = arith.constant 123 : index
    %97 = vector.load %arg13[%c0_96, %c123] : memref<16x1536xf32, #tpu.memory_space<vmem>>, vector<16x1280xf32>
    %98 = vector.broadcast %96 : vector<16x1xf32> to vector<16x1280xf32>
    %99 = arith.mulf %98, %97 : vector<16x1280xf32>
    %100 = arith.addf %95, %99 : vector<16x1280xf32>
    %101 = vector.extract_strided_slice %86 {offsets = [0, 3], sizes = [16, 1], strides = [1, 1]} : vector<16x15xf32> to vector<16x1xf32>
    %c0_97 = arith.constant 0 : index
    %c124_98 = arith.constant 124 : index
    %102 = vector.load %arg13[%c0_97, %c124_98] : memref<16x1536xf32, #tpu.memory_space<vmem>>, vector<16x1280xf32>
    %103 = vector.broadcast %101 : vector<16x1xf32> to vector<16x1280xf32>
    %104 = arith.mulf %103, %102 : vector<16x1280xf32>
    %105 = arith.addf %100, %104 : vector<16x1280xf32>
    %106 = vector.extract_strided_slice %86 {offsets = [0, 4], sizes = [16, 1], strides = [1, 1]} : vector<16x15xf32> to vector<16x1xf32>
    %c0_99 = arith.constant 0 : index
    %c125_100 = arith.constant 125 : index
    %107 = vector.load %arg13[%c0_99, %c125_100] : memref<16x1536xf32, #tpu.memory_space<vmem>>, vector<16x1280xf32>
    %108 = vector.broadcast %106 : vector<16x1xf32> to vector<16x1280xf32>
    %109 = arith.mulf %108, %107 : vector<16x1280xf32>
    %110 = arith.addf %105, %109 : vector<16x1280xf32>
    %111 = vector.extract_strided_slice %86 {offsets = [0, 5], sizes = [16, 1], strides = [1, 1]} : vector<16x15xf32> to vector<16x1xf32>
    %c0_101 = arith.constant 0 : index
    %c126_102 = arith.constant 126 : index
    %112 = vector.load %arg13[%c0_101, %c126_102] : memref<16x1536xf32, #tpu.memory_space<vmem>>, vector<16x1280xf32>
    %113 = vector.broadcast %111 : vector<16x1xf32> to vector<16x1280xf32>
    %114 = arith.mulf %113, %112 : vector<16x1280xf32>
    %115 = arith.addf %110, %114 : vector<16x1280xf32>
    %116 = vector.extract_strided_slice %86 {offsets = [0, 6], sizes = [16, 1], strides = [1, 1]} : vector<16x15xf32> to vector<16x1xf32>
    %c0_103 = arith.constant 0 : index
    %c127_104 = arith.constant 127 : index
    %117 = vector.load %arg13[%c0_103, %c127_104] : memref<16x1536xf32, #tpu.memory_space<vmem>>, vector<16x1280xf32>
    %118 = vector.broadcast %116 : vector<16x1xf32> to vector<16x1280xf32>
    %119 = arith.mulf %118, %117 : vector<16x1280xf32>
    %120 = arith.addf %115, %119 : vector<16x1280xf32>
    %121 = vector.extract_strided_slice %86 {offsets = [0, 7], sizes = [16, 1], strides = [1, 1]} : vector<16x15xf32> to vector<16x1xf32>
    %c0_105 = arith.constant 0 : index
    %c128_106 = arith.constant 128 : index
    %122 = vector.load %arg13[%c0_105, %c128_106] : memref<16x1536xf32, #tpu.memory_space<vmem>>, vector<16x1280xf32>
    %123 = vector.broadcast %121 : vector<16x1xf32> to vector<16x1280xf32>
    %124 = arith.mulf %123, %122 : vector<16x1280xf32>
    %125 = arith.addf %120, %124 : vector<16x1280xf32>
    %126 = vector.extract_strided_slice %86 {offsets = [0, 8], sizes = [16, 1], strides = [1, 1]} : vector<16x15xf32> to vector<16x1xf32>
    %c0_107 = arith.constant 0 : index
    %c129_108 = arith.constant 129 : index
    %127 = vector.load %arg13[%c0_107, %c129_108] : memref<16x1536xf32, #tpu.memory_space<vmem>>, vector<16x1280xf32>
    %128 = vector.broadcast %126 : vector<16x1xf32> to vector<16x1280xf32>
    %129 = arith.mulf %128, %127 : vector<16x1280xf32>
    %130 = arith.addf %125, %129 : vector<16x1280xf32>
    %131 = vector.extract_strided_slice %86 {offsets = [0, 9], sizes = [16, 1], strides = [1, 1]} : vector<16x15xf32> to vector<16x1xf32>
    %c0_109 = arith.constant 0 : index
    %c130_110 = arith.constant 130 : index
    %132 = vector.load %arg13[%c0_109, %c130_110] : memref<16x1536xf32, #tpu.memory_space<vmem>>, vector<16x1280xf32>
    %133 = vector.broadcast %131 : vector<16x1xf32> to vector<16x1280xf32>
    %134 = arith.mulf %133, %132 : vector<16x1280xf32>
    %135 = arith.addf %130, %134 : vector<16x1280xf32>
    %136 = vector.extract_strided_slice %86 {offsets = [0, 10], sizes = [16, 1], strides = [1, 1]} : vector<16x15xf32> to vector<16x1xf32>
    %c0_111 = arith.constant 0 : index
    %c131_112 = arith.constant 131 : index
    %137 = vector.load %arg13[%c0_111, %c131_112] : memref<16x1536xf32, #tpu.memory_space<vmem>>, vector<16x1280xf32>
    %138 = vector.broadcast %136 : vector<16x1xf32> to vector<16x1280xf32>
    %139 = arith.mulf %138, %137 : vector<16x1280xf32>
    %140 = arith.addf %135, %139 : vector<16x1280xf32>
    %141 = vector.extract_strided_slice %86 {offsets = [0, 11], sizes = [16, 1], strides = [1, 1]} : vector<16x15xf32> to vector<16x1xf32>
    %c0_113 = arith.constant 0 : index
    %c132_114 = arith.constant 132 : index
    %142 = vector.load %arg13[%c0_113, %c132_114] : memref<16x1536xf32, #tpu.memory_space<vmem>>, vector<16x1280xf32>
    %143 = vector.broadcast %141 : vector<16x1xf32> to vector<16x1280xf32>
    %144 = arith.mulf %143, %142 : vector<16x1280xf32>
    %145 = arith.addf %140, %144 : vector<16x1280xf32>
    %146 = vector.extract_strided_slice %86 {offsets = [0, 12], sizes = [16, 1], strides = [1, 1]} : vector<16x15xf32> to vector<16x1xf32>
    %c0_115 = arith.constant 0 : index
    %c133 = arith.constant 133 : index
    %147 = vector.load %arg13[%c0_115, %c133] : memref<16x1536xf32, #tpu.memory_space<vmem>>, vector<16x1280xf32>
    %148 = vector.broadcast %146 : vector<16x1xf32> to vector<16x1280xf32>
    %149 = arith.mulf %148, %147 : vector<16x1280xf32>
    %150 = arith.addf %145, %149 : vector<16x1280xf32>
    %151 = vector.extract_strided_slice %86 {offsets = [0, 13], sizes = [16, 1], strides = [1, 1]} : vector<16x15xf32> to vector<16x1xf32>
    %c0_116 = arith.constant 0 : index
    %c134 = arith.constant 134 : index
    %152 = vector.load %arg13[%c0_116, %c134] : memref<16x1536xf32, #tpu.memory_space<vmem>>, vector<16x1280xf32>
    %153 = vector.broadcast %151 : vector<16x1xf32> to vector<16x1280xf32>
    %154 = arith.mulf %153, %152 : vector<16x1280xf32>
    %155 = arith.addf %150, %154 : vector<16x1280xf32>
    %156 = vector.extract_strided_slice %86 {offsets = [0, 14], sizes = [16, 1], strides = [1, 1]} : vector<16x15xf32> to vector<16x1xf32>
    %c0_117 = arith.constant 0 : index
    %c135 = arith.constant 135 : index
    %157 = vector.load %arg13[%c0_117, %c135] : memref<16x1536xf32, #tpu.memory_space<vmem>>, vector<16x1280xf32>
    %158 = vector.broadcast %156 : vector<16x1xf32> to vector<16x1280xf32>
    %159 = arith.mulf %158, %157 : vector<16x1280xf32>
    %160 = arith.addf %155, %159 : vector<16x1280xf32>
    %cst_118 = arith.constant dense<0.000000e+00> : vector<1280xf32>
    %161 = vector.multi_reduction <add>, %160, %cst_118 [0] : vector<16x1280xf32> to vector<1280xf32>
    %162 = vector.shape_cast %161 : vector<1280xf32> to vector<1x1280xf32>
    %c0_119 = arith.constant 0 : index
    %c0_120 = arith.constant 0 : index
    %163 = vector.load %arg7[%c0_119, %c0_120] : memref<1x1xf32, #tpu.memory_space<vmem>>, vector<1x1xf32>
    %164 = vector.broadcast %163 : vector<1x1xf32> to vector<1x1280xf32>
    %165 = arith.addf %162, %164 : vector<1x1280xf32>
    %166 = vector.extract_strided_slice %165 {offsets = [0, 0], sizes = [1, 128], strides = [1, 1]} : vector<1x1280xf32> to vector<1x128xf32>
    %c0_121 = arith.constant 0 : index
    %c0_122 = arith.constant 0 : index
    %c0_123 = arith.constant 0 : index
    %167 = vector.load %arg10[%c0_121, %c0_122, %c0_123] : memref<4x1x128xf32, #tpu.memory_space<vmem>>, vector<1x1x128xf32>
    %168 = vector.shape_cast %167 : vector<1x1x128xf32> to vector<1x128xf32>
    %169 = vector.shape_cast %166 : vector<1x128xf32> to vector<1x1x128xf32>
    tpu.vector_store %arg10[%c0_121, %c0_122, %c0_123], %169 {strides = array<i32>} : memref<4x1x128xf32, #tpu.memory_space<vmem>>, vector<1x1x128xf32>,
    %170 = vector.extract_strided_slice %165 {offsets = [0, 384], sizes = [1, 128], strides = [1, 1]} : vector<1x1280xf32> to vector<1x128xf32>
    %c1_124 = arith.constant 1 : index
    %c0_125 = arith.constant 0 : index
    %c0_126 = arith.constant 0 : index
    %171 = vector.load %arg10[%c1_124, %c0_125, %c0_126] : memref<4x1x128xf32, #tpu.memory_space<vmem>>, vector<1x1x128xf32>
    %172 = vector.shape_cast %171 : vector<1x1x128xf32> to vector<1x128xf32>
    %173 = vector.shape_cast %170 : vector<1x128xf32> to vector<1x1x128xf32>
    tpu.vector_store %arg10[%c1_124, %c0_125, %c0_126], %173 {strides = array<i32>} : memref<4x1x128xf32, #tpu.memory_space<vmem>>, vector<1x1x128xf32>,
    %174 = vector.extract_strided_slice %165 {offsets = [0, 768], sizes = [1, 128], strides = [1, 1]} : vector<1x1280xf32> to vector<1x128xf32>
    %c2_127 = arith.constant 2 : index
    %c0_128 = arith.constant 0 : index
    %c0_129 = arith.constant 0 : index
    %175 = vector.load %arg10[%c2_127, %c0_128, %c0_129] : memref<4x1x128xf32, #tpu.memory_space<vmem>>, vector<1x1x128xf32>
    %176 = vector.shape_cast %175 : vector<1x1x128xf32> to vector<1x128xf32>
    %177 = vector.shape_cast %174 : vector<1x128xf32> to vector<1x1x128xf32>
    tpu.vector_store %arg10[%c2_127, %c0_128, %c0_129], %177 {strides = array<i32>} : memref<4x1x128xf32, #tpu.memory_space<vmem>>, vector<1x1x128xf32>,
    %178 = vector.extract_strided_slice %165 {offsets = [0, 1152], sizes = [1, 128], strides = [1, 1]} : vector<1x1280xf32> to vector<1x128xf32>
    %c3_130 = arith.constant 3 : index
    %c0_131 = arith.constant 0 : index
    %c0_132 = arith.constant 0 : index
    %179 = vector.load %arg10[%c3_130, %c0_131, %c0_132] : memref<4x1x128xf32, #tpu.memory_space<vmem>>, vector<1x1x128xf32>
    %180 = vector.shape_cast %179 : vector<1x1x128xf32> to vector<1x128xf32>
    %181 = vector.shape_cast %178 : vector<1x128xf32> to vector<1x1x128xf32>
    tpu.vector_store %arg10[%c3_130, %c0_131, %c0_132], %181 {strides = array<i32>} : memref<4x1x128xf32, #tpu.memory_space<vmem>>, vector<1x1x128xf32>,
    %c0_133 = arith.constant 0 : index
    %c0_134 = arith.constant 0 : index
    %182 = vector.load %arg8[%c0_133, %c0_134] : memref<16x1xf32, #tpu.memory_space<vmem>>, vector<16x1xf32>
    %c0_135 = arith.constant 0 : index
    %c0_136 = arith.constant 0 : index
    %183 = vector.load %arg9[%c0_135, %c0_136] : memref<2x1xf32, #tpu.memory_space<vmem>>, vector<2x1xf32>
    %c0_137 = arith.constant 0 : index
    %c160 = arith.constant 160 : index
    %184 = vector.load %arg13[%c0_137, %c160] : memref<16x1536xf32, #tpu.memory_space<vmem>>, vector<8x64xf32>
    %cst_138 = arith.constant dense<0.000000e+00> : vector<8xf32>
    %185 = vector.multi_reduction <add>, %184, %cst_138 [1] : vector<8x64xf32> to vector<8xf32>
    %186 = vector.shape_cast %185 : vector<8xf32> to vector<8x1xf32>
    %cst_139 = arith.constant 6.400000e+01 : f32
    %187 = vector.broadcast %cst_139 : f32 to vector<8x1xf32>
    %188 = arith.divf %186, %187 : vector<8x1xf32>
    %c8 = arith.constant 8 : index
    %c144 = arith.constant 144 : index
    %189 = vector.load %arg13[%c8, %c144] : memref<16x1536xf32, #tpu.memory_space<vmem>>, vector<8x96xf32>
    %cst_140 = arith.constant dense<0.000000e+00> : vector<8xf32>
    %190 = vector.multi_reduction <add>, %189, %cst_140 [1] : vector<8x96xf32> to vector<8xf32>
    %191 = vector.shape_cast %190 : vector<8xf32> to vector<8x1xf32>
    %cst_141 = arith.constant 9.600000e+01 : f32
    %192 = vector.broadcast %cst_141 : f32 to vector<8x1xf32>
    %193 = arith.divf %191, %192 : vector<8x1xf32>
    %194 = vector.extract_strided_slice %182 {offsets = [0, 0], sizes = [8, 1], strides = [1, 1]} : vector<16x1xf32> to vector<8x1xf32>
    %195 = arith.mulf %194, %188 : vector<8x1xf32>
    %196 = vector.shape_cast %195 : vector<8x1xf32> to vector<1x8x1xf32>
    %cst_142 = arith.constant dense<0.000000e+00> : vector<1xf32>
    %197 = vector.multi_reduction <add>, %196, %cst_142 [1, 2] : vector<1x8x1xf32> to vector<1xf32>
    %198 = vector.shape_cast %197 : vector<1xf32> to vector<1x1x1xf32>
    %199 = vector.extract %198[0, 0, 0] : f32 from vector<1x1x1xf32>
    %200 = vector.broadcast %199 : f32 to vector<1x1xf32>
    %201 = vector.extract_strided_slice %183 {offsets = [0, 0], sizes = [1, 1], strides = [1, 1]} : vector<2x1xf32> to vector<1x1xf32>
    %202 = arith.addf %200, %201 : vector<1x1xf32>
    %203 = vector.extract_strided_slice %182 {offsets = [8, 0], sizes = [8, 1], strides = [1, 1]} : vector<16x1xf32> to vector<8x1xf32>
    %204 = arith.mulf %203, %193 : vector<8x1xf32>
    %205 = vector.shape_cast %204 : vector<8x1xf32> to vector<1x8x1xf32>
    %cst_143 = arith.constant dense<0.000000e+00> : vector<1xf32>
    %206 = vector.multi_reduction <add>, %205, %cst_143 [1, 2] : vector<1x8x1xf32> to vector<1xf32>
    %207 = vector.shape_cast %206 : vector<1xf32> to vector<1x1x1xf32>
    %208 = vector.extract %207[0, 0, 0] : f32 from vector<1x1x1xf32>
    %209 = vector.broadcast %208 : f32 to vector<1x1xf32>
    %210 = vector.extract_strided_slice %183 {offsets = [1, 0], sizes = [1, 1], strides = [1, 1]} : vector<2x1xf32> to vector<1x1xf32>
    %211 = arith.addf %209, %210 : vector<1x1xf32>
    %212 = arith.maximumf %202, %211 : vector<1x1xf32>
    %213 = arith.subf %202, %212 : vector<1x1xf32>
    %214 = math.exp %213 : vector<1x1xf32>
    %215 = arith.subf %211, %212 : vector<1x1xf32>
    %216 = math.exp %215 : vector<1x1xf32>
    %217 = arith.addf %214, %216 : vector<1x1xf32>
    %218 = math.log %217 : vector<1x1xf32>
    %219 = arith.addf %212, %218 : vector<1x1xf32>
    %c0_144 = arith.constant 0 : index
    %c0_145 = arith.constant 0 : index
    %c0_146 = arith.constant 0 : index
    %220 = vector.load %arg11[%c0_144, %c0_145, %c0_146] : memref<4x1x1xf32, #tpu.memory_space<vmem>>, vector<1x1x1xf32>
    %221 = vector.shape_cast %220 : vector<1x1x1xf32> to vector<1x1xf32>
    %222 = vector.shape_cast %219 : vector<1x1xf32> to vector<1x1x1xf32>
    tpu.vector_store %arg11[%c0_144, %c0_145, %c0_146], %222 {strides = array<i32>} : memref<4x1x1xf32, #tpu.memory_space<vmem>>, vector<1x1x1xf32>,
    %c0_147 = arith.constant 0 : index
    %c544 = arith.constant 544 : index
    %223 = vector.load %arg13[%c0_147, %c544] : memref<16x1536xf32, #tpu.memory_space<vmem>>, vector<8x64xf32>
    %cst_148 = arith.constant dense<0.000000e+00> : vector<8xf32>
    %224 = vector.multi_reduction <add>, %223, %cst_148 [1] : vector<8x64xf32> to vector<8xf32>
    %225 = vector.shape_cast %224 : vector<8xf32> to vector<8x1xf32>
    %cst_149 = arith.constant 6.400000e+01 : f32
    %226 = vector.broadcast %cst_149 : f32 to vector<8x1xf32>
    %227 = arith.divf %225, %226 : vector<8x1xf32>
    %c8_150 = arith.constant 8 : index
    %c528 = arith.constant 528 : index
    %228 = vector.load %arg13[%c8_150, %c528] : memref<16x1536xf32, #tpu.memory_space<vmem>>, vector<8x96xf32>
    %cst_151 = arith.constant dense<0.000000e+00> : vector<8xf32>
    %229 = vector.multi_reduction <add>, %228, %cst_151 [1] : vector<8x96xf32> to vector<8xf32>
    %230 = vector.shape_cast %229 : vector<8xf32> to vector<8x1xf32>
    %cst_152 = arith.constant 9.600000e+01 : f32
    %231 = vector.broadcast %cst_152 : f32 to vector<8x1xf32>
    %232 = arith.divf %230, %231 : vector<8x1xf32>
    %233 = vector.extract_strided_slice %182 {offsets = [0, 0], sizes = [8, 1], strides = [1, 1]} : vector<16x1xf32> to vector<8x1xf32>
    %234 = arith.mulf %233, %227 : vector<8x1xf32>
    %235 = vector.shape_cast %234 : vector<8x1xf32> to vector<1x8x1xf32>
    %cst_153 = arith.constant dense<0.000000e+00> : vector<1xf32>
    %236 = vector.multi_reduction <add>, %235, %cst_153 [1, 2] : vector<1x8x1xf32> to vector<1xf32>
    %237 = vector.shape_cast %236 : vector<1xf32> to vector<1x1x1xf32>
    %238 = vector.extract %237[0, 0, 0] : f32 from vector<1x1x1xf32>
    %239 = vector.broadcast %238 : f32 to vector<1x1xf32>
    %240 = vector.extract_strided_slice %183 {offsets = [0, 0], sizes = [1, 1], strides = [1, 1]} : vector<2x1xf32> to vector<1x1xf32>
    %241 = arith.addf %239, %240 : vector<1x1xf32>
    %242 = vector.extract_strided_slice %182 {offsets = [8, 0], sizes = [8, 1], strides = [1, 1]} : vector<16x1xf32> to vector<8x1xf32>
    %243 = arith.mulf %242, %232 : vector<8x1xf32>
    %244 = vector.shape_cast %243 : vector<8x1xf32> to vector<1x8x1xf32>
    %cst_154 = arith.constant dense<0.000000e+00> : vector<1xf32>
    %245 = vector.multi_reduction <add>, %244, %cst_154 [1, 2] : vector<1x8x1xf32> to vector<1xf32>
    %246 = vector.shape_cast %245 : vector<1xf32> to vector<1x1x1xf32>
    %247 = vector.extract %246[0, 0, 0] : f32 from vector<1x1x1xf32>
    %248 = vector.broadcast %247 : f32 to vector<1x1xf32>
    %249 = vector.extract_strided_slice %183 {offsets = [1, 0], sizes = [1, 1], strides = [1, 1]} : vector<2x1xf32> to vector<1x1xf32>
    %250 = arith.addf %248, %249 : vector<1x1xf32>
    %251 = arith.maximumf %241, %250 : vector<1x1xf32>
    %252 = arith.subf %241, %251 : vector<1x1xf32>
    %253 = math.exp %252 : vector<1x1xf32>
    %254 = arith.subf %250, %251 : vector<1x1xf32>
    %255 = math.exp %254 : vector<1x1xf32>
    %256 = arith.addf %253, %255 : vector<1x1xf32>
    %257 = math.log %256 : vector<1x1xf32>
    %258 = arith.addf %251, %257 : vector<1x1xf32>
    %c1_155 = arith.constant 1 : index
    %c0_156 = arith.constant 0 : index
    %c0_157 = arith.constant 0 : index
    %259 = vector.load %arg11[%c1_155, %c0_156, %c0_157] : memref<4x1x1xf32, #tpu.memory_space<vmem>>, vector<1x1x1xf32>
    %260 = vector.shape_cast %259 : vector<1x1x1xf32> to vector<1x1xf32>
    %261 = vector.shape_cast %258 : vector<1x1xf32> to vector<1x1x1xf32>
    tpu.vector_store %arg11[%c1_155, %c0_156, %c0_157], %261 {strides = array<i32>} : memref<4x1x1xf32, #tpu.memory_space<vmem>>, vector<1x1x1xf32>,
    %c0_158 = arith.constant 0 : index
    %c928 = arith.constant 928 : index
    %262 = vector.load %arg13[%c0_158, %c928] : memref<16x1536xf32, #tpu.memory_space<vmem>>, vector<8x64xf32>
    %cst_159 = arith.constant dense<0.000000e+00> : vector<8xf32>
    %263 = vector.multi_reduction <add>, %262, %cst_159 [1] : vector<8x64xf32> to vector<8xf32>
    %264 = vector.shape_cast %263 : vector<8xf32> to vector<8x1xf32>
    %cst_160 = arith.constant 6.400000e+01 : f32
    %265 = vector.broadcast %cst_160 : f32 to vector<8x1xf32>
    %266 = arith.divf %264, %265 : vector<8x1xf32>
    %c8_161 = arith.constant 8 : index
    %c912 = arith.constant 912 : index
    %267 = vector.load %arg13[%c8_161, %c912] : memref<16x1536xf32, #tpu.memory_space<vmem>>, vector<8x96xf32>
    %cst_162 = arith.constant dense<0.000000e+00> : vector<8xf32>
    %268 = vector.multi_reduction <add>, %267, %cst_162 [1] : vector<8x96xf32> to vector<8xf32>
    %269 = vector.shape_cast %268 : vector<8xf32> to vector<8x1xf32>
    %cst_163 = arith.constant 9.600000e+01 : f32
    %270 = vector.broadcast %cst_163 : f32 to vector<8x1xf32>
    %271 = arith.divf %269, %270 : vector<8x1xf32>
    %272 = vector.extract_strided_slice %182 {offsets = [0, 0], sizes = [8, 1], strides = [1, 1]} : vector<16x1xf32> to vector<8x1xf32>
    %273 = arith.mulf %272, %266 : vector<8x1xf32>
    %274 = vector.shape_cast %273 : vector<8x1xf32> to vector<1x8x1xf32>
    %cst_164 = arith.constant dense<0.000000e+00> : vector<1xf32>
    %275 = vector.multi_reduction <add>, %274, %cst_164 [1, 2] : vector<1x8x1xf32> to vector<1xf32>
    %276 = vector.shape_cast %275 : vector<1xf32> to vector<1x1x1xf32>
    %277 = vector.extract %276[0, 0, 0] : f32 from vector<1x1x1xf32>
    %278 = vector.broadcast %277 : f32 to vector<1x1xf32>
    %279 = vector.extract_strided_slice %183 {offsets = [0, 0], sizes = [1, 1], strides = [1, 1]} : vector<2x1xf32> to vector<1x1xf32>
    %280 = arith.addf %278, %279 : vector<1x1xf32>
    %281 = vector.extract_strided_slice %182 {offsets = [8, 0], sizes = [8, 1], strides = [1, 1]} : vector<16x1xf32> to vector<8x1xf32>
    %282 = arith.mulf %281, %271 : vector<8x1xf32>
    %283 = vector.shape_cast %282 : vector<8x1xf32> to vector<1x8x1xf32>
    %cst_165 = arith.constant dense<0.000000e+00> : vector<1xf32>
    %284 = vector.multi_reduction <add>, %283, %cst_165 [1, 2] : vector<1x8x1xf32> to vector<1xf32>
    %285 = vector.shape_cast %284 : vector<1xf32> to vector<1x1x1xf32>
    %286 = vector.extract %285[0, 0, 0] : f32 from vector<1x1x1xf32>
    %287 = vector.broadcast %286 : f32 to vector<1x1xf32>
    %288 = vector.extract_strided_slice %183 {offsets = [1, 0], sizes = [1, 1], strides = [1, 1]} : vector<2x1xf32> to vector<1x1xf32>
    %289 = arith.addf %287, %288 : vector<1x1xf32>
    %290 = arith.maximumf %280, %289 : vector<1x1xf32>
    %291 = arith.subf %280, %290 : vector<1x1xf32>
    %292 = math.exp %291 : vector<1x1xf32>
    %293 = arith.subf %289, %290 : vector<1x1xf32>
    %294 = math.exp %293 : vector<1x1xf32>
    %295 = arith.addf %292, %294 : vector<1x1xf32>
    %296 = math.log %295 : vector<1x1xf32>
    %297 = arith.addf %290, %296 : vector<1x1xf32>
    %c2_166 = arith.constant 2 : index
    %c0_167 = arith.constant 0 : index
    %c0_168 = arith.constant 0 : index
    %298 = vector.load %arg11[%c2_166, %c0_167, %c0_168] : memref<4x1x1xf32, #tpu.memory_space<vmem>>, vector<1x1x1xf32>
    %299 = vector.shape_cast %298 : vector<1x1x1xf32> to vector<1x1xf32>
    %300 = vector.shape_cast %297 : vector<1x1xf32> to vector<1x1x1xf32>
    tpu.vector_store %arg11[%c2_166, %c0_167, %c0_168], %300 {strides = array<i32>} : memref<4x1x1xf32, #tpu.memory_space<vmem>>, vector<1x1x1xf32>,
    %c0_169 = arith.constant 0 : index
    %c1312 = arith.constant 1312 : index
    %301 = vector.load %arg13[%c0_169, %c1312] : memref<16x1536xf32, #tpu.memory_space<vmem>>, vector<8x64xf32>
    %cst_170 = arith.constant dense<0.000000e+00> : vector<8xf32>
    %302 = vector.multi_reduction <add>, %301, %cst_170 [1] : vector<8x64xf32> to vector<8xf32>
    %303 = vector.shape_cast %302 : vector<8xf32> to vector<8x1xf32>
    %cst_171 = arith.constant 6.400000e+01 : f32
    %304 = vector.broadcast %cst_171 : f32 to vector<8x1xf32>
    %305 = arith.divf %303, %304 : vector<8x1xf32>
    %c8_172 = arith.constant 8 : index
    %c1296 = arith.constant 1296 : index
    %306 = vector.load %arg13[%c8_172, %c1296] : memref<16x1536xf32, #tpu.memory_space<vmem>>, vector<8x96xf32>
    %cst_173 = arith.constant dense<0.000000e+00> : vector<8xf32>
    %307 = vector.multi_reduction <add>, %306, %cst_173 [1] : vector<8x96xf32> to vector<8xf32>
    %308 = vector.shape_cast %307 : vector<8xf32> to vector<8x1xf32>
    %cst_174 = arith.constant 9.600000e+01 : f32
    %309 = vector.broadcast %cst_174 : f32 to vector<8x1xf32>
    %310 = arith.divf %308, %309 : vector<8x1xf32>
    %311 = vector.extract_strided_slice %182 {offsets = [0, 0], sizes = [8, 1], strides = [1, 1]} : vector<16x1xf32> to vector<8x1xf32>
    %312 = arith.mulf %311, %305 : vector<8x1xf32>
    %313 = vector.shape_cast %312 : vector<8x1xf32> to vector<1x8x1xf32>
    %cst_175 = arith.constant dense<0.000000e+00> : vector<1xf32>
    %314 = vector.multi_reduction <add>, %313, %cst_175 [1, 2] : vector<1x8x1xf32> to vector<1xf32>
    %315 = vector.shape_cast %314 : vector<1xf32> to vector<1x1x1xf32>
    %316 = vector.extract %315[0, 0, 0] : f32 from vector<1x1x1xf32>
    %317 = vector.broadcast %316 : f32 to vector<1x1xf32>
    %318 = vector.extract_strided_slice %183 {offsets = [0, 0], sizes = [1, 1], strides = [1, 1]} : vector<2x1xf32> to vector<1x1xf32>
    %319 = arith.addf %317, %318 : vector<1x1xf32>
    %320 = vector.extract_strided_slice %182 {offsets = [8, 0], sizes = [8, 1], strides = [1, 1]} : vector<16x1xf32> to vector<8x1xf32>
    %321 = arith.mulf %320, %310 : vector<8x1xf32>
    %322 = vector.shape_cast %321 : vector<8x1xf32> to vector<1x8x1xf32>
    %cst_176 = arith.constant dense<0.000000e+00> : vector<1xf32>
    %323 = vector.multi_reduction <add>, %322, %cst_176 [1, 2] : vector<1x8x1xf32> to vector<1xf32>
    %324 = vector.shape_cast %323 : vector<1xf32> to vector<1x1x1xf32>
    %325 = vector.extract %324[0, 0, 0] : f32 from vector<1x1x1xf32>
    %326 = vector.broadcast %325 : f32 to vector<1x1xf32>
    %327 = vector.extract_strided_slice %183 {offsets = [1, 0], sizes = [1, 1], strides = [1, 1]} : vector<2x1xf32> to vector<1x1xf32>
    %328 = arith.addf %326, %327 : vector<1x1xf32>
    %329 = arith.maximumf %319, %328 : vector<1x1xf32>
    %330 = arith.subf %319, %329 : vector<1x1xf32>
    %331 = math.exp %330 : vector<1x1xf32>
    %332 = arith.subf %328, %329 : vector<1x1xf32>
    %333 = math.exp %332 : vector<1x1xf32>
    %334 = arith.addf %331, %333 : vector<1x1xf32>
    %335 = math.log %334 : vector<1x1xf32>
    %336 = arith.addf %329, %335 : vector<1x1xf32>
    %c3_177 = arith.constant 3 : index
    %c0_178 = arith.constant 0 : index
    %c0_179 = arith.constant 0 : index
    %337 = vector.load %arg11[%c3_177, %c0_178, %c0_179] : memref<4x1x1xf32, #tpu.memory_space<vmem>>, vector<1x1x1xf32>
    %338 = vector.shape_cast %337 : vector<1x1x1xf32> to vector<1x1xf32>
    %339 = vector.shape_cast %336 : vector<1x1xf32> to vector<1x1x1xf32>
    tpu.vector_store %arg11[%c3_177, %c0_178, %c0_179], %339 {strides = array<i32>} : memref<4x1x1xf32, #tpu.memory_space<vmem>>, vector<1x1x1xf32>,
    return
  }
  func.func @transform_0(%arg0: i32) -> (i32, i32, i32) {
    %c0_i32 = arith.constant 0 : i32
    %c0_i32_0 = arith.constant 0 : i32
    %c0_i32_1 = arith.constant 0 : i32
    return %arg0, %c0_i32, %c0_i32_0 : i32, i32, i32
  }
  func.func @transform_1(%arg0: i32) -> (i32, i32) {
    %c0_i32 = arith.constant 0 : i32
    %c0_i32_0 = arith.constant 0 : i32
    %c0_i32_1 = arith.constant 0 : i32
    return %c0_i32, %c0_i32_0 : i32, i32
  }
  func.func @transform_2(%arg0: i32) -> (i32, i32) {
    %c0_i32 = arith.constant 0 : i32
    %c0_i32_0 = arith.constant 0 : i32
    %c0_i32_1 = arith.constant 0 : i32
    return %c0_i32, %c0_i32_0 : i32, i32
  }
  func.func @transform_3(%arg0: i32) -> (i32, i32, i32) {
    %c0_i32 = arith.constant 0 : i32
    %c0_i32_0 = arith.constant 0 : i32
    %c0_i32_1 = arith.constant 0 : i32
    %c0_i32_2 = arith.constant 0 : i32
    return %c0_i32, %c0_i32_0, %c0_i32_1 : i32, i32, i32
  }
  func.func @transform_4(%arg0: i32) -> (i32, i32, i32) {
    %c0_i32 = arith.constant 0 : i32
    %c0_i32_0 = arith.constant 0 : i32
    %c0_i32_1 = arith.constant 0 : i32
    %c0_i32_2 = arith.constant 0 : i32
    return %c0_i32, %c0_i32_0, %c0_i32_1 : i32, i32, i32
  }
  func.func @transform_5(%arg0: i32) -> (i32, i32) {
    %c0_i32 = arith.constant 0 : i32
    %c0_i32_0 = arith.constant 0 : i32
    %c0_i32_1 = arith.constant 0 : i32
    return %c0_i32, %c0_i32_0 : i32, i32
  }
  func.func @transform_6(%arg0: i32) -> (i32, i32) {
    %c0_i32 = arith.constant 0 : i32
    %c0_i32_0 = arith.constant 0 : i32
    %c0_i32_1 = arith.constant 0 : i32
    return %c0_i32, %c0_i32_0 : i32, i32
  }
  func.func @transform_7(%arg0: i32) -> (i32, i32) {
    %c0_i32 = arith.constant 0 : i32
    %c0_i32_0 = arith.constant 0 : i32
    %c0_i32_1 = arith.constant 0 : i32
    return %c0_i32, %c0_i32_0 : i32, i32
  }
  func.func @transform_8(%arg0: i32) -> (i32, i32) {
    %c0_i32 = arith.constant 0 : i32
    %c0_i32_0 = arith.constant 0 : i32
    %c0_i32_1 = arith.constant 0 : i32
    return %c0_i32, %c0_i32_0 : i32, i32
  }
  func.func @transform_9(%arg0: i32) -> (i32, i32, i32) {
    %c0_i32 = arith.constant 0 : i32
    %c0_i32_0 = arith.constant 0 : i32
    %c0_i32_1 = arith.constant 0 : i32
    return %arg0, %c0_i32, %c0_i32_0 : i32, i32, i32
  }
  func.func @transform_10(%arg0: i32) -> (i32, i32, i32) {
    %c0_i32 = arith.constant 0 : i32
    %c0_i32_0 = arith.constant 0 : i32
    %c0_i32_1 = arith.constant 0 : i32
    return %arg0, %c0_i32, %c0_i32_0 : i32, i32, i32
  }
}

</mosaic_0001>

<bundles_post_ra>
// kernel: tpu_custom_call.1
= control target key start
LH: loop header
LB: loop body
LE: loop exit
PB: predicated region body
PF: predicated region fallthrough
CT: control target
= control target key end

     0   :  { %s8999_s0 = inlined_call_operand.vmem [shape: f32[4,4,128], index: 0, kind: input, shape index: {}]   ;;  %s9000_s1 = inlined_call_operand.vmem [shape: bf16[16,56], index: 1, kind: input, shape index: {}]   ;;  %s9001_s2 = inlined_call_operand.vmem [shape: f32[16,1], index: 2, kind: input, shape index: {}]   ;;  %s9002_s3 = inlined_call_operand.vmem [shape: bf16[2,16,48], index: 3, kind: input, shape index: {}]   ;;  %s9003_s4 = inlined_call_operand.vmem [shape: f32[2,16,1], index: 4, kind: input, shape index: {}]   ;;  %s9004_s5 = inlined_call_operand.vmem [shape: f32[16,15], index: 5, kind: input, shape index: {}]   ;;  %s9005_s6 = inlined_call_operand.<no memory space> [shape: f32[1,1], index: 6, kind: input, shape index: {}]   ;;  %s9006_s7 = inlined_call_operand.vmem [shape: f32[16,1], index: 7, kind: input, shape index: {}]   ;;  %s9007_s8 = inlined_call_operand.vmem [shape: f32[2,1], index: 8, kind: input, shape index: {}]   ;;  %s9008_s9 = inlined_call_operand.hbm [shape: f32[4,1,128], index: 9, kind: output, shape index: {0}]   ;;  %s9009_s10 = inlined_call_operand.vmem [shape: f32[4,1,1], index: 10, kind: output, shape index: {1}]  }
   0x1   :  { %v16_v0 = vstv %s9005_s6 }
   0x2   :  { %17 = vst [vmem:[#allocation4] sm:$0x1] %v16_v0 }
   0x3   :  { %v4918_v1 = vld [vmem:[%s8999_s0 + $0x4] sm:$0xf]  ;;  %v4919_v2 = vld [vmem:[%s8999_s0 + $0x8] sm:$0xf]  ;;  %v5453_v3 = vmov 0.0   ;;  %s5454_s22 = smov 127  }
   0x4   :  { %40 = vst [vmem:[#allocation2 + $0x10] sm:$0xff] %v5453_v3  ;;  %39 = vst [vmem:[#allocation2 + $0x8] sm:$0xff] %v5453_v3  ;;  %v50_v4 = vld [vmem:[%s8999_s0] sm:$0xf]  ;;  %v4920_v5 = vld [vmem:[%s8999_s0 + $0xc] sm:$0xf]  ;;  %5008 = vrot.lane.b32.xlu0 %v5453_v3, %s5454_s22 }
   0x5   :  { %42 = vst [vmem:[#allocation2 + $0x20] sm:$0xff] %v5453_v3  ;;  %45 = vst [vmem:[#allocation2 + $0x38] sm:$0xff] %v5453_v3  ;;  %v9010_v6 = vmov 0  }
   0x6   :  { %48 = vst [vmem:[#allocation2 + $0x50] sm:$0xff] %v5453_v3  ;;  %54 = vst [vmem:[#allocation2 + $0x20] sm:$0xf] %v4918_v1  ;;  %5157 = vset.pattern.permute.xlu1 %v9010_v6  ;;  %5158 = vset.pattern.permute.xlu0 %v9010_v6 }
   0x7   :  { %57 = vst [vmem:[#allocation2 + $0x38] sm:$0xf] %v4919_v2  ;;  %51 = vst [vmem:[#allocation2 + $0x8] sm:$0xf] %v50_v4  ;;  %703 = vmatprep.mubr.bf16.mxu0 %v9010_v6  ;;  %746 = vmatprep.mubr.bf16.mxu1 %v9010_v6 }
   0x8   :  { %60 = vst [vmem:[#allocation2 + $0x50] sm:$0xf] %v4920_v5 }
   0x9   :  { %18 = vsyncpa [#allocation6], 0  ;;  %5013 = vrot.lane.b32.xlu0 %v5453_v3, %s5454_s22  ;;  %s5456_s0 = smov 126   ;;  %s5457_s23 = smov 125   ;;  %v417_v18 = vld [vmem:[%s9001_s2 + $0x8] sm:$0xff]  ;;  %v416_v19 = vld [vmem:[%s9001_s2] sm:$0xff] }
   0xa   :  { %s5458_s24 = smov 124   ;;  %s5459_s25 = smov 123   ;;  %vm122_vm0 = vcmask 1039360   ;;  %vm166_vm1 = vcmask 1031168   ;;  %vm208_vm2 = vcmask 1022976   ;;  %vm262_vm3 = vcmask 1014784  }
   0xb   :  { %s5460_s26 = smov 122   ;;  %s5461_s2 = smov 3   ;;  %vm306_vm4 = vcmask 1006592   ;;  %vm350_vm5 = vcmask 998400   ;;  %vm565_vm6 = vcmask 23552   ;;  %vm640_vm7 = vcmask 1043456  }
   0xc   :  { %s5463_s15 = smov 2   ;;  %vm636_vm8 = vcmask 457728   ;;  %vm1341_vm9 = vcmask 15360   ;;  %s5465_s19 = smov 4   ;;  %vm1402_vm10 = vcmask 392192   ;;  %vm2099_vm11 = vcmask 31744  }
   0xd   :  { %v5576_v7 = vld [vmem:[#allocation2 + $0x20] sm:$0xff]  ;;  %vm1906_vm12 = vcmask 982016   ;;  %s5477_s11 = smov 119   ;;  %s5479_s12 = smov 118   ;;  %vm3440_vm13 = vcmask 990208   ;;  %vm3745_vm14 = vcmask 973824  }
   0xe   :  { %v5578_v8 = vld [vmem:[#allocation2 + $0x38] sm:$0xff]  ;;  %v5580_v9 = vld [vmem:[#allocation2 + $0x8] sm:$0xff]  ;;  %v5022_v10 = vpack.i.bf16 %v5453_v3, %v5576_v7  ;;  %v5062_v15 = vpack.i.bf16 %v5576_v7, %v5453_v3  ;;  %s5481_s13 = smov 117   ;;  %s5483_s14 = smov 116   ;;  %vm3888_vm15 = vcmask 965632  }
   0xf   :  { %v5017_v11 = vpack.i.bf16 %v5580_v9, %v5453_v3  ;;  %v5027_v12 = vpack.i.bf16 %v5578_v8, %v5453_v3  ;;  %v5592_v13 = vld [vmem:[#allocation2 + $0x50] sm:$0xff]  ;;  %v5057_v14 = vpack.i.bf16 %v5453_v3, %v5580_v9  ;;  %v5072_v17 = vpack.i.bf16 %v5453_v3, %v5578_v8  ;;  %s5488_s27 = smov 112  }
  0x10   :  { %5023 = vrot.lane.b32.xlu1 %v5022_v10, %s5454_s22  ;;  %v5077_v16 = vpack.i.bf16 %v5592_v13, %v5453_v3 }
  0x11   :  { %5018 = vrot.lane.b32.xlu0 %v5017_v11, %s5454_s22 }
  0x14   :  { %5028 = vrot.lane.b32.xlu1 %v5027_v12, %s5454_s22 }
  0x15   :  { %5033 = vrot.lane.b32.xlu0 %v5017_v11, %s5456_s0 }
  0x18   :  { %120 = vrot.lane.b32.xlu1 %v5592_v13, %s5454_s22 }
  0x19   :  { %5043 = vrot.lane.b32.xlu0 %v5022_v10, %s5456_s0 }
  0x1c   :  { %5038 = vrot.lane.b32.xlu1 %v5453_v3, %s5456_s0 }
  0x1d   :  { %5053 = vrot.lane.b32.xlu0 %v5453_v3, %s5456_s0 }
  0x20   :  { %5048 = vrot.lane.b32.xlu1 %v5027_v12, %s5456_s0 }
  0x21   :  { %5058 = vrot.lane.b32.xlu0 %v5057_v14, %s5457_s23 }
  0x24   :  { %164 = vrot.lane.b32.xlu1 %v5592_v13, %s5456_s0 }
  0x25   :  { %5068 = vrot.lane.b32.xlu0 %v5453_v3, %s5457_s23 }
  0x28   :  { %5063 = vrot.lane.b32.xlu1 %v5062_v15, %s5457_s23 }
  0x29   :  { %5078 = vrot.lane.b32.xlu0 %v5077_v16, %s5457_s23 }
  0x2c   :  { %5073 = vrot.lane.b32.xlu1 %v5072_v17, %s5457_s23 }
  0x2d   :  { %5088 = vrot.lane.b32.xlu0 %v5062_v15, %s5458_s24 }
  0x30   :  { %5083 = vrot.lane.b32.xlu1 %v5057_v14, %s5458_s24 }
  0x31   :  { %5098 = vrot.lane.b32.xlu0 %v5072_v17, %s5458_s24 }
  0x34   :  { %5093 = vrot.lane.b32.xlu1 %v5453_v3, %s5458_s24 }
  0x35   :  { %260 = vrot.lane.b32.xlu0 %v5453_v3, %s5458_s24 }
  0x38   :  { %5103 = vrot.lane.b32.xlu1 %v5077_v16, %s5458_s24 }
  0x39   :  { %5113 = vrot.lane.b32.xlu0 %v5062_v15, %s5459_s25 }
  0x3c   :  { %5108 = vrot.lane.b32.xlu1 %v5057_v14, %s5459_s25 }
  0x3d   :  { %5123 = vrot.lane.b32.xlu0 %v5072_v17, %s5459_s25 }
  0x40   :  { %5118 = vrot.lane.b32.xlu1 %v5453_v3, %s5459_s25 }
  0x41   :  { %304 = vrot.lane.b32.xlu0 %v5453_v3, %s5459_s25 }
  0x44   :  { %5128 = vrot.lane.b32.xlu1 %v5077_v16, %s5459_s25 }
  0x45   :  { %5138 = vrot.lane.b32.xlu0 %v5062_v15, %s5460_s26 }
  0x48   :  { %5133 = vrot.lane.b32.xlu1 %v5057_v14, %s5460_s26 }
  0x49   :  { %5148 = vrot.lane.b32.xlu0 %v5072_v17, %s5460_s26 }
  0x4c   :  { %5143 = vrot.lane.b32.xlu1 %v5453_v3, %s5460_s26 }
  0x4d   :  { %348 = vrot.lane.b32.xlu0 %v5453_v3, %s5460_s26 }
  0x50   :  { %5153 = vrot.lane.b32.xlu1 %v5077_v16, %s5460_s26 }
  0x51   :  { %425 = vperm.xlu0 %5158, %v417_v18  }
  0x54   :  { %420 = vperm.xlu1 %5157, %v416_v19  }
  0x76   :  { %v5648_v20 = vpop.permute.xlu0 %5008 }
  0x77   :  { %v5011_v21 = vunpack.i.h.bf16 %v5648_v20  ;;  %v5010_v22 = vunpack.i.l.bf16 %v5648_v20 }
  0x79   :  { %v125_v23 = vsel %vm122_vm0, %v5010_v22, %v5011_v21 }
  0x7a   :  { %v374_v25 = vpack.c.bf16 %v125_v23, %v5453_v3 }
  0x7b   :  { %v5657_v24 = vpop.permute.xlu0 %5013 }
  0x7c   :  { %v5016_v26 = vunpack.i.h.bf16 %v5657_v24  ;;  %v5015_v27 = vunpack.i.l.bf16 %v5657_v24  ;;  %481 = vrot.lane.b32.xlu0 %v374_v25, %s5461_s2 }
  0x7e   :  { %v131_v28 = vsel %vm122_vm0, %v5015_v27, %v5016_v26 }
  0x7f   :  { %v380_v29 = vpack.c.bf16 %v131_v28, %v5453_v3 }
  0x81   :  { %493 = vrot.lane.b32.xlu0 %v380_v29, %s5461_s2 }
  0x82   :  { %v5669_v30 = vpop.permute.xlu1 %5023 }
  0x83   :  { %v5671_v31 = vpop.permute.xlu0 %5018  ;;  %v5026_v34 = vunpack.i.h.bf16 %v5669_v30  ;;  %v5025_v28 = vunpack.i.l.bf16 %v5669_v30 }
  0x84   :  { %v5020_v16 = vunpack.i.l.bf16 %v5671_v31  ;;  %v5021_v17 = vunpack.i.h.bf16 %v5671_v31 }
  0x86   :  { %v5674_v32 = vpop.permute.xlu1 %5028  ;;  %v123_v25 = vsel %vm122_vm0, %v5020_v16, %v5021_v17  ;;  %v124_v31 = vsel %vm122_vm0, %v5021_v17, %v5010_v22 }
  0x87   :  { %v5676_v33 = vpop.permute.xlu0 %5033  ;;  %v5030_v35 = vunpack.i.l.bf16 %v5674_v32 }
  0x89   :  { %v128_v36 = vsel %vm122_vm0, %v5026_v34, %v5030_v35 }
  0x8a   :  { %v5685_v37 = vpop.permute.xlu1 %120  ;;  %v377_v38 = vpack.c.bf16 %v128_v36, %v5453_v3  ;;  %v372_v36 = vpack.c.bf16 %v123_v25, %v5453_v3 }
  0x8b   :  { %v5688_v39 = vpop.permute.xlu0 %5043  ;;  %v382_v40 = vpack.c.bf16 %v5685_v37, %v5592_v13 }
  0x8c   :  { %487 = vrot.lane.b32.xlu1 %v377_v38, %s5461_s2  ;;  %v5046_v45 = vunpack.i.h.bf16 %v5688_v39 }
  0x8d   :  { %497 = vrot.lane.b32.xlu0 %v382_v40, %s5461_s2 }
  0x8e   :  { %v5694_v41 = vpop.permute.xlu1 %5038 }
  0x8f   :  { %v5696_v42 = vpop.permute.xlu0 %5053  ;;  %v5041_v51 = vunpack.i.h.bf16 %v5694_v41  ;;  %v5040_v52 = vunpack.i.l.bf16 %v5694_v41 }
  0x90   :  { %v5056_v60 = vunpack.i.h.bf16 %v5696_v42  ;;  %v5055_v2 = vunpack.i.l.bf16 %v5696_v42 }
  0x91   :  { %v169_v61 = vsel %vm166_vm1, %v5040_v52, %v5041_v51 }
  0x92   :  { %v5698_v43 = vpop.permute.xlu1 %5048  ;;  %v175_v10 = vsel %vm166_vm1, %v5055_v2, %v5056_v60 }
  0x93   :  { %v5700_v44 = vpop.permute.xlu0 %5058  ;;  %v5050_v46 = vunpack.i.l.bf16 %v5698_v43 }
  0x94   :  { %v5061_v58 = vunpack.i.h.bf16 %v5700_v44 }
  0x95   :  { %v172_v53 = vsel %vm166_vm1, %v5046_v45, %v5050_v46 }
  0x96   :  { %v5704_v47 = vpop.permute.xlu1 %164 }
  0x97   :  { %v5706_v48 = vpop.permute.xlu0 %5068 }
  0x98   :  { %v5071_v49 = vunpack.i.h.bf16 %v5706_v48  ;;  %v5070_v50 = vunpack.i.l.bf16 %v5706_v48 }
  0x9a   :  { %v213_v54 = vsel %vm208_vm2, %v5070_v50, %v5071_v49  ;;  %v5722_v55 = vpop.permute.xlu1 %5063 }
  0x9b   :  { %v5724_v56 = vpop.permute.xlu0 %5078  ;;  %v388_v57 = vpack.c.bf16 %v213_v54, %v172_v53  ;;  %v5065_v59 = vunpack.i.l.bf16 %v5722_v55  ;;  %v373_v53 = vpack.c.bf16 %v124_v31, %v5580_v9  ;;  %v126_v54 = vsel %vm122_vm0, %v5011_v21, %v5025_v28 }
  0x9c   :  { %v5080_v5 = vunpack.i.l.bf16 %v5724_v56  ;;  %v5081_v12 = vunpack.i.h.bf16 %v5724_v56  ;;  %v5035_v31 = vunpack.i.l.bf16 %v5676_v33 }
  0x9d   :  { %509 = vrot.lane.b32.xlu0 %v388_v57, %s5461_s2  ;;  %v210_v62 = vsel %vm208_vm2, %v5061_v58, %v5065_v59  ;;  %v5031_v57 = vunpack.i.h.bf16 %v5674_v32 }
  0x9e   :  { %v5740_v63 = vpop.permute.xlu1 %5073  ;;  %v385_v0 = vpack.c.bf16 %v210_v62, %v169_v61  ;;  %v393_v19 = vpack.c.bf16 %v5081_v12, %v5704_v47 }
  0x9f   :  { %v5742_v1 = vpop.permute.xlu0 %5088  ;;  %v5076_v4 = vunpack.i.h.bf16 %v5740_v63 }
  0xa0   :  { %503 = vrot.lane.b32.xlu1 %v385_v0, %s5461_s2  ;;  %v5090_v22 = vunpack.i.l.bf16 %v5742_v1 }
  0xa1   :  { %v216_v11 = vsel %vm208_vm2, %v5076_v4, %v5080_v5 }
  0xa2   :  { %v5759_v13 = vpop.permute.xlu1 %5083  ;;  %v391_v14 = vpack.c.bf16 %v216_v11, %v175_v10 }
  0xa3   :  { %v5761_v15 = vpop.permute.xlu0 %5098  ;;  %v5085_v61 = vunpack.i.l.bf16 %v5759_v13  ;;  %v5086_v10 = vunpack.i.h.bf16 %v5759_v13  ;;  %v130_v13 = vsel %vm122_vm0, %v5031_v57, %v5015_v27  ;;  %v5036_v27 = vunpack.i.h.bf16 %v5676_v33 }
  0xa4   :  { %515 = vrot.lane.b32.xlu1 %v391_v14, %s5461_s2  ;;  %v375_v14 = vpack.c.bf16 %v126_v54, %v5453_v3  ;;  %v379_v25 = vpack.c.bf16 %v130_v13, %v5578_v8  ;;  %v5066_v8 = vunpack.i.h.bf16 %v5722_v55 }
  0xa5   :  { %v264_v16 = vsel %vm262_vm3, %v5086_v10, %v5090_v22 }
  0xa6   :  { %v5766_v18 = vpop.permute.xlu1 %5093  ;;  %v212_v13 = vsel %vm208_vm2, %v5066_v8, %v5070_v50 }
  0xa7   :  { %v5771_v23 = vpop.permute.xlu0 %260  ;;  %v5096_v42 = vunpack.i.h.bf16 %v5766_v18 }
  0xa8   :  { %519 = vrot.lane.b32.xlu1 %v393_v19, %s5461_s2 }
  0xaa   :  { %v5776_v29 = vpop.permute.xlu1 %5103 }
  0xab   :  { %v5783_v38 = vpop.permute.xlu0 %5113 }
  0xac   :  { %477 = vrot.lane.b32.xlu1 %v372_v36, %s5461_s2  ;;  %v5115_v11 = vunpack.i.l.bf16 %v5783_v38  ;;  %v132_v36 = vsel %vm122_vm0, %v5016_v26, %v5685_v37  ;;  %v167_v37 = vsel %vm166_vm1, %v5035_v31, %v5036_v27 }
  0xad   :  { %v381_v54 = vpack.c.bf16 %v132_v36, %v5453_v3 }
  0xae   :  { %v5109_v40 = vpop.permute.xlu1 %5108 }
  0xaf   :  { %v5111_v62 = vunpack.i.h.bf16 %v5109_v40  ;;  %v5110_v0 = vunpack.i.l.bf16 %v5109_v40  ;;  %v5060_v40 = vunpack.i.l.bf16 %v5700_v44 }
  0xb0   :  { %479 = vrot.lane.b32.xlu1 %v373_v53, %s5461_s2 }
  0xb1   :  { %v394_v9 = vpack.c.bf16 %v5110_v0, %v5085_v61  ;;  %v308_v21 = vsel %vm306_vm4, %v5111_v62, %v5115_v11  ;;  %v383_v33 = vpack.c.bf16 %v5060_v40, %v167_v37  ;;  %v209_v32 = vsel %vm208_vm2, %v5060_v40, %v5061_v58 }
  0xb2   :  { %v5795_v20 = vpop.permute.xlu1 %5118  ;;  %v396_v17 = vpack.c.bf16 %v308_v21, %v264_v16  ;;  %v5045_v21 = vunpack.i.l.bf16 %v5688_v39  ;;  %v5051_v16 = vunpack.i.h.bf16 %v5698_v43  ;;  %v307_v48 = vsel %vm306_vm4, %v5110_v0, %v5111_v62 }
  0xb3   :  { %521 = vrot.lane.b32.xlu0 %v394_v9, %s5461_s2  ;;  %v127_v9 = vsel %vm122_vm0, %v5025_v28, %v5026_v34  ;;  %v129_v34 = vsel %vm122_vm0, %v5030_v35, %v5031_v57  ;;  %v5091_v43 = vunpack.i.h.bf16 %v5742_v1  ;;  %v263_v58 = vsel %vm262_vm3, %v5085_v61, %v5086_v10 }
  0xb4   :  { %483 = vrot.lane.b32.xlu1 %v375_v14, %s5461_s2  ;;  %v5075_v14 = vunpack.i.l.bf16 %v5740_v63  ;;  %v171_v30 = vsel %vm166_vm1, %v5045_v21, %v5046_v45  ;;  %v173_v39 = vsel %vm166_vm1, %v5050_v46, %v5051_v16  ;;  %v5116_v45 = vunpack.i.h.bf16 %v5783_v38 }
  0xb5   :  { %v387_v28 = vpack.c.bf16 %v212_v13, %v171_v30  ;;  %v211_v57 = vsel %vm208_vm2, %v5065_v59, %v5066_v8  ;;  %v395_v36 = vpack.c.bf16 %v307_v48, %v263_v58  ;;  %v170_v61 = vsel %vm166_vm1, %v5041_v51, %v5045_v21 }
  0xb6   :  { %v5809_v19 = vpop.permute.xlu1 %5128  ;;  %v214_v50 = vsel %vm208_vm2, %v5071_v49, %v5075_v14  ;;  %v168_v49 = vsel %vm166_vm1, %v5036_v27, %v5040_v52  ;;  %v265_v52 = vsel %vm262_vm3, %v5090_v22, %v5091_v43  ;;  %v309_v0 = vsel %vm306_vm4, %v5115_v11, %v5116_v45 }
  0xb7   :  { %525 = vrot.lane.b32.xlu0 %v396_v17, %s5461_s2  ;;  %v376_v17 = vpack.c.bf16 %v127_v9, %v5576_v7  ;;  %v378_v7 = vpack.c.bf16 %v129_v34, %v5453_v3  ;;  %v389_v35 = vpack.c.bf16 %v214_v50, %v173_v39  ;;  %v384_v44 = vpack.c.bf16 %v209_v32, %v168_v49 }
  0xb8   :  { %491 = vrot.lane.b32.xlu1 %v379_v25, %s5461_s2  ;;  %v5851_v25 = vpop.permute.xlu0 %5123  ;;  %v386_v55 = vpack.c.bf16 %v211_v57, %v170_v61  ;;  %v215_v59 = vsel %vm208_vm2, %v5075_v14, %v5076_v4  ;;  %v397_v10 = vpack.c.bf16 %v309_v0, %v265_v52  ;;  %v5120_v22 = vunpack.i.l.bf16 %v5795_v20 }
  0xb9   :  { %v174_v51 = vsel %vm166_vm1, %v5051_v16, %v5055_v2  ;;  %v5095_v63 = vunpack.i.l.bf16 %v5766_v18  ;;  %v217_v40 = vsel %vm208_vm2, %v5080_v5, %v5081_v12  ;;  %v5121_v12 = vunpack.i.h.bf16 %v5795_v20 }
  0xba   :  { %v5821_v53 = vpop.permute.xlu1 %5133  ;;  %v390_v4 = vpack.c.bf16 %v215_v59, %v174_v51  ;;  %v310_v2 = vsel %vm306_vm4, %v5116_v45, %v5120_v22  ;;  %v5126_v18 = vunpack.i.h.bf16 %v5851_v25  ;;  %v5130_v34 = vunpack.i.l.bf16 %v5809_v19 }
  0xbb   :  { %v5135_v24 = vunpack.i.l.bf16 %v5821_v53  ;;  %v5136_v62 = vunpack.i.h.bf16 %v5821_v53  ;;  %v311_v16 = vsel %vm306_vm4, %v5120_v22, %v5121_v12  ;;  %v267_v39 = vsel %vm262_vm3, %v5095_v63, %v5096_v42 }
  0xbc   :  { %495 = vrot.lane.b32.xlu1 %v381_v54, %s5461_s2  ;;  %v5868_v46 = vpop.permute.xlu0 %304  ;;  %v176_v54 = vsel %vm166_vm1, %v5056_v60, %v5704_v47  ;;  %v5100_v47 = vunpack.i.l.bf16 %v5761_v15  ;;  %v5125_v60 = vunpack.i.l.bf16 %v5851_v25  ;;  %v5105_v32 = vunpack.i.l.bf16 %v5776_v29 }
  0xbd   :  { %v405_v26 = vpack.c.bf16 %v5135_v24, %v5135_v24  ;;  %v351_v41 = vsel %vm350_vm5, %v5135_v24, %v5136_v62  ;;  %v392_v8 = vpack.c.bf16 %v217_v40, %v176_v54  ;;  %v266_v24 = vsel %vm262_vm3, %v5091_v43, %v5095_v63  ;;  %v1226_v40 = vld [vmem:[%s9003_s4 + $0x8] sm:$0xff] }
  0xbe   :  { %v5889_v1 = vpop.permute.xlu1 %5143  ;;  %v406_v53 = vpack.c.bf16 %v351_v41, %v351_v41  ;;  %v398_v5 = vpack.c.bf16 %v310_v2, %v266_v24  ;;  %v312_v20 = vsel %vm306_vm4, %v5121_v12, %v5125_v60  ;;  %v268_v13 = vsel %vm262_vm3, %v5096_v42, %v5100_v47 }
  0xbf   :  { %543 = vrot.lane.b32.xlu0 %v405_v26, %s5461_s2  ;;  %v5145_v27 = vunpack.i.l.bf16 %v5889_v1  ;;  %v5146_v21 = vunpack.i.h.bf16 %v5889_v1  ;;  %v313_v43 = vsel %vm306_vm4, %v5125_v60, %v5126_v18  ;;  %v314_v58 = vsel %vm306_vm4, %v5126_v18, %v5130_v34 }
  0xc0   :  { %499 = vrot.lane.b32.xlu1 %v383_v33, %s5461_s2  ;;  %v5139_v38 = vpop.permute.xlu0 %5138  ;;  %v5131_v0 = vunpack.i.h.bf16 %v5809_v19  ;;  %v5106_v59 = vunpack.i.h.bf16 %v5776_v29 }
  0xc1   :  { %v5141_v11 = vunpack.i.h.bf16 %v5139_v38  ;;  %v5140_v31 = vunpack.i.l.bf16 %v5139_v38  ;;  %v355_v50 = vsel %vm350_vm5, %v5145_v27, %v5146_v21 }
  0xc2   :  { %v5154_v30 = vpop.permute.xlu1 %5153  ;;  %v316_v38 = vsel %vm306_vm4, %v5131_v0, %v5868_v46  ;;  %v272_v19 = vsel %vm262_vm3, %v5106_v59, %v5771_v23  ;;  %v1225_v23 = vld [vmem:[%s9003_s4] sm:$0xff] }
  0xc3   :  { %485 = vrot.lane.b32.xlu0 %v376_v17, %s5461_s2  ;;  %v354_v26 = vsel %vm350_vm5, %v5141_v11, %v5145_v27  ;;  %v352_v56 = vsel %vm350_vm5, %v5136_v62, %v5140_v31  ;;  %v353_v33 = vsel %vm350_vm5, %v5140_v31, %v5141_v11  ;;  %v400_v17 = vpack.c.bf16 %v312_v20, %v268_v13 }
  0xc4   :  { %507 = vrot.lane.b32.xlu1 %v387_v28, %s5461_s2  ;;  %v409_v37 = vpack.c.bf16 %v354_v26, %v354_v26  ;;  %v407_v9 = vpack.c.bf16 %v352_v56, %v352_v56  ;;  %v408_v14 = vpack.c.bf16 %v353_v33, %v353_v33  ;;  %v5149_v28 = vpop.permute.xlu0 %5148  ;;  %v5155_v45 = vunpack.i.l.bf16 %v5154_v30 }
  0xc5   :  { %v5151_v25 = vunpack.i.h.bf16 %v5149_v28  ;;  %v5150_v48 = vunpack.i.l.bf16 %v5149_v28  ;;  %v404_v63 = vpack.c.bf16 %v316_v38, %v272_v19  ;;  %v315_v11 = vsel %vm306_vm4, %v5130_v34, %v5131_v0 }
  0xc7   :  { %489 = vrot.lane.b32.xlu0 %v378_v7, %s5461_s2  ;;  %v5101_v7 = vunpack.i.h.bf16 %v5761_v15  ;;  %v356_v62 = vsel %vm350_vm5, %v5146_v21, %v5150_v48  ;;  %v357_v61 = vsel %vm350_vm5, %v5150_v48, %v5151_v25 }
  0xc8   :  { %511 = vrot.lane.b32.xlu1 %v389_v35, %s5461_s2  ;;  %v399_v35 = vpack.c.bf16 %v311_v16, %v267_v39  ;;  %v411_v1 = vpack.c.bf16 %v356_v62, %v356_v62  ;;  %v349_v22 = vpop.permute.xlu0 %348  ;;  %v412_v41 = vpack.c.bf16 %v357_v61, %v357_v61 }
  0xc9   :  { %v269_v49 = vsel %vm262_vm3, %v5100_v47, %v5101_v7  ;;  %v270_v57 = vsel %vm262_vm3, %v5101_v7, %v5105_v32 }
  0xca   :  { %v401_v15 = vpack.c.bf16 %v313_v43, %v269_v49  ;;  %v402_v52 = vpack.c.bf16 %v314_v58, %v270_v57 }
  0xcb   :  { %501 = vrot.lane.b32.xlu0 %v384_v44, %s5461_s2  ;;  %v410_v44 = vpack.c.bf16 %v355_v50, %v355_v50 }
  0xcc   :  { %523 = vrot.lane.b32.xlu1 %v395_v36, %s5461_s2  ;;  %v358_v36 = vsel %vm350_vm5, %v5151_v25, %v5155_v45 }
  0xcf   :  { %505 = vrot.lane.b32.xlu0 %v386_v55, %s5461_s2  ;;  %v413_v55 = vpack.c.bf16 %v358_v36, %v358_v36 }
  0xd0   :  { %527 = vrot.lane.b32.xlu1 %v397_v10, %s5461_s2  ;;  %v5156_v10 = vunpack.i.h.bf16 %v5154_v30  ;;  %v5988_v54 = vpop.permute.xlu0 %425 }
  0xd2   :  { %v360_v51 = vsel %vm350_vm5, %v5156_v10, %v349_v22  ;;  %v359_v46 = vsel %vm350_vm5, %v5155_v45, %v5156_v10  ;;  %v6037_v22 = vld [vmem:[%s9000_s1] sm:$0xff]   ;;  %s5464_s1 = smov 120  }
  0xd3   :  { %513 = vrot.lane.b32.xlu0 %v390_v4, %s5461_s2  ;;  %v415_v29 = vpack.c.bf16 %v360_v51, %v360_v51  ;;  %v271_v4 = vsel %vm262_vm3, %v5105_v32, %v5106_v59  ;;  %v414_v31 = vpack.c.bf16 %v359_v46, %v359_v46  ;;  %v5982_v2 = vpop.permute.xlu1 %420 }
  0xd4   :  { %545 = vrot.lane.b32.xlu1 %v406_v53, %s5461_s2  ;;  %v403_v27 = vpack.c.bf16 %v315_v11, %v271_v4  ;;  %v5462_v53 = vmov 0.0|0.0  }
  0xd7   :  { %517 = vrot.lane.b32.xlu0 %v392_v8, %s5461_s2 }
  0xd8   :  { %529 = vrot.lane.b32.xlu1 %v398_v5, %s5461_s2 }
  0xdb   :  { %547 = vrot.lane.b32.xlu0 %v407_v9, %s5461_s2 }
  0xdc   :  { %551 = vrot.lane.b32.xlu1 %v409_v37, %s5461_s2 }
  0xdf   :  { %549 = vrot.lane.b32.xlu0 %v408_v14, %s5461_s2 }
  0xe0   :  { %533 = vrot.lane.b32.xlu1 %v400_v17, %s5461_s2 }
  0xe3   :  { %531 = vrot.lane.b32.xlu0 %v399_v35, %s5461_s2 }
  0xe4   :  { %553 = vrot.lane.b32.xlu1 %v410_v44, %s5461_s2 }
  0xe7   :  { %535 = vrot.lane.b32.xlu0 %v401_v15, %s5461_s2 }
  0xe8   :  { %537 = vrot.lane.b32.xlu1 %v402_v52, %s5461_s2 }
  0xeb   :  { %555 = vrot.lane.b32.xlu0 %v411_v1, %s5461_s2 }
  0xec   :  { %559 = vrot.lane.b32.xlu1 %v413_v55, %s5461_s2 }
  0xee   :  { %v482_v24 = vpop.permute.xlu0 %481 }
  0xef   :  { %557 = vrot.lane.b32.xlu0 %v412_v41, %s5461_s2 }
  0xf0   :  { %541 = vrot.lane.b32.xlu1 %v404_v63, %s5461_s2 }
  0xf3   :  { %539 = vrot.lane.b32.xlu0 %v403_v27, %s5461_s2  ;;  %v6002_v56 = vpop.permute.xlu0 %493 }
  0xf4   :  { %563 = vrot.lane.b32.xlu1 %v415_v29, %s5461_s2 }
  0xf7   :  { %561 = vrot.lane.b32.xlu0 %v414_v31, %s5461_s2  ;;  %s5474_s2 = smov 121  }
  0xf8   :  { %5165 = vrot.lane.b32.xlu1 %v5453_v3, %s5456_s0 }
  0xfb   :  { %5160 = vrot.lane.b32.xlu0 %v5453_v3, %s5456_s0 }
  0xfc   :  { %5180 = vrot.lane.b32.xlu1 %v5453_v3, %s5458_s24 }
  0xff   :  { %5170 = vrot.lane.b32.xlu0 %v5453_v3, %s5458_s24  ;;  %v6006_v37 = vpop.permute.xlu0 %497 }
 0x100   :  { %1229 = vperm.xlu1 %5157, %v1225_v23  }
 0x103   :  { %5175 = vrot.lane.b32.xlu0 %v5453_v3, %s5458_s24  ;;  %v5990_v3 = vpop.permute.xlu1 %487 }
 0x104   :  { %1275 = vrot.lane.b32.xlu1 %v5462_v53, %s5463_s15 }
 0x107   :  { %1234 = vperm.xlu0 %5158, %v1226_v40  }
 0x108   :  { %1279 = vrot.lane.b32.xlu1 %v5462_v53, %s5463_s15 }
 0x10b   :  { %1281 = vrot.lane.b32.xlu0 %v5462_v53, %s5463_s15 }
 0x10c   :  { %1287 = vrot.lane.b32.xlu1 %v5462_v53, %s5463_s15 }
 0x10f   :  { %1285 = vrot.lane.b32.xlu0 %v5462_v53, %s5463_s15  ;;  %v6008_v47 = vpop.permute.xlu0 %509 }
 0x110   :  { %1291 = vrot.lane.b32.xlu1 %v5462_v53, %s5463_s15 }
 0x112   :  { %v504_v8 = vpop.permute.xlu1 %503 }
 0x113   :  { %1293 = vrot.lane.b32.xlu0 %v5462_v53, %s5463_s15 }
 0x116   :  { %v6000_v26 = vpop.permute.xlu1 %515 }
 0x11a   :  { %v6004_v5 = vpop.permute.xlu1 %519 }
 0x11e   :  { %v478_v12 = vpop.permute.xlu1 %477 }
 0x122   :  { %v480_v42 = vpop.permute.xlu1 %479 }
 0x123   :  { %v567_v60 = vsel %vm565_vm6, %v480_v42, %v482_v24  ;;  %v566_v9 = vsel %vm565_vm6, %v478_v12, %v480_v42 }
 0x124   :  { %671 = vmatprep.subr.bf16.mxu0 %v567_v60 }
 0x125   :  { %672 = vmatpush1.bf16.msra.mxu0 %v566_v9  ;;  %v522_v21 = vpop.permute.xlu0 %521 }
 0x126   :  { %v484_v33 = vpop.permute.xlu1 %483 }
 0x127   :  { %v568_v28 = vsel %vm565_vm6, %v482_v24, %v484_v33 }
 0x129   :  { %v526_v14 = vpop.permute.xlu0 %525 }
 0x12a   :  { %v6012_v20 = vpop.permute.xlu1 %491 }
 0x12b   :  { %v573_v46 = vsel %vm565_vm6, %v6012_v20, %v6002_v56 }
 0x12e   :  { %v6014_v13 = vpop.permute.xlu1 %495 }
 0x131   :  { %v544_v18 = vpop.permute.xlu0 %543 }
 0x132   :  { %v500_v16 = vpop.permute.xlu1 %499 }
 0x135   :  { %v486_v17 = vpop.permute.xlu0 %485 }
 0x136   :  { %v569_v30 = vsel %vm565_vm6, %v484_v33, %v486_v17  ;;  %v508_v34 = vpop.permute.xlu1 %507  ;;  %v570_v29 = vsel %vm565_vm6, %v486_v17, %v5990_v3 }
 0x137   :  { %714 = vmatprep.subr.bf16.mxu1 %v569_v30  ;;  %v580_v23 = vsel %vm565_vm6, %v508_v34, %v6008_v47 }
 0x138   :  { %715 = vmatpush1.bf16.msra.mxu1 %v568_v28 }
 0x139   :  { %v490_v50 = vpop.permute.xlu0 %489 }
 0x13a   :  { %v6018_v7 = vpop.permute.xlu1 %511  ;;  %v571_v38 = vsel %vm565_vm6, %v5990_v3, %v490_v50  ;;  %v572_v40 = vsel %vm565_vm6, %v490_v50, %v6012_v20  ;;  %v574_v50 = vsel %vm565_vm6, %v6002_v56, %v6014_v13 }
 0x13b   :  { %v581_v4 = vsel %vm565_vm6, %v6008_v47, %v6018_v7 }
 0x13d   :  { %v502_v39 = vpop.permute.xlu0 %501 }
 0x13e   :  { %v577_v32 = vsel %vm565_vm6, %v502_v39, %v504_v8  ;;  %v576_v25 = vsel %vm565_vm6, %v500_v16, %v502_v39  ;;  %v524_v35 = vpop.permute.xlu1 %523  ;;  %v575_v16 = vsel %vm565_vm6, %v6014_v13, %v6006_v37 }
 0x13f   :  { %673 = vmatprep.subr.bf16.mxu0 %v577_v32  ;;  %v587_v45 = vsel %vm565_vm6, %v524_v35, %v526_v14  ;;  %v586_v58 = vsel %vm565_vm6, %v522_v21, %v524_v35 }
 0x140   :  { %674 = vmatpush1.bf16.msra.mxu0 %v576_v25 }
 0x141   :  { %v506_v48 = vpop.permute.xlu0 %505  ;;  %675 = vmatprep.subr.bf16.mxu0 %v587_v45 }
 0x142   :  { %v579_v49 = vsel %vm565_vm6, %v506_v48, %v508_v34  ;;  %v578_v43 = vsel %vm565_vm6, %v504_v8, %v506_v48  ;;  %v528_v44 = vpop.permute.xlu1 %527 }
 0x143   :  { %716 = vmatprep.subr.bf16.mxu1 %v579_v49  ;;  %v588_v61 = vsel %vm565_vm6, %v526_v14, %v528_v44 }
 0x144   :  { %676 = vmatpush1.bf16.msra.mxu0 %v586_v58  ;;  %717 = vmatpush1.bf16.msra.mxu1 %v578_v43 }
 0x145   :  { %v514_v15 = vpop.permute.xlu0 %513 }
 0x146   :  { %v546_v57 = vpop.permute.xlu1 %545  ;;  %v583_v8 = vsel %vm565_vm6, %v514_v15, %v6000_v26  ;;  %v582_v47 = vsel %vm565_vm6, %v6018_v7, %v514_v15 }
 0x147   :  { %v596_v0 = vsel %vm565_vm6, %v544_v18, %v546_v57 }
 0x148   :  { %v642_v1 = vsel %vm640_vm7, %v596_v0, 0 }
 0x149   :  { %v6026_v36 = vpop.permute.xlu0 %517 }
 0x14a   :  { %v530_v62 = vpop.permute.xlu1 %529  ;;  %v585_v37 = vsel %vm565_vm6, %v6026_v36, %v6004_v5  ;;  %v584_v32 = vsel %vm565_vm6, %v6000_v26, %v6026_v36 }
 0x14b   :  { %v589_v52 = vsel %vm565_vm6, %v528_v44, %v530_v62 }
 0x14c   :  { %718 = vmatprep.subr.bf16.mxu1 %v589_v52 }
 0x14d   :  { %v548_v55 = vpop.permute.xlu0 %547  ;;  %719 = vmatpush1.bf16.msra.mxu1 %v588_v61 }
 0x14e   :  { %v597_v59 = vsel %vm565_vm6, %v546_v57, %v548_v55  ;;  %v552_v10 = vpop.permute.xlu1 %551 }
 0x14f   :  { %4922 = vmatprep.subr.msk.bf16.mxu0 %vm640_vm7, %v597_v59 }
 0x150   :  { %678 = vmatpush1.bf16.msra.mxu0 %v642_v1 }
 0x151   :  { %v550_v41 = vpop.permute.xlu0 %549  ;;  %757 = vmatprep.subr.bf16.mxu0 %v571_v38 }
 0x152   :  { %v599_v19 = vsel %vm565_vm6, %v550_v41, %v552_v10  ;;  %v598_v51 = vsel %vm565_vm6, %v548_v55, %v550_v41  ;;  %v534_v63 = vpop.permute.xlu1 %533 }
 0x153   :  { %4923 = vmatmul.mubr.msk.bf16.vlgmr.msra.gmra.mrb[0].mxu0 %vm636_vm8, %v6037_v22  ;;  %4924 = vmatprep.subr.msk.bf16.mxu1 %vm640_vm7, %v599_v19  ;;  %v648_v11 = vsel %vm640_vm7, %v598_v51, 0 }
 0x154   :  { %721 = vmatpush1.bf16.msra.mxu1 %v648_v11  ;;  %758 = vmatpush1.bf16.msra.mxu0 %v570_v29 }
 0x155   :  { %v532_v27 = vpop.permute.xlu0 %531  ;;  %759 = vmatprep.subr.bf16.mxu0 %v581_v4  ;;  %800 = vmatprep.subr.bf16.mxu1 %v573_v46 }
 0x156   :  { %v554_v31 = vpop.permute.xlu1 %553  ;;  %789 = vmatprep.mubr.bf16.mxu0 %v9010_v6  ;;  %v591_v3 = vsel %vm565_vm6, %v532_v27, %v534_v63  ;;  %v590_v42 = vsel %vm565_vm6, %v530_v62, %v532_v27 }
 0x157   :  { %4925 = vmatmul.mubr.msk.bf16.vlgmr.msra.gmra.mrb[0].mxu1 %vm636_vm8, %v6037_v22  ;;  %v600_v9 = vsel %vm565_vm6, %v552_v10, %v554_v31 }
 0x158   :  { %760 = vmatpush1.bf16.msra.mxu0 %v580_v23  ;;  %801 = vmatpush1.bf16.msra.mxu1 %v572_v40  ;;  %v654_v14 = vsel %vm640_vm7, %v600_v9, 0 }
 0x159   :  { %v536_v24 = vpop.permute.xlu0 %535  ;;  %761 = vmatprep.subr.bf16.mxu0 %v591_v3  ;;  %802 = vmatprep.subr.bf16.mxu1 %v583_v8 }
 0x15a   :  { %v538_v12 = vpop.permute.xlu1 %537  ;;  %832 = vmatprep.mubr.bf16.mxu1 %v9010_v6  ;;  %v592_v18 = vsel %vm565_vm6, %v534_v63, %v536_v24  ;;  %v6136_v63 = vld [vmem:[#allocation2 + $0x10] sm:$0xff] }
 0x15b   :  { %v593_v60 = vsel %vm565_vm6, %v536_v24, %v538_v12 }
 0x15c   :  { %762 = vmatpush1.bf16.msra.mxu0 %v590_v42  ;;  %803 = vmatpush1.bf16.msra.mxu1 %v582_v47 }
 0x15d   :  { %v556_v33 = vpop.permute.xlu0 %555  ;;  %804 = vmatprep.subr.bf16.mxu1 %v593_v60 }
 0x15e   :  { %v601_v21 = vsel %vm565_vm6, %v554_v31, %v556_v33  ;;  %v560_v20 = vpop.permute.xlu1 %559 }
 0x15f   :  { %4926 = vmatprep.subr.msk.bf16.mxu0 %vm640_vm7, %v601_v21 }
 0x160   :  { %764 = vmatpush1.bf16.msra.mxu0 %v654_v14  ;;  %805 = vmatpush1.bf16.msra.mxu1 %v592_v18 }
 0x161   :  { %v558_v17 = vpop.permute.xlu0 %557  ;;  %843 = vmatprep.subr.bf16.mxu0 %v575_v16 }
 0x162   :  { %v602_v30 = vsel %vm565_vm6, %v556_v33, %v558_v17  ;;  %v603_v34 = vsel %vm565_vm6, %v558_v17, %v560_v20  ;;  %v542_v7 = vpop.permute.xlu1 %541 }
 0x163   :  { %4928 = vmatprep.subr.msk.bf16.mxu1 %vm640_vm7, %v603_v34  ;;  %4927 = vmatmul.mubr.msk.bf16.vlgmr.msra.gmra.mrb[4].mxu0 %vm636_vm8, %v6037_v22  ;;  %v660_v28 = vsel %vm640_vm7, %v602_v30, 0 }
 0x164   :  { %807 = vmatpush1.bf16.msra.mxu1 %v660_v28  ;;  %844 = vmatpush1.bf16.msra.mxu0 %v574_v50 }
 0x165   :  { %v540_v39 = vpop.permute.xlu0 %539  ;;  %845 = vmatprep.subr.bf16.mxu0 %v585_v37  ;;  %875 = vmatprep.mubr.bf16.mxu0 %v9010_v6 }
 0x166   :  { %v564_v25 = vpop.permute.xlu1 %563  ;;  %v595_v56 = vsel %vm565_vm6, %v540_v39, %v542_v7  ;;  %v594_v45 = vsel %vm565_vm6, %v538_v12, %v540_v39 }
 0x167   :  { %4929 = vmatmul.mubr.msk.bf16.vlgmr.msra.gmra.mrb[4].mxu1 %vm636_vm8, %v6037_v22 }
 0x168   :  { %846 = vmatpush1.bf16.msra.mxu0 %v584_v32  ;;  %1438 = vmatprep.mubr.bf16.mxu1 %v9010_v6 }
 0x169   :  { %847 = vmatprep.subr.bf16.mxu0 %v595_v56  ;;  %v562_v13 = vpop.permute.xlu0 %561 }
 0x16a   :  { %v604_v5 = vsel %vm565_vm6, %v560_v20, %v562_v13  ;;  %v605_v35 = vsel %vm565_vm6, %v562_v13, %v564_v25  ;;  %v6108_v49 = vpop.permute.xlu1 %5165  ;;  %vm4031_vm6 = vcmask 957440  }
 0x16b   :  { %v666_v48 = vsel %vm640_vm7, %v604_v5, 0  ;;  %v9013_v60 = vunpack.i.h.bf16 %v6108_v49  ;;  %v9019_v9 = vunpack.i.l.bf16 %v6108_v49 }
 0x16c   :  { %848 = vmatpush1.bf16.msra.mxu0 %v594_v45 }
 0x16d   :  { %4930 = vmatprep.subr.msk.bf16.mxu0 %vm640_vm7, %v605_v35  ;;  %v6106_v26 = vpop.permute.xlu0 %5160  ;;  %v1057_v17 = vsel %vm166_vm1, %v9019_v9, %v9013_v60  ;;  %vm4174_vm7 = vcmask 949248  }
 0x16e   :  { %v6112_v44 = vpop.permute.xlu1 %5180  ;;  %v9012_v42 = vunpack.i.h.bf16 %v6106_v26  ;;  %v9017_v47 = vunpack.i.l.bf16 %v6106_v26 }
 0x170   :  { %850 = vmatpush1.bf16.msra.mxu0 %v666_v48  ;;  %v1048_v16 = vsel %vm166_vm1, %v9017_v47, %v9012_v42 }
 0x171   :  { %v6110_v43 = vpop.permute.xlu0 %5170  ;;  %v1208_v7 = vpack.c.bf16 %v1057_v17, %v1048_v16 }
 0x172   :  { %v9028_v60 = vunpack.i.h.bf16 %v6110_v43 }
 0x173   :  { %4931 = vmatmul.mubr.msk.bf16.vlgmr.msra.gmra.mrb[8].mxu0 %vm636_vm8, %v6037_v22  ;;  %vm4317_vm8 = vcmask 941056  }
 0x174   :  { %1524 = vmatprep.mubr.bf16.mxu0 %v9010_v6 }
 0x175   :  { %v6114_v58 = vpop.permute.xlu0 %5175 }
 0x17f   :  { %v6116_v15 = vpop.permute.xlu1 %1229 }
 0x183   :  { %v6120_v36 = vpop.permute.xlu1 %1275 }
 0x186   :  { %v6118_v57 = vpop.permute.xlu0 %1234 }
 0x187   :  { %v6124_v52 = vpop.permute.xlu1 %1279 }
 0x18a   :  { %v6122_v62 = vpop.permute.xlu0 %1281 }
 0x18b   :  { %v6128_v61 = vpop.permute.xlu1 %1287 }
 0x18e   :  { %v6126_v0 = vpop.permute.xlu0 %1285 }
 0x18f   :  { %v1347_v55 = vsel %vm1341_vm9, %v6126_v0, %v6128_v61 }
 0x190   :  { %1492 = vmatprep.subr.bf16.mxu0 %v1347_v55 }
 0x226   :  { %v705_v59 = vpop.f32.mrb[0].mxu0 }
 0x227   :  { %v706_v10 = vadd.f32 %v705_v59, %v5982_v2  ;;  %v707_v1 = vpop.f32.mrb[1].mxu0 }
 0x228   :  { %v709_v22 = vpop.f32.mrb[2].mxu0  ;;  %v6200_v1 = vpop.permute.xlu1 %1291 }
 0x229   :  { %v6134_v38 = vmax.f32 %v706_v10, 0.0  ;;  %v711_v41 = vpop.f32.mrb[3].mxu0  ;;  %v710_v23 = vadd.f32 %v709_v22, %v5988_v54  ;;  %v6198_v10 = vpop.permute.xlu0 %1293 }
 0x22a   :  { %v748_v19 = vpop.f32.mrb[0].mxu1 }
 0x22b   :  { %v750_v51 = vpop.f32.mrb[1].mxu1  ;;  %v5184_v11 = vpack.i.bf16 %v6136_v63, %v6134_v38  ;;  %v6154_v24 = vmax.f32 %v710_v23, 0.0 }
 0x22c   :  { %v751_v29 = vadd.f32 %v750_v51, %v5982_v2  ;;  %v752_v4 = vpop.f32.mrb[2].mxu1  ;;  %v9015_v51 = vunpack.i.h.bf16 %v6114_v58 }
 0x22d   :  { %5185 = vrot.lane.b32.xlu0 %v5184_v11, %s5456_s0  ;;  %v754_v46 = vpop.f32.mrb[3].mxu1  ;;  %v5204_v21 = vpack.i.bf16 %v6136_v63, %v6154_v24  ;;  %v5209_v28 = vpack.i.bf16 %v6154_v24, %v6136_v63 }
 0x22e   :  { %v6142_v27 = vmax.f32 %v751_v29, 0.0  ;;  %v755_v31 = vadd.f32 %v754_v46, %v5988_v54 }
 0x230   :  { %v6146_v40 = vmax.f32 %v755_v31, 0.0  ;;  %v5194_v3 = vpack.i.bf16 %v6142_v27, %v6136_v63 }
 0x231   :  { %5190 = vrot.lane.b32.xlu0 %v5184_v11, %s5458_s24  ;;  %v9021_v11 = vunpack.i.l.bf16 %v6114_v58 }
 0x232   :  { %5195 = vrot.lane.b32.xlu1 %v5194_v3, %s5456_s0  ;;  %v5214_v8 = vpack.i.bf16 %v6146_v40, %v6136_v63  ;;  %v5219_v39 = vpack.i.bf16 %v6136_v63, %v6146_v40  ;;  %v1196_v5 = vpack.c.bf16 %v6146_v40, %v6142_v27 }
 0x235   :  { %5215 = vrot.lane.b32.xlu0 %v5214_v8, %s5456_s0 }
 0x236   :  { %5200 = vrot.lane.b32.xlu1 %v5194_v3, %s5458_s24  ;;  %v791_v12 = vpop.f32.mrb[4].mxu0 }
 0x237   :  { %v793_v33 = vpop.f32.mrb[5].mxu0 }
 0x238   :  { %v795_v20 = vpop.f32.mrb[6].mxu0  ;;  %v1161_v33 = vsel %vm262_vm3, %v9021_v11, %v9015_v51 }
 0x239   :  { %v797_v14 = vpop.f32.mrb[7].mxu0 }
 0x23a   :  { %5205 = vrot.lane.b32.xlu1 %v5204_v21, %s5456_s0  ;;  %v834_v18 = vpop.f32.mrb[4].mxu1 }
 0x23b   :  { %v836_v30 = vpop.f32.mrb[5].mxu1  ;;  %v835_v37 = vadd.f32 %v834_v18, %v5982_v2 }
 0x23c   :  { %v838_v34 = vpop.f32.mrb[6].mxu1 }
 0x23d   :  { %v840_v50 = vpop.f32.mrb[7].mxu1  ;;  %v6183_v56 = vmax.f32 %v835_v37, 0.0 }
 0x23e   :  { %5210 = vrot.lane.b32.xlu1 %v5209_v28, %s5458_s24 }
 0x23f   :  { %v5224_v48 = vpack.i.bf16 %v6136_v63, %v6183_v56 }
 0x242   :  { %1307 = vrot.lane.b32.xlu1 %v1208_v7, %s5463_s15 }
 0x246   :  { %v877_v32 = vpop.f32.mrb[8].mxu0  ;;  %5220 = vrot.lane.b32.xlu1 %v5219_v39, %s5458_s24 }
 0x247   :  { %v879_v25 = vpop.f32.mrb[9].mxu0 }
 0x248   :  { %v881_v13 = vpop.f32.mrb[10].mxu0 }
 0x249   :  { %v883_v35 = vpop.f32.mrb[11].mxu0 }
 0x24a   :  { %1283 = vrot.lane.b32.xlu1 %v1196_v5, %s5463_s15  ;;  %v884_v45 = vadd.f32 %v883_v35, %v5988_v54  ;;  %v839_v5 = vadd.f32 %v838_v34, %v5988_v54  ;;  %v880_v34 = vadd.f32 %v879_v25, %v5982_v2 }
 0x24c   :  { %v6192_v55 = vmax.f32 %v884_v45, 0.0 }
 0x24e   :  { %5225 = vrot.lane.b32.xlu1 %v5224_v48, %s5456_s0  ;;  %v5254_v59 = vpack.i.bf16 %v6192_v55, %v6136_v63 }
 0x252   :  { %5230 = vrot.lane.b32.xlu1 %v5224_v48, %s5458_s24  ;;  %v5182_v48 = vunpack.i.l.bf16 %v6112_v44 }
 0x256   :  { %5255 = vrot.lane.b32.xlu1 %v5254_v59, %s5456_s0  ;;  %v6267_v59 = vmax.f32 %v839_v5, 0.0 }
 0x258   :  { %v5234_v54 = vpack.i.bf16 %v6136_v63, %v6267_v59 }
 0x29f   :  { %v6202_v22 = vpop.permute.xlu0 %5185 }
 0x2a0   :  { %v5188_v20 = vunpack.i.h.bf16 %v6202_v22  ;;  %v5187_v14 = vunpack.i.l.bf16 %v6202_v22 }
 0x2a2   :  { %v6252_v37 = vsel %vm166_vm1, %v5187_v14, %v5188_v20 }
 0x2a3   :  { %v6204_v41 = vpop.permute.xlu0 %5190 }
 0x2a4   :  { %v6206_v19 = vpop.permute.xlu1 %5195  ;;  %v9020_v8 = vunpack.i.h.bf16 %v6204_v41 }
 0x2a5   :  { %v9016_v29 = vunpack.i.h.bf16 %v6206_v19  ;;  %v5197_v4 = vunpack.i.l.bf16 %v6206_v19 }
 0x2a7   :  { %v6212_v46 = vpop.permute.xlu0 %5215  ;;  %v6235_v18 = vsel %vm166_vm1, %v5197_v4, %v9016_v29  ;;  %v1045_v39 = vsel %vm166_vm1, %v5188_v20, %v5197_v4 }
 0x2a8   :  { %v9018_v31 = vunpack.i.h.bf16 %v6212_v46  ;;  %v5217_v23 = vunpack.i.l.bf16 %v6212_v46  ;;  %v6216_v3 = vpop.permute.xlu1 %5200 }
 0x2a9   :  { %v9014_v12 = vunpack.i.l.bf16 %v6216_v3 }
 0x2aa   :  { %v6228_v21 = vsel %vm166_vm1, %v5217_v23, %v9018_v31 }
 0x2ab   :  { %v1151_v16 = vsel %vm262_vm3, %v9020_v8, %v9014_v12  ;;  %v5172_v12 = vunpack.i.l.bf16 %v6110_v43 }
 0x2ac   :  { %v6242_v17 = vpop.permute.xlu1 %5205  ;;  %v1216_v30 = vpack.c.bf16 %v1161_v33, %v1151_v16  ;;  %v5239_v16 = vpack.i.bf16 %v6267_v59, %v6136_v63 }
 0x2ad   :  { %v5208_v50 = vunpack.i.h.bf16 %v6242_v17  ;;  %v9023_v7 = vunpack.i.l.bf16 %v6242_v17 }
 0x2ae   :  { %1323 = vrot.lane.b32.xlu1 %v1216_v30, %s5463_s15 }
 0x2af   :  { %v1054_v32 = vsel %vm166_vm1, %v5208_v50, %v5217_v23  ;;  %v6259_v13 = vsel %vm166_vm1, %v9023_v7, %v5208_v50  ;;  %v1193_v23 = vpack.c.bf16 %v6154_v24, %v6134_v38  ;;  %v6288_v50 = vmax.f32 %v880_v34, 0.0 }
 0x2b0   :  { %v6262_v35 = vpop.permute.xlu1 %5210  ;;  %v1205_v45 = vpack.c.bf16 %v1054_v32, %v1045_v39  ;;  %v1199_v39 = vpack.c.bf16 %v6267_v59, %v6183_v56 }
 0x2b1   :  { %v5244_v2 = vpack.i.bf16 %v6288_v50, %v6136_v63 }
 0x2b2   :  { %1301 = vrot.lane.b32.xlu0 %v1205_v45, %s5463_s15 }
 0x2b4   :  { %v6269_v4 = vpop.permute.xlu1 %1307 }
 0x2b6   :  { %1277 = vrot.lane.b32.xlu0 %v1193_v23, %s5463_s15 }
 0x2b8   :  { %v6274_v33 = vpop.permute.xlu1 %5220 }
 0x2b9   :  { %v5223_v51 = vunpack.i.h.bf16 %v6274_v33 }
 0x2ba   :  { %5235 = vrot.lane.b32.xlu0 %v5234_v54, %s5456_s0 }
 0x2bc   :  { %v6280_v20 = vpop.permute.xlu1 %1283 }
 0x2bd   :  { %v1346_v30 = vsel %vm1341_vm9, %v6280_v20, %v6126_v0 }
 0x2be   :  { %5240 = vrot.lane.b32.xlu0 %v5239_v16, %s5458_s24  ;;  %1493 = vmatpush1.bf16.msra.mxu0 %v1346_v30 }
 0x2c0   :  { %v6299_v0 = vpop.permute.xlu1 %5225 }
 0x2c2   :  { %1289 = vrot.lane.b32.xlu0 %v1199_v39, %s5463_s15 }
 0x2c4   :  { %v6307_v54 = vpop.permute.xlu1 %5230 }
 0x2c5   :  { %v5233_v7 = vunpack.i.h.bf16 %v6307_v54 }
 0x2c6   :  { %5245 = vrot.lane.b32.xlu0 %v5244_v2, %s5456_s0 }
 0x2c8   :  { %v6311_v16 = vpop.permute.xlu1 %5255 }
 0x2c9   :  { %v9022_v39 = vunpack.i.h.bf16 %v6311_v16 }
 0x2ca   :  { %5250 = vrot.lane.b32.xlu0 %v5244_v2, %s5458_s24  ;;  %v5257_v2 = vunpack.i.l.bf16 %v6311_v16 }
 0x2cc   :  { %v6332_v29 = vsel %vm166_vm1, %v5257_v2, %v9022_v39 }
 0x324   :  { %v6297_v25 = vpop.permute.xlu0 %1301 }
 0x328   :  { %v1278_v32 = vpop.permute.xlu0 %1277 }
 0x329   :  { %v1343_v5 = vsel %vm1341_vm9, %v1278_v32, %v6124_v52  ;;  %v1342_v45 = vsel %vm1341_vm9, %v6120_v36, %v1278_v32  ;;  %v9026_v36 = vunpack.i.h.bf16 %v6112_v44 }
 0x32a   :  { %1406 = vmatprep.subr.bf16.mxu1 %v1343_v5  ;;  %v9024_v5 = vunpack.i.h.bf16 %v6299_v0 }
 0x32b   :  { %1407 = vmatpush1.bf16.msra.mxu1 %v1342_v45 }
 0x32c   :  { %v6305_v23 = vpop.permute.xlu0 %5235 }
 0x32d   :  { %v5238_v6 = vunpack.i.h.bf16 %v6305_v23 }
 0x32f   :  { %v1060_v47 = vsel %vm166_vm1, %v5238_v6, %v5257_v2 }
 0x330   :  { %v6309_v34 = vpop.permute.xlu0 %5240 }
 0x331   :  { %v5242_v45 = vunpack.i.l.bf16 %v6309_v34 }
 0x333   :  { %v1164_v2 = vsel %vm262_vm3, %v5223_v51, %v5242_v45 }
 0x334   :  { %v6313_v30 = vpop.permute.xlu0 %1289 }
 0x338   :  { %v6319_v32 = vpop.permute.xlu0 %5245 }
 0x339   :  { %v9025_v42 = vunpack.i.h.bf16 %v6319_v32  ;;  %v5247_v28 = vunpack.i.l.bf16 %v6319_v32 }
 0x33b   :  { %v1051_v31 = vsel %vm166_vm1, %v9024_v5, %v5247_v28  ;;  %v6343_v9 = vsel %vm166_vm1, %v5247_v28, %v9025_v42  ;;  %v5264_v42 = vpack.i.bf16 %v6136_v63, %v6136_v63 }
 0x33c   :  { %v6345_v8 = vpop.permute.xlu0 %5250  ;;  %v1211_v11 = vpack.c.bf16 %v1060_v47, %v1051_v31  ;;  %v1154_v47 = vsel %vm262_vm3, %v5172_v12, %v9028_v60  ;;  %v1167_v31 = vsel %vm262_vm3, %v5182_v48, %v9026_v36  ;;  %v5222_v60 = vunpack.i.l.bf16 %v6274_v33 }
 0x33d   :  { %v9027_v5 = vunpack.i.l.bf16 %v6345_v8  ;;  %v9137_v33 = vunpack.i.h.bf16 %v6106_v26 }
 0x33e   :  { %1313 = vrot.lane.b32.xlu0 %v1211_v11, %s5463_s15  ;;  %v1219_v11 = vpack.c.bf16 %v1164_v2, %v1154_v47  ;;  %v4940_v2 = vld [vmem:[%s9003_s4 + $0x10] sm:$0xff]  ;;  %v5192_v47 = vunpack.i.l.bf16 %v6204_v41 }
 0x33f   :  { %v1157_v28 = vsel %vm262_vm3, %v5233_v7, %v9027_v5 }
 0x340   :  { %v1222_v39 = vpack.c.bf16 %v1167_v31, %v1157_v28  ;;  %v9125_v31 = vunpack.i.l.bf16 %v6242_v17  ;;  %v9128_v17 = vunpack.i.l.bf16 %v6108_v49 }
 0x342   :  { %1335 = vrot.lane.b32.xlu1 %v1222_v39, %s5463_s15  ;;  %1329 = vrot.lane.b32.xlu0 %v1219_v11, %s5463_s15  ;;  %v5213_v39 = vunpack.i.h.bf16 %v6262_v35  ;;  %v1203_v28 = vpack.c.bf16 %v9125_v31, %v5187_v14  ;;  %v1202_v11 = vpack.c.bf16 %v6192_v55, %v6288_v50  ;;  %v9129_v14 = vunpack.i.h.bf16 %v6212_v46 }
 0x344   :  { %v1214_v5 = vpack.c.bf16 %v5213_v39, %v5192_v47  ;;  %v1056_v31 = vsel %vm166_vm1, %v9129_v14, %v9128_v17  ;;  %v9135_v17 = vunpack.i.h.bf16 %v6108_v49  ;;  %v5232_v49 = vunpack.i.l.bf16 %v6307_v54 }
 0x345   :  { %v9141_v54 = vunpack.i.h.bf16 %v6311_v16 }
 0x346   :  { %5265 = vrot.lane.b32.xlu1 %v5264_v42, %s5458_s24  ;;  %5260 = vrot.lane.b32.xlu0 %v5264_v42, %s5458_s24 }
 0x34a   :  { %5280 = vrot.lane.b32.xlu1 %v5264_v42, %s5464_s1  ;;  %5270 = vrot.lane.b32.xlu0 %v5264_v42, %s5464_s1 }
 0x34e   :  { %1987 = vperm.xlu1 %5157, %v4940_v2   ;;  %5275 = vrot.lane.b32.xlu0 %v5264_v42, %s5464_s1  ;;  %v5284_v42 = vpack.i.bf16 %v6136_v63, %v6192_v55  ;;  %v9126_v2 = vunpack.i.l.bf16 %v6114_v58 }
 0x350   :  { %v1160_v36 = vsel %vm262_vm3, %v5213_v39, %v9126_v2  ;;  %v5237_v2 = vunpack.i.l.bf16 %v6305_v23 }
 0x352   :  { %2033 = vrot.lane.b32.xlu1 %v5462_v53, %s5465_s19  ;;  %2039 = vrot.lane.b32.xlu0 %v5462_v53, %s5465_s19  ;;  %v1058_v14 = vsel %vm166_vm1, %v9135_v17, %v5237_v2 }
 0x356   :  { %2037 = vrot.lane.b32.xlu1 %v5462_v53, %s5465_s19  ;;  %2043 = vrot.lane.b32.xlu0 %v5462_v53, %s5465_s19 }
 0x35a   :  { %2045 = vrot.lane.b32.xlu1 %v5462_v53, %s5465_s19  ;;  %2051 = vrot.lane.b32.xlu0 %v5462_v53, %s5465_s19 }
 0x35e   :  { %2049 = vrot.lane.b32.xlu1 %v5462_v53, %s5465_s19  ;;  %5285 = vrot.lane.b32.xlu0 %v5284_v42, %s5458_s24  ;;  %v9127_v53 = vunpack.i.h.bf16 %v6204_v41  ;;  %v9131_v41 = vunpack.i.h.bf16 %v6206_v19  ;;  %v9134_v19 = vunpack.i.l.bf16 %v6216_v3 }
 0x360   :  { %v1150_v42 = vsel %vm262_vm3, %v5192_v47, %v9127_v53  ;;  %v9132_v47 = vunpack.i.h.bf16 %v6114_v58  ;;  %v1163_v58 = vsel %vm262_vm3, %v5222_v60, %v5223_v51 }
 0x361   :  { %v1215_v22 = vpack.c.bf16 %v1160_v36, %v1150_v42  ;;  %v5203_v36 = vunpack.i.h.bf16 %v6216_v3  ;;  %v5227_v42 = vunpack.i.l.bf16 %v6299_v0 }
 0x362   :  { %1295 = vrot.lane.b32.xlu1 %v1202_v11, %s5463_s15  ;;  %1297 = vrot.lane.b32.xlu0 %v1203_v28, %s5463_s15  ;;  %v9130_v28 = vunpack.i.l.bf16 %v6106_v26  ;;  %v1162_v46 = vsel %vm262_vm3, %v9132_v47, %v5222_v60  ;;  %v9138_v26 = vunpack.i.h.bf16 %v6299_v0 }
 0x363   :  { %v1152_v53 = vsel %vm262_vm3, %v9134_v19, %v5203_v36  ;;  %v1153_v3 = vsel %vm262_vm3, %v5203_v36, %v5172_v12  ;;  %v1049_v60 = vsel %vm166_vm1, %v9137_v33, %v5227_v42 }
 0x364   :  { %v1047_v11 = vsel %vm166_vm1, %v9131_v41, %v9130_v28  ;;  %v1218_v51 = vpack.c.bf16 %v1163_v58, %v1153_v3  ;;  %v1059_v28 = vsel %vm166_vm1, %v5237_v2, %v5238_v6  ;;  %v1050_v12 = vsel %vm166_vm1, %v5227_v42, %v9138_v26 }
 0x365   :  { %v1207_v39 = vpack.c.bf16 %v1056_v31, %v1047_v11  ;;  %v1209_v31 = vpack.c.bf16 %v1058_v14, %v1049_v60  ;;  %v1210_v41 = vpack.c.bf16 %v1059_v28, %v1050_v12  ;;  %v9140_v11 = vunpack.i.h.bf16 %v6319_v32  ;;  %v6501_v32 = vpop.permute.xlu1 %1323 }
 0x366   :  { %1319 = vrot.lane.b32.xlu1 %v1214_v5, %s5463_s15  ;;  %1321 = vrot.lane.b32.xlu0 %v1215_v22, %s5463_s15  ;;  %v9133_v5 = vpack.c.bf16 %v6259_v13, %v6252_v37  ;;  %v1217_v22 = vpack.c.bf16 %v1162_v46, %v1152_v53  ;;  %v5243_v37 = vunpack.i.h.bf16 %v6309_v34  ;;  %v9136_v13 = vpack.c.bf16 %v6228_v21, %v6235_v18 }
 0x367   :  { %v1156_v18 = vsel %vm262_vm3, %v5232_v49, %v5233_v7  ;;  %v1213_v36 = vpack.c.bf16 %v9141_v54, %v9140_v11  ;;  %v9142_v34 = vpack.c.bf16 %v6332_v29, %v6343_v9  ;;  %v5253_v42 = vunpack.i.h.bf16 %v6345_v8 }
 0x368   :  { %v1166_v21 = vsel %vm262_vm3, %v5243_v37, %v5182_v48  ;;  %v1165_v6 = vsel %vm262_vm3, %v5242_v45, %v5243_v37  ;;  %v9139_v48 = vunpack.i.h.bf16 %v6110_v43  ;;  %v5212_v58 = vunpack.i.l.bf16 %v6262_v35 }
 0x369   :  { %v1221_v23 = vpack.c.bf16 %v1166_v21, %v1156_v18  ;;  %v9143_v3 = vunpack.i.l.bf16 %v6345_v8  ;;  %v9144_v60 = vunpack.i.h.bf16 %v6112_v44 }
 0x36a   :  { %1299 = vrot.lane.b32.xlu1 %v9133_v5, %s5463_s15  ;;  %1305 = vrot.lane.b32.xlu0 %v1207_v39, %s5463_s15  ;;  %v1155_v0 = vsel %vm262_vm3, %v9139_v48, %v5232_v49 }
 0x36b   :  { %v1220_v7 = vpack.c.bf16 %v1165_v6, %v1155_v0  ;;  %v1158_v33 = vsel %vm262_vm3, %v9143_v3, %v5253_v42 }
 0x36e   :  { %1303 = vrot.lane.b32.xlu1 %v9136_v13, %s5463_s15  ;;  %1325 = vrot.lane.b32.xlu0 %v1217_v22, %s5463_s15  ;;  %v1159_v13 = vsel %vm262_vm3, %v5253_v42, %v5212_v58 }
 0x372   :  { %1327 = vrot.lane.b32.xlu1 %v1218_v51, %s5463_s15  ;;  %1309 = vrot.lane.b32.xlu0 %v1209_v31, %s5463_s15 }
 0x376   :  { %1311 = vrot.lane.b32.xlu1 %v1210_v41, %s5463_s15  ;;  %1333 = vrot.lane.b32.xlu0 %v1221_v23, %s5463_s15 }
 0x37a   :  { %1331 = vrot.lane.b32.xlu1 %v1220_v7, %s5463_s15  ;;  %1317 = vrot.lane.b32.xlu0 %v1213_v36, %s5463_s15 }
 0x37e   :  { %1315 = vrot.lane.b32.xlu1 %v9142_v34, %s5463_s15 }
 0x3b0   :  { %v6495_v45 = vpop.permute.xlu0 %1313 }
 0x3b4   :  { %v6497_v43 = vpop.permute.xlu0 %1329  ;;  %v6505_v47 = vpop.permute.xlu1 %1335 }
 0x3b8   :  { %v6499_v39 = vpop.permute.xlu0 %5260  ;;  %v6509_v2 = vpop.permute.xlu1 %5265 }
 0x3bc   :  { %v6503_v16 = vpop.permute.xlu0 %5270  ;;  %v6515_v29 = vpop.permute.xlu1 %5280 }
 0x3c0   :  { %v6507_v46 = vpop.permute.xlu0 %5275 }
 0x3c4   :  { %v6511_v5 = vpop.permute.xlu0 %2039 }
 0x3c8   :  { %v6513_v9 = vpop.permute.xlu0 %2043 }
 0x3cc   :  { %v6517_v19 = vpop.permute.xlu0 %2051 }
 0x3cd   :  { %v6519_v53 = vpop.permute.xlu1 %1987 }
 0x3d0   :  { %v5286_v22 = vpop.permute.xlu0 %5285 }
 0x3d1   :  { %v5288_v17 = vunpack.i.h.bf16 %v5286_v22  ;;  %v5287_v14 = vunpack.i.l.bf16 %v5286_v22  ;;  %v6523_v37 = vpop.permute.xlu1 %2033  ;;  %v1345_v22 = vsel %vm1341_vm9, %v6122_v62, %v6280_v20 }
 0x3d3   :  { %v1168_v49 = vsel %vm262_vm3, %v9144_v60, %v5287_v14  ;;  %v1169_v51 = vsel %vm262_vm3, %v5287_v14, %v5288_v17  ;;  %v1344_v17 = vsel %vm1341_vm9, %v6124_v52, %v6122_v62 }
 0x3d4   :  { %v1298_v31 = vpop.permute.xlu0 %1297  ;;  %v1224_v28 = vpack.c.bf16 %v1169_v51, %v1159_v13  ;;  %v1223_v21 = vpack.c.bf16 %v1168_v49, %v1158_v33  ;;  %v9145_v13 = vmov 0  }
 0x3d5   :  { %v6533_v35 = vpop.permute.xlu1 %2037 }
 0x3d6   :  { %1339 = vrot.lane.b32.xlu1 %v1224_v28, %s5463_s15  ;;  %1337 = vrot.lane.b32.xlu0 %v1223_v21, %s5463_s15 }
 0x3d8   :  { %v1322_v26 = vpop.permute.xlu0 %1321 }
 0x3d9   :  { %v6537_v12 = vpop.permute.xlu1 %2045  ;;  %v1363_v7 = vsel %vm1341_vm9, %v1322_v26, %v6501_v32 }
 0x3dc   :  { %v1306_v8 = vpop.permute.xlu0 %1305 }
 0x3dd   :  { %v6539_v18 = vpop.permute.xlu1 %2049  ;;  %v1356_v0 = vsel %vm1341_vm9, %v1306_v8, %v6269_v4 }
 0x3e0   :  { %v1326_v44 = vpop.permute.xlu0 %1325 }
 0x3e1   :  { %v1296_v41 = vpop.permute.xlu1 %1295  ;;  %v1364_v62 = vsel %vm1341_vm9, %v6501_v32, %v1326_v44  ;;  %v1350_v32 = vsel %vm1341_vm9, %v6200_v1, %v6198_v10 }
 0x3e4   :  { %v1310_v23 = vpop.permute.xlu0 %1309 }
 0x3e5   :  { %v1320_v6 = vpop.permute.xlu1 %1319  ;;  %v1357_v48 = vsel %vm1341_vm9, %v6269_v4, %v1310_v23  ;;  %v5399_v4 = vld [vmem:[%s9002_s3] sm:$0xff]  }
 0x3e6   :  { %1494 = vmatprep.subr.bf16.mxu0 %v1357_v48  ;;  %v1362_v42 = vsel %vm1341_vm9, %v1320_v6, %v1322_v26 }
 0x3e7   :  { %1495 = vmatpush1.bf16.msra.mxu0 %v1356_v0 }
 0x3e8   :  { %v1334_v60 = vpop.permute.xlu0 %1333 }
 0x3e9   :  { %v1300_v11 = vpop.permute.xlu1 %1299 }
 0x3ea   :  { %v1353_v54 = vsel %vm1341_vm9, %v1300_v11, %v6297_v25  ;;  %v1352_v36 = vsel %vm1341_vm9, %v1298_v31, %v1300_v11  ;;  %v1351_v31 = vsel %vm1341_vm9, %v6198_v10, %v1296_v41  ;;  %v1369_v10 = vsel %vm1341_vm9, %v1334_v60, %v6505_v47 }
 0x3eb   :  { %1408 = vmatprep.subr.bf16.mxu1 %v1353_v54 }
 0x3ec   :  { %1409 = vmatpush1.bf16.msra.mxu1 %v1352_v36  ;;  %v1318_v21 = vpop.permute.xlu0 %1317 }
 0x3ed   :  { %v1304_v34 = vpop.permute.xlu1 %1303  ;;  %1410 = vmatprep.subr.bf16.mxu1 %v1363_v7 }
 0x3ee   :  { %v1355_v14 = vsel %vm1341_vm9, %v1304_v34, %v1306_v8  ;;  %v1354_v33 = vsel %vm1341_vm9, %v6297_v25, %v1304_v34  ;;  %v1349_v25 = vsel %vm1341_vm9, %v6313_v30, %v6200_v1 }
 0x3f0   :  { %1411 = vmatpush1.bf16.msra.mxu1 %v1362_v42 }
 0x3f1   :  { %1449 = vmatprep.subr.bf16.mxu1 %v1345_v22  ;;  %v1328_v58 = vpop.permute.xlu1 %1327 }
 0x3f2   :  { %v1365_v20 = vsel %vm1341_vm9, %v1326_v44, %v1328_v58  ;;  %v1366_v52 = vsel %vm1341_vm9, %v1328_v58, %v6497_v43 }
 0x3f3   :  { %4933 = vmatmul.mubr.msk.bf16.vlgmr.msra.gmra.mrb[8].mxu1 %vm1402_vm10, %v5399_v4 }
 0x3f4   :  { %1450 = vmatpush1.bf16.msra.mxu1 %v1344_v17  ;;  %1481 = vmatprep.mubr.bf16.mxu1 %v9145_v13 }
 0x3f5   :  { %v1312_v3 = vpop.permute.xlu1 %1311  ;;  %1451 = vmatprep.subr.bf16.mxu1 %v1355_v14 }
 0x3f6   :  { %v1359_v26 = vsel %vm1341_vm9, %v1312_v3, %v6495_v45  ;;  %v1358_v44 = vsel %vm1341_vm9, %v1310_v23, %v1312_v3 }
 0x3f8   :  { %1452 = vmatpush1.bf16.msra.mxu1 %v1354_v33 }
 0x3f9   :  { %v1332_v49 = vpop.permute.xlu1 %1331  ;;  %1453 = vmatprep.subr.bf16.mxu1 %v1365_v20 }
 0x3fa   :  { %v1367_v51 = vsel %vm1341_vm9, %v6497_v43, %v1332_v49  ;;  %v1348_v43 = vsel %vm1341_vm9, %v6128_v61, %v6313_v30  ;;  %v1368_v1 = vsel %vm1341_vm9, %v1332_v49, %v1334_v60 }
 0x3fb   :  { %1496 = vmatprep.subr.bf16.mxu0 %v1367_v51 }
 0x3fc   :  { %1454 = vmatpush1.bf16.msra.mxu1 %v1364_v62  ;;  %1497 = vmatpush1.bf16.msra.mxu0 %v1366_v52 }
 0x3fd   :  { %v1316_v28 = vpop.permute.xlu1 %1315  ;;  %1535 = vmatprep.subr.bf16.mxu1 %v1349_v25  ;;  %1578 = vmatprep.subr.bf16.mxu0 %v1351_v31 }
 0x3fe   :  { %v1361_v8 = vsel %vm1341_vm9, %v1316_v28, %v1318_v21  ;;  %v1360_v61 = vsel %vm1341_vm9, %v6495_v45, %v1316_v28 }
 0x3ff   :  { %4934 = vmatmul.mubr.msk.bf16.vlgmr.msra.gmra.mrb[12].mxu1 %vm1402_vm10, %v5399_v4  ;;  %4935 = vmatmul.mubr.msk.bf16.vlgmr.msra.gmra.mrb[12].mxu0 %vm1402_vm10, %v5399_v4 }
 0x400   :  { %1536 = vmatpush1.bf16.msra.mxu1 %v1348_v43  ;;  %1579 = vmatpush1.bf16.msra.mxu0 %v1350_v32  ;;  %v9030_v43 = vunpack.i.h.bf16 %v6509_v2  ;;  %v9036_v32 = vunpack.i.l.bf16 %v6509_v2 }
 0x401   :  { %1537 = vmatprep.subr.bf16.mxu1 %v1359_v26  ;;  %1580 = vmatprep.subr.bf16.mxu0 %v1361_v8  ;;  %v9029_v26 = vunpack.i.h.bf16 %v6499_v39  ;;  %v9034_v8 = vunpack.i.l.bf16 %v6499_v39 }
 0x402   :  { %1567 = vmatprep.mubr.bf16.mxu1 %v9145_v13  ;;  %1610 = vmatprep.mubr.bf16.mxu0 %v9145_v13 }
 0x404   :  { %1538 = vmatpush1.bf16.msra.mxu1 %v1358_v44  ;;  %1581 = vmatpush1.bf16.msra.mxu0 %v1360_v61  ;;  %v1813_v44 = vsel %vm262_vm3, %v9036_v32, %v9030_v43  ;;  %v1804_v61 = vsel %vm262_vm3, %v9034_v8, %v9029_v26  ;;  %v9046_v26 = vunpack.i.l.bf16 %v6515_v29  ;;  %v9043_v43 = vunpack.i.h.bf16 %v6503_v16 }
 0x405   :  { %1539 = vmatprep.subr.bf16.mxu1 %v1369_v10 }
 0x408   :  { %1540 = vmatpush1.bf16.msra.mxu1 %v1368_v1 }
 0x40b   :  { %4936 = vmatmul.mubr.msk.bf16.vlgmr.msra.gmra.mrb[16].mxu1 %vm1402_vm10, %v5399_v4 }
 0x40c   :  { %2195 = vmatprep.mubr.bf16.mxu1 %v9145_v13 }
 0x448   :  { %v1340_v30 = vpop.permute.xlu1 %1339  ;;  %v1338_v41 = vpop.permute.xlu0 %1337 }
 0x449   :  { %v1371_v23 = vsel %vm1341_vm9, %v1338_v41, %v1340_v30  ;;  %v1370_v45 = vsel %vm1341_vm9, %v6505_v47, %v1338_v41  ;;  %vm4460_vm9 = vcmask 932864  }
 0x44a   :  { %1582 = vmatprep.subr.bf16.mxu0 %v1371_v23  ;;  %v1965_v23 = vpack.c.bf16 %v1813_v44, %v1804_v61  ;;  %v9050_v44 = vunpack.i.l.bf16 %v6507_v46 }
 0x44b   :  { %1583 = vmatpush1.bf16.msra.mxu0 %v1370_v45 }
 0x44e   :  { %4937 = vmatmul.mubr.msk.bf16.vlgmr.msra.gmra.mrb[16].mxu0 %vm1402_vm10, %v5399_v4 }
 0x44f   :  { %2238 = vmatprep.mubr.bf16.mxu0 %v9145_v13 }
 0x4c6   :  { %v1440_v6 = vpop.f32.mrb[8].mxu1 }
 0x4c7   :  { %v1441_v48 = vadd.f32 %v1440_v6, %v6116_v15  ;;  %v1442_v0 = vpop.f32.mrb[9].mxu1 }
 0x4c8   :  { %v1444_v11 = vpop.f32.mrb[10].mxu1 }
 0x4c9   :  { %v1621_v54 = vmax.f32 %v1441_v48, 0.0  ;;  %v1445_v36 = vadd.f32 %v1444_v11, %v6118_v57  ;;  %v1446_v7 = vpop.f32.mrb[11].mxu1 }
 0x4cb   :  { %v6606_v34 = vadd.f32 %v1621_v54, %v6134_v38  ;;  %v1631_v42 = vmax.f32 %v1445_v36, 0.0 }
 0x4cd   :  { %v6609_v47 = vadd.f32 %v1631_v42, %v6154_v24  ;;  %v5289_v4 = vpack.i.bf16 %v6136_v63, %v6606_v34 }
 0x4cf   :  { %5290 = vrot.lane.b32.xlu0 %v5289_v4, %s5458_s24  ;;  %v5299_v22 = vpack.i.bf16 %v6136_v63, %v6609_v47  ;;  %v5304_v14 = vpack.i.bf16 %v6609_v47, %v6136_v63  ;;  %v1950_v49 = vpack.c.bf16 %v6609_v47, %v6606_v34 }
 0x4d1   :  { %5300 = vrot.lane.b32.xlu1 %v5299_v22, %s5458_s24 }
 0x4d2   :  { %v1483_v58 = vpop.f32.mrb[12].mxu1  ;;  %v1526_v17 = vpop.f32.mrb[12].mxu0 }
 0x4d3   :  { %5295 = vrot.lane.b32.xlu0 %v5289_v4, %s5464_s1  ;;  %v1485_v38 = vpop.f32.mrb[13].mxu1  ;;  %v1528_v24 = vpop.f32.mrb[13].mxu0 }
 0x4d4   :  { %v1486_v3 = vadd.f32 %v1485_v38, %v6116_v15  ;;  %v1487_v33 = vpop.f32.mrb[14].mxu1  ;;  %v1530_v20 = vpop.f32.mrb[14].mxu0 }
 0x4d5   :  { %5305 = vrot.lane.b32.xlu1 %v5304_v14, %s5464_s1  ;;  %v1489_v60 = vpop.f32.mrb[15].mxu1  ;;  %v1532_v51 = vpop.f32.mrb[15].mxu0 }
 0x4d6   :  { %v1624_v62 = vmax.f32 %v1486_v3, 0.0  ;;  %v1490_v52 = vadd.f32 %v1489_v60, %v6118_v57 }
 0x4d7   :  { %2035 = vrot.lane.b32.xlu0 %v1950_v49, %s5465_s19 }
 0x4d8   :  { %v6627_v25 = vadd.f32 %v1624_v62, %v6142_v27  ;;  %v1634_v31 = vmax.f32 %v1490_v52, 0.0 }
 0x4da   :  { %9146 = vst [vmem:[#allocation8_spill] sm:$0xff] %v6627_v25  ;;  %v6630_v28 = vadd.f32 %v1634_v31, %v6146_v40  ;;  %v5309_v21 = vpack.i.bf16 %v6627_v25, %v6136_v63 }
 0x4dc   :  { %9147 = vst [vmem:[#allocation9_spill] sm:$0xff] %v6630_v28  ;;  %5310 = vrot.lane.b32.xlu1 %v5309_v21, %s5458_s24  ;;  %v5319_v27 = vpack.i.bf16 %v6630_v28, %v6136_v63  ;;  %v5324_v6 = vpack.i.bf16 %v6136_v63, %v6630_v28  ;;  %v1953_v0 = vpack.c.bf16 %v6630_v28, %v6627_v25 }
 0x4de   :  { %5320 = vrot.lane.b32.xlu0 %v5319_v27, %s5458_s24  ;;  %v1569_v40 = vpop.f32.mrb[16].mxu1 }
 0x4df   :  { %v1571_v10 = vpop.f32.mrb[17].mxu1  ;;  %v1570_v41 = vadd.f32 %v1569_v40, %v6116_v15  ;;  %v9032_v40 = vunpack.i.h.bf16 %v6507_v46 }
 0x4e0   :  { %5315 = vrot.lane.b32.xlu1 %v5309_v21, %s5464_s1  ;;  %v1573_v1 = vpop.f32.mrb[18].mxu1 }
 0x4e1   :  { %v1575_v30 = vpop.f32.mrb[19].mxu1  ;;  %v1627_v45 = vmax.f32 %v1570_v41, 0.0  ;;  %v1574_v21 = vadd.f32 %v1573_v1, %v6118_v57 }
 0x4e3   :  { %v6659_v48 = vadd.f32 %v1627_v45, %v6183_v56  ;;  %v1637_v30 = vmax.f32 %v1574_v21, 0.0 }
 0x4e4   :  { %2065 = vrot.lane.b32.xlu1 %v1965_v23, %s5465_s19 }
 0x4e5   :  { %9148 = vst [vmem:[#allocation10_spill] sm:$0xff] %v6659_v48  ;;  %v5329_v11 = vpack.i.bf16 %v6136_v63, %v6659_v48 }
 0x4e8   :  { %5325 = vrot.lane.b32.xlu1 %v5324_v6, %s5464_s1  ;;  %v1918_v6 = vsel %vm1906_vm12, %v9050_v44, %v9032_v40 }
 0x4ec   :  { %2041 = vrot.lane.b32.xlu1 %v1953_v0, %s5465_s19 }
 0x4f0   :  { %5330 = vrot.lane.b32.xlu1 %v5329_v11, %s5458_s24 }
 0x4f4   :  { %5335 = vrot.lane.b32.xlu1 %v5329_v11, %s5464_s1 }
 0x521   :  { %v1612_v54 = vpop.f32.mrb[16].mxu0 }
 0x522   :  { %v1614_v36 = vpop.f32.mrb[17].mxu0 }
 0x523   :  { %v1616_v7 = vpop.f32.mrb[18].mxu0 }
 0x524   :  { %v1618_v42 = vpop.f32.mrb[19].mxu0  ;;  %v6731_v7 = vadd.f32 %v1637_v30, %v6267_v59  ;;  %v1615_v59 = vadd.f32 %v1614_v36, %v6116_v15  ;;  %v2102_v15 = vsel %vm2099_vm11, %v6533_v35, %v6511_v5 }
 0x525   :  { %v1619_v4 = vadd.f32 %v1618_v42, %v6118_v57 }
 0x526   :  { %9150 = vst [vmem:[#allocation12_spill] sm:$0xff] %v6731_v7  ;;  %v5344_v21 = vpack.i.bf16 %v6731_v7, %v6136_v63 }
 0x527   :  { %v1640_v56 = vmax.f32 %v1619_v4, 0.0 }
 0x529   :  { %v6670_v22 = vadd.f32 %v1640_v56, %v6192_v55 }
 0x52b   :  { %9149 = vst [vmem:[#allocation11_spill] sm:$0xff] %v6670_v22  ;;  %v5359_v58 = vpack.i.bf16 %v6670_v22, %v6136_v63 }
 0x52d   :  { %5360 = vrot.lane.b32.xlu1 %v5359_v58, %s5458_s24 }
 0x541   :  { %v6675_v17 = vpop.permute.xlu0 %5290 }
 0x542   :  { %v5293_v38 = vunpack.i.h.bf16 %v6675_v17  ;;  %v9052_v14 = vunpack.i.l.bf16 %v6675_v17 }
 0x543   :  { %v6679_v24 = vpop.permute.xlu1 %5300 }
 0x544   :  { %v5303_v3 = vunpack.i.h.bf16 %v6679_v24  ;;  %v9051_v33 = vunpack.i.l.bf16 %v6679_v24  ;;  %v6688_v55 = vsel %vm262_vm3, %v9052_v14, %v5293_v38 }
 0x545   :  { %v6683_v20 = vpop.permute.xlu0 %5295 }
 0x546   :  { %v6693_v60 = vsel %vm262_vm3, %v9051_v33, %v5303_v3  ;;  %v9038_v57 = vunpack.i.h.bf16 %v6683_v20 }
 0x547   :  { %v6697_v62 = vpop.permute.xlu1 %5305 }
 0x549   :  { %v2036_v51 = vpop.permute.xlu0 %2035 }
 0x54a   :  { %v2101_v52 = vsel %vm2099_vm11, %v2036_v51, %v6533_v35  ;;  %v2100_v31 = vsel %vm2099_vm11, %v6523_v37, %v2036_v51  ;;  %v5339_v51 = vpack.i.bf16 %v6136_v63, %v6731_v7 }
 0x54b   :  { %2163 = vmatprep.subr.bf16.mxu1 %v2101_v52 }
 0x54c   :  { %2164 = vmatpush1.bf16.msra.mxu1 %v2100_v31  ;;  %v1630_v31 = vmax.f32 %v1615_v59, 0.0 }
 0x54e   :  { %v6704_v27 = vpop.permute.xlu1 %5310  ;;  %v6767_v36 = vadd.f32 %v1630_v31, %v6288_v50  ;;  %v9040_v31 = vunpack.i.h.bf16 %v6515_v29 }
 0x54f   :  { %v5312_v61 = vunpack.i.l.bf16 %v6704_v27  ;;  %v9033_v41 = vunpack.i.h.bf16 %v6704_v27 }
 0x550   :  { %v6709_v10 = vpop.permute.xlu0 %5320 }
 0x551   :  { %v9035_v23 = vunpack.i.h.bf16 %v6709_v10  ;;  %v5322_v37 = vunpack.i.l.bf16 %v6709_v10  ;;  %v1801_v0 = vsel %vm262_vm3, %v5293_v38, %v5312_v61  ;;  %v6736_v42 = vsel %vm262_vm3, %v5312_v61, %v9033_v41 }
 0x552   :  { %v6714_v45 = vpop.permute.xlu1 %5315 }
 0x553   :  { %v9031_v1 = vunpack.i.l.bf16 %v6714_v45  ;;  %v1810_v11 = vsel %vm262_vm3, %v5303_v3, %v5322_v37  ;;  %v6728_v54 = vsel %vm262_vm3, %v5322_v37, %v9035_v23  ;;  %v1956_v37 = vpack.c.bf16 %v6731_v7, %v6659_v48 }
 0x554   :  { %v1962_v56 = vpack.c.bf16 %v1810_v11, %v1801_v0  ;;  %v5349_v0 = vpack.i.bf16 %v6767_v36, %v6136_v63 }
 0x555   :  { %v1908_v4 = vsel %vm1906_vm12, %v9038_v57, %v9031_v1  ;;  %v9048_v1 = vunpack.i.l.bf16 %v6503_v16 }
 0x556   :  { %v6743_v58 = vpop.permute.xlu1 %2065  ;;  %v1973_v38 = vpack.c.bf16 %v1918_v6, %v1908_v4  ;;  %2059 = vrot.lane.b32.xlu0 %v1962_v56, %s5465_s19  ;;  %v5466_v6 = vmov 1  }
 0x557   :  { %5364 = vset.pattern.permute.xlu0 %v5466_v6 }
 0x558   :  { %2081 = vrot.lane.b32.xlu1 %v1973_v38, %s5465_s19 }
 0x55a   :  { %v6752_v52 = vpop.permute.xlu1 %5325  ;;  %5340 = vrot.lane.b32.xlu0 %v5339_v51, %s5458_s24 }
 0x55b   :  { %v9049_v3 = vunpack.i.h.bf16 %v6752_v52 }
 0x55e   :  { %v6757_v61 = vpop.permute.xlu1 %2041  ;;  %5345 = vrot.lane.b32.xlu0 %v5344_v21, %s5464_s1 }
 0x55f   :  { %v2103_v30 = vsel %vm2099_vm11, %v6511_v5, %v6757_v61 }
 0x560   :  { %2206 = vmatprep.subr.bf16.mxu0 %v2103_v30 }
 0x561   :  { %2207 = vmatpush1.bf16.msra.mxu0 %v2102_v15 }
 0x562   :  { %2047 = vrot.lane.b32.xlu0 %v1956_v37, %s5465_s19  ;;  %v6778_v5 = vpop.permute.xlu1 %5330 }
 0x563   :  { %v9039_v30 = vunpack.i.h.bf16 %v6778_v5 }
 0x566   :  { %5350 = vrot.lane.b32.xlu0 %v5349_v0, %s5458_s24  ;;  %v6782_v35 = vpop.permute.xlu1 %5335 }
 0x567   :  { %v9045_v57 = vunpack.i.h.bf16 %v6782_v35 }
 0x56a   :  { %5355 = vrot.lane.b32.xlu0 %v5349_v0, %s5464_s1 }
 0x59f   :  { %v6786_v56 = vpop.permute.xlu1 %5360 }
 0x5a0   :  { %v9037_v63 = vunpack.i.h.bf16 %v6786_v56  ;;  %v5362_v59 = vunpack.i.l.bf16 %v6786_v56 }
 0x5a2   :  { %v6807_v40 = vsel %vm262_vm3, %v5362_v59, %v9037_v63 }
 0x5c8   :  { %v6776_v11 = vpop.permute.xlu0 %2059 }
 0x5cc   :  { %v6780_v50 = vpop.permute.xlu0 %5340 }
 0x5cd   :  { %v9047_v51 = vunpack.i.h.bf16 %v6780_v50 }
 0x5cf   :  { %v1816_v41 = vsel %vm262_vm3, %v9047_v51, %v5362_v59 }
 0x5d0   :  { %v6784_v4 = vpop.permute.xlu0 %5345 }
 0x5d1   :  { %v9044_v15 = vunpack.i.l.bf16 %v6784_v4 }
 0x5d3   :  { %v1921_v59 = vsel %vm1906_vm12, %v9049_v3, %v9044_v15  ;;  %v5468_v15 = vmov 3  }
 0x5d4   :  { %v6788_v38 = vpop.permute.xlu0 %2047 }
 0x5d8   :  { %v6794_v21 = vpop.permute.xlu0 %5350 }
 0x5d9   :  { %v9041_v37 = vunpack.i.h.bf16 %v6794_v21  ;;  %v5352_v0 = vunpack.i.l.bf16 %v6794_v21 }
 0x5db   :  { %v1807_v8 = vsel %vm262_vm3, %v9039_v30, %v5352_v0  ;;  %v6818_v49 = vsel %vm262_vm3, %v5352_v0, %v9041_v37  ;;  %v6857_v37 = vld [vmem:[%s9004_s5] sm:$0xff] }
 0x5dc   :  { %v6820_v23 = vpop.permute.xlu0 %5355  ;;  %v1968_v32 = vpack.c.bf16 %v1816_v41, %v1807_v8  ;;  %v1924_v8 = vsel %vm1906_vm12, %v9046_v26, %v9040_v31  ;;  %v1911_v41 = vsel %vm1906_vm12, %v9048_v1, %v9043_v43  ;;  %v6852_v31 = vld [vmem:[%s9004_s5 + $0x8] sm:$0xff] }
 0x5dd   :  { %v9042_v30 = vunpack.i.l.bf16 %v6820_v23 }
 0x5de   :  { %2071 = vrot.lane.b32.xlu0 %v1968_v32, %s5465_s19  ;;  %v1976_v32 = vpack.c.bf16 %v1921_v59, %v1911_v41 }
 0x5df   :  { %v1914_v0 = vsel %vm1906_vm12, %v9045_v57, %v9042_v30 }
 0x5e0   :  { %v1979_v63 = vpack.c.bf16 %v1924_v8, %v1914_v0  ;;  %v6864_v8 = vpop.permute.xlu1 %2081 }
 0x5e2   :  { %2093 = vrot.lane.b32.xlu1 %v1979_v63, %s5465_s19  ;;  %2087 = vrot.lane.b32.xlu0 %v1976_v32, %s5465_s19  ;;  %v5467_v63 = vmov 2  }
 0x5e6   :  { %2475 = vperm.xlu1 %5157, %v6852_v31   ;;  %2501 = vperm.xlu0 %5364, %v6857_v37  }
 0x5ea   :  { %5365 = vset.pattern.permute.xlu1 %v5466_v6  ;;  %5367 = vset.pattern.permute.xlu0 %v5467_v63 }
 0x5eb   :  { %2505 = vperm.xlu1 %5365, %v6852_v31  }
 0x5ef   :  { %5366 = vset.pattern.permute.xlu1 %v5467_v63 }
 0x650   :  { %v6862_v59 = vpop.permute.xlu0 %2071 }
 0x654   :  { %v6866_v41 = vpop.permute.xlu0 %2087  ;;  %v6868_v0 = vpop.permute.xlu1 %2093 }
 0x665   :  { %v6870_v32 = vpop.permute.xlu0 %2501  ;;  %v6875_v6 = vpop.permute.xlu1 %2475 }
 0x666   :  { %v2508_v30 = vmul.f32 0.0, %v6870_v32  ;;  %9151 = vst [vmem:[#allocation13_spill] sm:$0xff] %v6875_v6 }
 0x668   :  { %2558 = vrot.lane.b32.xlu0 %v2508_v30, %s5454_s22  ;;  %2552 = vrot.lane.b32.xlu1 %v2508_v30, %s5454_s22 }
 0x66a   :  { %v6879_v63 = vpop.permute.xlu1 %2505 }
 0x66b   :  { %9152 = vst [vmem:[#allocation14_spill] sm:$0xff] %v6879_v63  ;;  %v2519_v43 = vmul.f32 0.0, %v6879_v63 }
 0x66c   :  { %2562 = vrot.lane.b32.xlu0 %v2508_v30, %s5454_s22  ;;  %2556 = vrot.lane.b32.xlu1 %v2508_v30, %s5454_s22 }
 0x670   :  { %2570 = vrot.lane.b32.xlu0 %v2508_v30, %s5454_s22  ;;  %2564 = vrot.lane.b32.xlu1 %v2508_v30, %s5454_s22 }
 0x674   :  { %2574 = vrot.lane.b32.xlu0 %v2519_v43, %s5454_s22  ;;  %2568 = vrot.lane.b32.xlu1 %v2508_v30, %s5454_s22 }
 0x678   :  { %2578 = vrot.lane.b32.xlu0 %v2519_v43, %s5454_s22  ;;  %2580 = vrot.lane.b32.xlu1 %v2519_v43, %s5454_s22 }
 0x67c   :  { %2586 = vrot.lane.b32.xlu0 %v2519_v43, %s5454_s22  ;;  %2584 = vrot.lane.b32.xlu1 %v2519_v43, %s5454_s22 }
 0x680   :  { %2590 = vrot.lane.b32.xlu0 %v2519_v43, %s5454_s22  ;;  %2592 = vrot.lane.b32.xlu1 %v2519_v43, %s5454_s22 }
 0x684   :  { %2643 = vperm.xlu1 %5366, %v6857_v37   ;;  %2647 = vperm.xlu0 %5367, %v6852_v31  }
 0x688   :  { %5368 = vset.pattern.permute.xlu0 %v5468_v15  ;;  %5369 = vset.pattern.permute.xlu1 %v5468_v15 }
 0x6da   :  { %v6894_v30 = vpop.permute.xlu1 %2552  ;;  %v6898_v26 = vpop.permute.xlu0 %2558 }
 0x6db   :  { %9153 = vst [vmem:[#allocation15_spill] sm:$0xff] %v6894_v30  ;;  %9155 = vst [vmem:[#allocation17_spill] sm:$0xff] %v6898_v26 }
 0x6de   :  { %v6896_v57 = vpop.permute.xlu1 %2556  ;;  %v6902_v1 = vpop.permute.xlu0 %2562 }
 0x6df   :  { %9154 = vst [vmem:[#allocation16_spill] sm:$0xff] %v6896_v57  ;;  %9157 = vst [vmem:[#allocation19_spill] sm:$0xff] %v6902_v1 }
 0x6e2   :  { %v6900_v51 = vpop.permute.xlu1 %2564  ;;  %v6906_v43 = vpop.permute.xlu0 %2570 }
 0x6e3   :  { %9156 = vst [vmem:[#allocation18_spill] sm:$0xff] %v6900_v51  ;;  %9159 = vst [vmem:[#allocation21_spill] sm:$0xff] %v6906_v43 }
 0x6e6   :  { %v6904_v3 = vpop.permute.xlu1 %2568  ;;  %v6910_v33 = vpop.permute.xlu0 %2574 }
 0x6e7   :  { %9158 = vst [vmem:[#allocation20_spill] sm:$0xff] %v6904_v3  ;;  %9161 = vst [vmem:[#allocation23_spill] sm:$0xff] %v6910_v33 }
 0x6ea   :  { %v6908_v44 = vpop.permute.xlu1 %2580  ;;  %v6914_v15 = vpop.permute.xlu0 %2578 }
 0x6eb   :  { %9160 = vst [vmem:[#allocation22_spill] sm:$0xff] %v6908_v44  ;;  %9163 = vst [vmem:[#allocation25_spill] sm:$0xff] %v6914_v15 }
 0x6ee   :  { %v6912_v14 = vpop.permute.xlu1 %2584  ;;  %v6918_v6 = vpop.permute.xlu0 %2586 }
 0x6ef   :  { %9162 = vst [vmem:[#allocation24_spill] sm:$0xff] %v6912_v14  ;;  %9165 = vst [vmem:[#allocation27_spill] sm:$0xff] %v6918_v6 }
 0x6f2   :  { %v6916_v30 = vpop.permute.xlu1 %2592  ;;  %v6925_v43 = vpop.permute.xlu0 %2590 }
 0x6f3   :  { %9164 = vst [vmem:[#allocation26_spill] sm:$0xff] %v6916_v30  ;;  %9166 = vst [vmem:[#allocation28_spill] sm:$0xff] %v6925_v43  ;;  %v5469_v43 = vmov 4  }
 0x703   :  { %v6920_v26 = vpop.permute.xlu1 %2643  ;;  %v6929_v33 = vpop.permute.xlu0 %2647 }
 0x704   :  { %v2650_v1 = vmul.f32 0.0, %v6920_v26  ;;  %9167 = vst [vmem:[#allocation29_spill] sm:$0xff] %v6929_v33  ;;  %v2661_v30 = vmul.f32 0.0, %v6929_v33 }
 0x706   :  { %2698 = vrot.lane.b32.xlu0 %v2650_v1, %s5456_s0  ;;  %2694 = vrot.lane.b32.xlu1 %v2650_v1, %s5456_s0 }
 0x70a   :  { %2706 = vrot.lane.b32.xlu0 %v2650_v1, %s5456_s0  ;;  %2700 = vrot.lane.b32.xlu1 %v2650_v1, %s5456_s0 }
 0x70e   :  { %2710 = vrot.lane.b32.xlu0 %v2650_v1, %s5456_s0  ;;  %2704 = vrot.lane.b32.xlu1 %v2650_v1, %s5456_s0 }
 0x712   :  { %2722 = vrot.lane.b32.xlu0 %v2661_v30, %s5456_s0  ;;  %2712 = vrot.lane.b32.xlu1 %v2650_v1, %s5456_s0 }
 0x716   :  { %2726 = vrot.lane.b32.xlu0 %v2661_v30, %s5456_s0  ;;  %2716 = vrot.lane.b32.xlu1 %v2661_v30, %s5456_s0 }
 0x71a   :  { %2734 = vrot.lane.b32.xlu0 %v2661_v30, %s5456_s0  ;;  %2720 = vrot.lane.b32.xlu1 %v2661_v30, %s5456_s0 }
 0x71e   :  { %2785 = vperm.xlu0 %5368, %v6857_v37   ;;  %2728 = vrot.lane.b32.xlu1 %v2661_v30, %s5456_s0 }
 0x722   :  { %2732 = vrot.lane.b32.xlu1 %v2661_v30, %s5456_s0  ;;  %5371 = vset.pattern.permute.xlu0 %v5469_v43 }
 0x726   :  { %2789 = vperm.xlu1 %5369, %v6852_v31  }
 0x72a   :  { %5370 = vset.pattern.permute.xlu1 %v5469_v43 }
 0x778   :  { %v6944_v1 = vpop.permute.xlu1 %2694  ;;  %v6946_v6 = vpop.permute.xlu0 %2698 }
 0x779   :  { %9168 = vst [vmem:[#allocation30_spill] sm:$0xff] %v6944_v1  ;;  %9169 = vst [vmem:[#allocation31_spill] sm:$0xff] %v6946_v6 }
 0x77c   :  { %v6948_v3 = vpop.permute.xlu1 %2700  ;;  %v6950_v51 = vpop.permute.xlu0 %2706 }
 0x77d   :  { %9170 = vst [vmem:[#allocation32_spill] sm:$0xff] %v6948_v3  ;;  %9171 = vst [vmem:[#allocation33_spill] sm:$0xff] %v6950_v51 }
 0x780   :  { %v6952_v14 = vpop.permute.xlu1 %2704  ;;  %v6954_v44 = vpop.permute.xlu0 %2710 }
 0x781   :  { %9172 = vst [vmem:[#allocation34_spill] sm:$0xff] %v6952_v14  ;;  %9173 = vst [vmem:[#allocation35_spill] sm:$0xff] %v6954_v44 }
 0x784   :  { %v6956_v15 = vpop.permute.xlu1 %2712  ;;  %v6958_v30 = vpop.permute.xlu0 %2722 }
 0x785   :  { %9174 = vst [vmem:[#allocation36_spill] sm:$0xff] %v6956_v15  ;;  %9175 = vst [vmem:[#allocation37_spill] sm:$0xff] %v6958_v30 }
 0x788   :  { %v6960_v57 = vpop.permute.xlu1 %2716  ;;  %v6962_v7 = vpop.permute.xlu0 %2726 }
 0x789   :  { %9176 = vst [vmem:[#allocation38_spill] sm:$0xff] %v6960_v57  ;;  %9177 = vst [vmem:[#allocation39_spill] sm:$0xff] %v6962_v7 }
 0x78c   :  { %v6964_v43 = vpop.permute.xlu1 %2720  ;;  %v6966_v1 = vpop.permute.xlu0 %2734 }
 0x78d   :  { %9178 = vst [vmem:[#allocation40_spill] sm:$0xff] %v6964_v43  ;;  %9179 = vst [vmem:[#allocation41_spill] sm:$0xff] %v6966_v1 }
 0x790   :  { %v6968_v6 = vpop.permute.xlu1 %2728 }
 0x791   :  { %9180 = vst [vmem:[#allocation42_spill] sm:$0xff] %v6968_v6 }
 0x794   :  { %v6975_v15 = vpop.permute.xlu1 %2732 }
 0x795   :  { %9181 = vst [vmem:[#allocation43_spill] sm:$0xff] %v6975_v15  ;;  %v5470_v15 = vmov 5  }
 0x79d   :  { %v6970_v3 = vpop.permute.xlu0 %2785 }
 0x79e   :  { %v2792_v14 = vmul.f32 0.0, %v6970_v3 }
 0x7a0   :  { %2842 = vrot.lane.b32.xlu0 %v2792_v14, %s5457_s23  ;;  %2836 = vrot.lane.b32.xlu1 %v2792_v14, %s5457_s23 }
 0x7a4   :  { %2846 = vrot.lane.b32.xlu0 %v2792_v14, %s5457_s23  ;;  %2840 = vrot.lane.b32.xlu1 %v2792_v14, %s5457_s23 }
 0x7a5   :  { %v6979_v57 = vpop.permute.xlu1 %2789 }
 0x7a6   :  { %9182 = vst [vmem:[#allocation44_spill] sm:$0xff] %v6979_v57  ;;  %v2803_v1 = vmul.f32 0.0, %v6979_v57 }
 0x7a8   :  { %2854 = vrot.lane.b32.xlu0 %v2792_v14, %s5457_s23  ;;  %2848 = vrot.lane.b32.xlu1 %v2792_v14, %s5457_s23 }
 0x7ac   :  { %2852 = vrot.lane.b32.xlu1 %v2792_v14, %s5457_s23  ;;  %2858 = vrot.lane.b32.xlu0 %v2803_v1, %s5457_s23 }
 0x7b0   :  { %2864 = vrot.lane.b32.xlu1 %v2803_v1, %s5457_s23  ;;  %2862 = vrot.lane.b32.xlu0 %v2803_v1, %s5457_s23 }
 0x7b4   :  { %2868 = vrot.lane.b32.xlu1 %v2803_v1, %s5457_s23  ;;  %2870 = vrot.lane.b32.xlu0 %v2803_v1, %s5457_s23 }
 0x7b8   :  { %2876 = vrot.lane.b32.xlu1 %v2803_v1, %s5457_s23  ;;  %2874 = vrot.lane.b32.xlu0 %v2803_v1, %s5457_s23 }
 0x7bc   :  { %2927 = vperm.xlu1 %5370, %v6857_v37   ;;  %2931 = vperm.xlu0 %5371, %v6852_v31  }
 0x7c0   :  { %5372 = vset.pattern.permute.xlu0 %v5470_v15  ;;  %5373 = vset.pattern.permute.xlu1 %v5470_v15 }
 0x812   :  { %v6994_v14 = vpop.permute.xlu1 %2836  ;;  %v6998_v44 = vpop.permute.xlu0 %2842 }
 0x813   :  { %9183 = vst [vmem:[#allocation45_spill] sm:$0xff] %v6994_v14  ;;  %9185 = vst [vmem:[#allocation47_spill] sm:$0xff] %v6998_v44 }
 0x816   :  { %v6996_v6 = vpop.permute.xlu1 %2840  ;;  %v7002_v7 = vpop.permute.xlu0 %2846 }
 0x817   :  { %9184 = vst [vmem:[#allocation46_spill] sm:$0xff] %v6996_v6  ;;  %9187 = vst [vmem:[#allocation49_spill] sm:$0xff] %v7002_v7 }
 0x81a   :  { %v7000_v51 = vpop.permute.xlu1 %2848  ;;  %v7006_v1 = vpop.permute.xlu0 %2854 }
 0x81b   :  { %9186 = vst [vmem:[#allocation48_spill] sm:$0xff] %v7000_v51  ;;  %9189 = vst [vmem:[#allocation51_spill] sm:$0xff] %v7006_v1 }
 0x81e   :  { %v7004_v30 = vpop.permute.xlu1 %2852  ;;  %v7010_v48 = vpop.permute.xlu0 %2858 }
 0x81f   :  { %9188 = vst [vmem:[#allocation50_spill] sm:$0xff] %v7004_v30  ;;  %9191 = vst [vmem:[#allocation53_spill] sm:$0xff] %v7010_v48 }
 0x822   :  { %v7008_v43 = vpop.permute.xlu1 %2864  ;;  %v7014_v15 = vpop.permute.xlu0 %2862 }
 0x823   :  { %9190 = vst [vmem:[#allocation52_spill] sm:$0xff] %v7008_v43  ;;  %9193 = vst [vmem:[#allocation55_spill] sm:$0xff] %v7014_v15 }
 0x826   :  { %v7012_v28 = vpop.permute.xlu1 %2868  ;;  %v7018_v6 = vpop.permute.xlu0 %2870 }
 0x827   :  { %9192 = vst [vmem:[#allocation54_spill] sm:$0xff] %v7012_v28  ;;  %9195 = vst [vmem:[#allocation57_spill] sm:$0xff] %v7018_v6 }
 0x82a   :  { %v7016_v14 = vpop.permute.xlu1 %2876  ;;  %v7025_v1 = vpop.permute.xlu0 %2874 }
 0x82b   :  { %9194 = vst [vmem:[#allocation56_spill] sm:$0xff] %v7016_v14  ;;  %9196 = vst [vmem:[#allocation58_spill] sm:$0xff] %v7025_v1  ;;  %v5471_v1 = vmov 6  }
 0x83b   :  { %v7020_v44 = vpop.permute.xlu1 %2927  ;;  %v7029_v48 = vpop.permute.xlu0 %2931 }
 0x83c   :  { %v2934_v7 = vmul.f32 0.0, %v7020_v44  ;;  %9197 = vst [vmem:[#allocation59_spill] sm:$0xff] %v7029_v48  ;;  %v2945_v14 = vmul.f32 0.0, %v7029_v48 }
 0x83e   :  { %2982 = vrot.lane.b32.xlu0 %v2934_v7, %s5458_s24  ;;  %2978 = vrot.lane.b32.xlu1 %v2934_v7, %s5458_s24 }
 0x842   :  { %2990 = vrot.lane.b32.xlu0 %v2934_v7, %s5458_s24  ;;  %2984 = vrot.lane.b32.xlu1 %v2934_v7, %s5458_s24 }
 0x846   :  { %2994 = vrot.lane.b32.xlu0 %v2934_v7, %s5458_s24  ;;  %2988 = vrot.lane.b32.xlu1 %v2934_v7, %s5458_s24 }
 0x84a   :  { %3006 = vrot.lane.b32.xlu0 %v2945_v14, %s5458_s24  ;;  %2996 = vrot.lane.b32.xlu1 %v2934_v7, %s5458_s24 }
 0x84e   :  { %3010 = vrot.lane.b32.xlu0 %v2945_v14, %s5458_s24  ;;  %3000 = vrot.lane.b32.xlu1 %v2945_v14, %s5458_s24 }
 0x852   :  { %3018 = vrot.lane.b32.xlu0 %v2945_v14, %s5458_s24  ;;  %3004 = vrot.lane.b32.xlu1 %v2945_v14, %s5458_s24 }
 0x856   :  { %3069 = vperm.xlu0 %5372, %v6857_v37   ;;  %3012 = vrot.lane.b32.xlu1 %v2945_v14, %s5458_s24 }
 0x85a   :  { %3016 = vrot.lane.b32.xlu1 %v2945_v14, %s5458_s24  ;;  %5375 = vset.pattern.permute.xlu0 %v5471_v1 }
 0x85e   :  { %3073 = vperm.xlu1 %5373, %v6852_v31  }
 0x862   :  { %5374 = vset.pattern.permute.xlu1 %v5471_v1 }
 0x8b0   :  { %v7044_v7 = vpop.permute.xlu1 %2978  ;;  %v7046_v6 = vpop.permute.xlu0 %2982 }
 0x8b1   :  { %9198 = vst [vmem:[#allocation60_spill] sm:$0xff] %v7044_v7  ;;  %9199 = vst [vmem:[#allocation61_spill] sm:$0xff] %v7046_v6 }
 0x8b4   :  { %v7048_v30 = vpop.permute.xlu1 %2984  ;;  %v7050_v51 = vpop.permute.xlu0 %2990 }
 0x8b5   :  { %9200 = vst [vmem:[#allocation62_spill] sm:$0xff] %v7048_v30  ;;  %9201 = vst [vmem:[#allocation63_spill] sm:$0xff] %v7050_v51 }
 0x8b8   :  { %v7052_v28 = vpop.permute.xlu1 %2988  ;;  %v7054_v43 = vpop.permute.xlu0 %2994 }
 0x8b9   :  { %9202 = vst [vmem:[#allocation64_spill] sm:$0xff] %v7052_v28  ;;  %9203 = vst [vmem:[#allocation65_spill] sm:$0xff] %v7054_v43 }
 0x8bc   :  { %v7056_v15 = vpop.permute.xlu1 %2996  ;;  %v7058_v14 = vpop.permute.xlu0 %3006 }
 0x8bd   :  { %9204 = vst [vmem:[#allocation66_spill] sm:$0xff] %v7056_v15  ;;  %9205 = vst [vmem:[#allocation67_spill] sm:$0xff] %v7058_v14 }
 0x8c0   :  { %v7060_v57 = vpop.permute.xlu1 %3000  ;;  %v7062_v63 = vpop.permute.xlu0 %3010 }
 0x8c1   :  { %9206 = vst [vmem:[#allocation68_spill] sm:$0xff] %v7060_v57  ;;  %9207 = vst [vmem:[#allocation69_spill] sm:$0xff] %v7062_v63 }
 0x8c4   :  { %v7064_v1 = vpop.permute.xlu1 %3004  ;;  %v7066_v7 = vpop.permute.xlu0 %3018 }
 0x8c5   :  { %9208 = vst [vmem:[#allocation70_spill] sm:$0xff] %v7064_v1  ;;  %9209 = vst [vmem:[#allocation71_spill] sm:$0xff] %v7066_v7 }
 0x8c8   :  { %v7068_v6 = vpop.permute.xlu1 %3012 }
 0x8c9   :  { %9210 = vst [vmem:[#allocation72_spill] sm:$0xff] %v7068_v6 }
 0x8cc   :  { %v7075_v15 = vpop.permute.xlu1 %3016 }
 0x8cd   :  { %9211 = vst [vmem:[#allocation73_spill] sm:$0xff] %v7075_v15  ;;  %v5472_v15 = vmov 7  }
 0x8d5   :  { %v7070_v30 = vpop.permute.xlu0 %3069 }
 0x8d6   :  { %v3076_v28 = vmul.f32 0.0, %v7070_v30 }
 0x8d8   :  { %3126 = vrot.lane.b32.xlu0 %v3076_v28, %s5459_s25  ;;  %3120 = vrot.lane.b32.xlu1 %v3076_v28, %s5459_s25 }
 0x8dc   :  { %3130 = vrot.lane.b32.xlu0 %v3076_v28, %s5459_s25  ;;  %3124 = vrot.lane.b32.xlu1 %v3076_v28, %s5459_s25 }
 0x8dd   :  { %v7079_v57 = vpop.permute.xlu1 %3073 }
 0x8de   :  { %9212 = vst [vmem:[#allocation74_spill] sm:$0xff] %v7079_v57  ;;  %v3087_v7 = vmul.f32 0.0, %v7079_v57 }
 0x8e0   :  { %3138 = vrot.lane.b32.xlu0 %v3076_v28, %s5459_s25  ;;  %3132 = vrot.lane.b32.xlu1 %v3076_v28, %s5459_s25 }
 0x8e4   :  { %3136 = vrot.lane.b32.xlu1 %v3076_v28, %s5459_s25  ;;  %3142 = vrot.lane.b32.xlu0 %v3087_v7, %s5459_s25 }
 0x8e8   :  { %3148 = vrot.lane.b32.xlu1 %v3087_v7, %s5459_s25  ;;  %3146 = vrot.lane.b32.xlu0 %v3087_v7, %s5459_s25 }
 0x8ec   :  { %3152 = vrot.lane.b32.xlu1 %v3087_v7, %s5459_s25  ;;  %3154 = vrot.lane.b32.xlu0 %v3087_v7, %s5459_s25 }
 0x8f0   :  { %3160 = vrot.lane.b32.xlu1 %v3087_v7, %s5459_s25  ;;  %3158 = vrot.lane.b32.xlu0 %v3087_v7, %s5459_s25 }
 0x8f4   :  { %3211 = vperm.xlu1 %5374, %v6857_v37   ;;  %3215 = vperm.xlu0 %5375, %v6852_v31  }
 0x8f8   :  { %5376 = vset.pattern.permute.xlu0 %v5472_v15  ;;  %5377 = vset.pattern.permute.xlu1 %v5472_v15 }
 0x94a   :  { %v7094_v28 = vpop.permute.xlu1 %3120  ;;  %v7098_v43 = vpop.permute.xlu0 %3126 }
 0x94b   :  { %9213 = vst [vmem:[#allocation75_spill] sm:$0xff] %v7094_v28  ;;  %9215 = vst [vmem:[#allocation77_spill] sm:$0xff] %v7098_v43 }
 0x94e   :  { %v7096_v6 = vpop.permute.xlu1 %3124  ;;  %v7102_v63 = vpop.permute.xlu0 %3130 }
 0x94f   :  { %9214 = vst [vmem:[#allocation76_spill] sm:$0xff] %v7096_v6  ;;  %9217 = vst [vmem:[#allocation79_spill] sm:$0xff] %v7102_v63 }
 0x952   :  { %v7100_v51 = vpop.permute.xlu1 %3132  ;;  %v7106_v7 = vpop.permute.xlu0 %3138 }
 0x953   :  { %9216 = vst [vmem:[#allocation78_spill] sm:$0xff] %v7100_v51  ;;  %9219 = vst [vmem:[#allocation81_spill] sm:$0xff] %v7106_v7 }
 0x956   :  { %v7104_v14 = vpop.permute.xlu1 %3136  ;;  %v7110_v57 = vpop.permute.xlu0 %3142 }
 0x957   :  { %9218 = vst [vmem:[#allocation80_spill] sm:$0xff] %v7104_v14  ;;  %9221 = vst [vmem:[#allocation83_spill] sm:$0xff] %v7110_v57 }
 0x95a   :  { %v7108_v1 = vpop.permute.xlu1 %3148  ;;  %v7114_v15 = vpop.permute.xlu0 %3146 }
 0x95b   :  { %9220 = vst [vmem:[#allocation82_spill] sm:$0xff] %v7108_v1  ;;  %9223 = vst [vmem:[#allocation85_spill] sm:$0xff] %v7114_v15 }
 0x95e   :  { %v7112_v25 = vpop.permute.xlu1 %3152  ;;  %v7118_v6 = vpop.permute.xlu0 %3154 }
 0x95f   :  { %9222 = vst [vmem:[#allocation84_spill] sm:$0xff] %v7112_v25  ;;  %9225 = vst [vmem:[#allocation87_spill] sm:$0xff] %v7118_v6 }
 0x962   :  { %v7116_v28 = vpop.permute.xlu1 %3160  ;;  %v7125_v7 = vpop.permute.xlu0 %3158 }
 0x963   :  { %9224 = vst [vmem:[#allocation86_spill] sm:$0xff] %v7116_v28  ;;  %9226 = vst [vmem:[#allocation88_spill] sm:$0xff] %v7125_v7  ;;  %v5473_v7 = vmov 8  }
 0x973   :  { %v7120_v43 = vpop.permute.xlu1 %3211  ;;  %v7129_v57 = vpop.permute.xlu0 %3215 }
 0x974   :  { %v3218_v63 = vmul.f32 0.0, %v7120_v43  ;;  %9227 = vst [vmem:[#allocation89_spill] sm:$0xff] %v7129_v57  ;;  %v3229_v28 = vmul.f32 0.0, %v7129_v57 }
 0x976   :  { %3266 = vrot.lane.b32.xlu0 %v3218_v63, %s5460_s26  ;;  %3262 = vrot.lane.b32.xlu1 %v3218_v63, %s5460_s26 }
 0x97a   :  { %3274 = vrot.lane.b32.xlu0 %v3218_v63, %s5460_s26  ;;  %3268 = vrot.lane.b32.xlu1 %v3218_v63, %s5460_s26 }
 0x97e   :  { %3278 = vrot.lane.b32.xlu0 %v3218_v63, %s5460_s26  ;;  %3272 = vrot.lane.b32.xlu1 %v3218_v63, %s5460_s26 }
 0x982   :  { %3290 = vrot.lane.b32.xlu0 %v3229_v28, %s5460_s26  ;;  %3280 = vrot.lane.b32.xlu1 %v3218_v63, %s5460_s26 }
 0x986   :  { %3294 = vrot.lane.b32.xlu0 %v3229_v28, %s5460_s26  ;;  %3284 = vrot.lane.b32.xlu1 %v3229_v28, %s5460_s26 }
 0x98a   :  { %3302 = vrot.lane.b32.xlu0 %v3229_v28, %s5460_s26  ;;  %3288 = vrot.lane.b32.xlu1 %v3229_v28, %s5460_s26 }
 0x98e   :  { %3353 = vperm.xlu0 %5376, %v6857_v37   ;;  %3296 = vrot.lane.b32.xlu1 %v3229_v28, %s5460_s26 }
 0x992   :  { %3300 = vrot.lane.b32.xlu1 %v3229_v28, %s5460_s26  ;;  %5379 = vset.pattern.permute.xlu0 %v5473_v7 }
 0x996   :  { %3357 = vperm.xlu1 %5377, %v6852_v31  }
 0x99a   :  { %5378 = vset.pattern.permute.xlu1 %v5473_v7 }
 0x9e8   :  { %v7144_v63 = vpop.permute.xlu1 %3262  ;;  %v7146_v6 = vpop.permute.xlu0 %3266 }
 0x9e9   :  { %9228 = vst [vmem:[#allocation90_spill] sm:$0xff] %v7144_v63  ;;  %9229 = vst [vmem:[#allocation91_spill] sm:$0xff] %v7146_v6 }
 0x9ec   :  { %v7148_v14 = vpop.permute.xlu1 %3268  ;;  %v7150_v51 = vpop.permute.xlu0 %3274 }
 0x9ed   :  { %9230 = vst [vmem:[#allocation92_spill] sm:$0xff] %v7148_v14  ;;  %9231 = vst [vmem:[#allocation93_spill] sm:$0xff] %v7150_v51 }
 0x9f0   :  { %v7152_v25 = vpop.permute.xlu1 %3272  ;;  %v7154_v1 = vpop.permute.xlu0 %3278 }
 0x9f1   :  { %9232 = vst [vmem:[#allocation94_spill] sm:$0xff] %v7152_v25  ;;  %9233 = vst [vmem:[#allocation95_spill] sm:$0xff] %v7154_v1 }
 0x9f4   :  { %v7156_v15 = vpop.permute.xlu1 %3280  ;;  %v7158_v28 = vpop.permute.xlu0 %3290 }
 0x9f5   :  { %9234 = vst [vmem:[#allocation96_spill] sm:$0xff] %v7156_v15  ;;  %9235 = vst [vmem:[#allocation97_spill] sm:$0xff] %v7158_v28 }
 0x9f8   :  { %v7160_v57 = vpop.permute.xlu1 %3284  ;;  %v7162_v48 = vpop.permute.xlu0 %3294 }
 0x9f9   :  { %9236 = vst [vmem:[#allocation98_spill] sm:$0xff] %v7160_v57  ;;  %9237 = vst [vmem:[#allocation99_spill] sm:$0xff] %v7162_v48 }
 0x9fc   :  { %v7164_v7 = vpop.permute.xlu1 %3288  ;;  %v7166_v63 = vpop.permute.xlu0 %3302 }
 0x9fd   :  { %9238 = vst [vmem:[#allocation100_spill] sm:$0xff] %v7164_v7  ;;  %9239 = vst [vmem:[#allocation101_spill] sm:$0xff] %v7166_v63 }
 0xa00   :  { %v7168_v6 = vpop.permute.xlu1 %3296 }
 0xa01   :  { %9240 = vst [vmem:[#allocation102_spill] sm:$0xff] %v7168_v6 }
 0xa04   :  { %v7175_v15 = vpop.permute.xlu1 %3300 }
 0xa05   :  { %9242 = vst [vmem:[#allocation104_spill] sm:$0xff] %v7175_v15  ;;  %v5475_v15 = vmov 9  }
 0xa0d   :  { %v7170_v14 = vpop.permute.xlu0 %3353 }
 0xa0e   :  { %9241 = vst [vmem:[#allocation103_spill] sm:$0xff] %v7170_v14  ;;  %v3361_v25 = vmul.f32 0.0, %v7170_v14 }
 0xa10   :  { %3402 = vrot.lane.b32.xlu0 %v3361_v25, %s5474_s2  ;;  %3404 = vrot.lane.b32.xlu1 %v3361_v25, %s5474_s2 }
 0xa14   :  { %3410 = vrot.lane.b32.xlu0 %v3361_v25, %s5474_s2  ;;  %3408 = vrot.lane.b32.xlu1 %v3361_v25, %s5474_s2 }
 0xa15   :  { %v7179_v57 = vpop.permute.xlu1 %3357 }
 0xa16   :  { %9243 = vst [vmem:[#allocation105_spill] sm:$0xff] %v7179_v57  ;;  %v3371_v63 = vmul.f32 0.0, %v7179_v57 }
 0xa18   :  { %3414 = vrot.lane.b32.xlu0 %v3361_v25, %s5474_s2  ;;  %3416 = vrot.lane.b32.xlu1 %v3361_v25, %s5474_s2 }
 0xa1c   :  { %3424 = vrot.lane.b32.xlu1 %v3371_v63, %s5474_s2  ;;  %3422 = vrot.lane.b32.xlu0 %v3371_v63, %s5474_s2 }
 0xa20   :  { %3428 = vrot.lane.b32.xlu1 %v3371_v63, %s5474_s2  ;;  %3430 = vrot.lane.b32.xlu0 %v3371_v63, %s5474_s2 }
 0xa24   :  { %3436 = vrot.lane.b32.xlu1 %v3371_v63, %s5474_s2  ;;  %3434 = vrot.lane.b32.xlu0 %v3371_v63, %s5474_s2 }
 0xa28   :  { %3508 = vperm.xlu1 %5378, %v6857_v37   ;;  %3512 = vperm.xlu0 %5379, %v6852_v31  }
 0xa2c   :  { %5380 = vset.pattern.permute.xlu0 %v5475_v15  ;;  %5381 = vset.pattern.permute.xlu1 %v5475_v15 }
 0xa82   :  { %v7192_v25 = vpop.permute.xlu1 %3404  ;;  %v7196_v1 = vpop.permute.xlu0 %3402 }
 0xa83   :  { %9244 = vst [vmem:[#allocation106_spill] sm:$0xff] %v7192_v25  ;;  %9246 = vst [vmem:[#allocation108_spill] sm:$0xff] %v7196_v1 }
 0xa86   :  { %v7194_v6 = vpop.permute.xlu1 %3408  ;;  %v7200_v48 = vpop.permute.xlu0 %3410 }
 0xa87   :  { %9245 = vst [vmem:[#allocation107_spill] sm:$0xff] %v7194_v6  ;;  %9248 = vst [vmem:[#allocation110_spill] sm:$0xff] %v7200_v48 }
 0xa8a   :  { %v7198_v51 = vpop.permute.xlu1 %3416  ;;  %v7204_v63 = vpop.permute.xlu0 %3414 }
 0xa8b   :  { %9247 = vst [vmem:[#allocation109_spill] sm:$0xff] %v7198_v51  ;;  %9250 = vst [vmem:[#allocation112_spill] sm:$0xff] %v7204_v63 }
 0xa8e   :  { %v7202_v28 = vpop.permute.xlu1 %3424  ;;  %v7208_v57 = vpop.permute.xlu0 %3422 }
 0xa8f   :  { %9249 = vst [vmem:[#allocation111_spill] sm:$0xff] %v7202_v28  ;;  %9252 = vst [vmem:[#allocation114_spill] sm:$0xff] %v7208_v57 }
 0xa92   :  { %v7206_v7 = vpop.permute.xlu1 %3428  ;;  %v7212_v15 = vpop.permute.xlu0 %3430 }
 0xa93   :  { %9251 = vst [vmem:[#allocation113_spill] sm:$0xff] %v7206_v7  ;;  %9254 = vst [vmem:[#allocation116_spill] sm:$0xff] %v7212_v15 }
 0xa96   :  { %v7210_v14 = vpop.permute.xlu1 %3436  ;;  %v7219_v51 = vpop.permute.xlu0 %3434 }
 0xa97   :  { %9253 = vst [vmem:[#allocation115_spill] sm:$0xff] %v7210_v14  ;;  %9256 = vst [vmem:[#allocation118_spill] sm:$0xff] %v7219_v51  ;;  %v5476_v51 = vmov 10  }
 0xaa7   :  { %v7214_v25 = vpop.permute.xlu1 %3508  ;;  %v7223_v63 = vpop.permute.xlu0 %3512 }
 0xaa8   :  { %9255 = vst [vmem:[#allocation117_spill] sm:$0xff] %v7214_v25  ;;  %v3516_v6 = vmul.f32 0.0, %v7214_v25  ;;  %9257 = vst [vmem:[#allocation119_spill] sm:$0xff] %v7223_v63  ;;  %v3527_v14 = vmul.f32 0.0, %v7223_v63 }
 0xaaa   :  { %3563 = vrot.lane.b32.xlu0 %v3516_v6, %s5464_s1  ;;  %3561 = vrot.lane.b32.xlu1 %v3516_v6, %s5464_s1 }
 0xaae   :  { %3567 = vrot.lane.b32.xlu0 %v3516_v6, %s5464_s1  ;;  %3569 = vrot.lane.b32.xlu1 %v3516_v6, %s5464_s1 }
 0xab2   :  { %3575 = vrot.lane.b32.xlu0 %v3516_v6, %s5464_s1  ;;  %3573 = vrot.lane.b32.xlu1 %v3516_v6, %s5464_s1 }
 0xab6   :  { %3579 = vrot.lane.b32.xlu0 %v3516_v6, %s5464_s1  ;;  %3585 = vrot.lane.b32.xlu1 %v3527_v14, %s5464_s1 }
 0xaba   :  { %3583 = vrot.lane.b32.xlu0 %v3527_v14, %s5464_s1  ;;  %3589 = vrot.lane.b32.xlu1 %v3527_v14, %s5464_s1 }
 0xabe   :  { %3591 = vrot.lane.b32.xlu0 %v3527_v14, %s5464_s1  ;;  %3597 = vrot.lane.b32.xlu1 %v3527_v14, %s5464_s1 }
 0xac2   :  { %3595 = vrot.lane.b32.xlu0 %v3527_v14, %s5464_s1  ;;  %3601 = vrot.lane.b32.xlu1 %v3527_v14, %s5464_s1 }
 0xac6   :  { %3650 = vperm.xlu0 %5380, %v6857_v37   ;;  %3654 = vperm.xlu1 %5381, %v6852_v31  }
 0xaca   :  { %5382 = vset.pattern.permute.xlu1 %v5476_v51  ;;  %5383 = vset.pattern.permute.xlu0 %v5476_v51 }
 0xb1c   :  { %v7238_v6 = vpop.permute.xlu0 %3563  ;;  %v7242_v48 = vpop.permute.xlu1 %3561 }
 0xb1d   :  { %9258 = vst [vmem:[#allocation120_spill] sm:$0xff] %v7238_v6  ;;  %9260 = vst [vmem:[#allocation122_spill] sm:$0xff] %v7242_v48 }
 0xb20   :  { %v7240_v15 = vpop.permute.xlu0 %3567  ;;  %v7246_v28 = vpop.permute.xlu1 %3569 }
 0xb21   :  { %9259 = vst [vmem:[#allocation121_spill] sm:$0xff] %v7240_v15  ;;  %9262 = vst [vmem:[#allocation124_spill] sm:$0xff] %v7246_v28 }
 0xb24   :  { %v7244_v7 = vpop.permute.xlu0 %3575  ;;  %v7250_v14 = vpop.permute.xlu1 %3573 }
 0xb25   :  { %9261 = vst [vmem:[#allocation123_spill] sm:$0xff] %v7244_v7  ;;  %9264 = vst [vmem:[#allocation126_spill] sm:$0xff] %v7250_v14 }
 0xb28   :  { %v7248_v57 = vpop.permute.xlu0 %3579  ;;  %v7254_v63 = vpop.permute.xlu1 %3585 }
 0xb29   :  { %9263 = vst [vmem:[#allocation125_spill] sm:$0xff] %v7248_v57  ;;  %9266 = vst [vmem:[#allocation128_spill] sm:$0xff] %v7254_v63 }
 0xb2c   :  { %v7252_v1 = vpop.permute.xlu0 %3583  ;;  %v7258_v51 = vpop.permute.xlu1 %3589 }
 0xb2d   :  { %9265 = vst [vmem:[#allocation127_spill] sm:$0xff] %v7252_v1  ;;  %9268 = vst [vmem:[#allocation130_spill] sm:$0xff] %v7258_v51 }
 0xb30   :  { %v7256_v25 = vpop.permute.xlu0 %3591  ;;  %v7262_v15 = vpop.permute.xlu1 %3597 }
 0xb31   :  { %9267 = vst [vmem:[#allocation129_spill] sm:$0xff] %v7256_v25  ;;  %9270 = vst [vmem:[#allocation132_spill] sm:$0xff] %v7262_v15 }
 0xb34   :  { %v7260_v6 = vpop.permute.xlu0 %3595  ;;  %v7269_v57 = vpop.permute.xlu1 %3601 }
 0xb35   :  { %9269 = vst [vmem:[#allocation131_spill] sm:$0xff] %v7260_v6  ;;  %9272 = vst [vmem:[#allocation134_spill] sm:$0xff] %v7269_v57  ;;  %v5478_v57 = vmov 11  }
 0xb45   :  { %v7264_v48 = vpop.permute.xlu0 %3650  ;;  %v7273_v25 = vpop.permute.xlu1 %3654 }
 0xb46   :  { %9271 = vst [vmem:[#allocation133_spill] sm:$0xff] %v7264_v48  ;;  %v3658_v7 = vmul.f32 0.0, %v7264_v48  ;;  %9273 = vst [vmem:[#allocation135_spill] sm:$0xff] %v7273_v25  ;;  %v3669_v15 = vmul.f32 0.0, %v7273_v25 }
 0xb48   :  { %3703 = vrot.lane.b32.xlu0 %v3658_v7, %s5477_s11  ;;  %3705 = vrot.lane.b32.xlu1 %v3658_v7, %s5477_s11 }
 0xb4c   :  { %3711 = vrot.lane.b32.xlu0 %v3658_v7, %s5477_s11  ;;  %3709 = vrot.lane.b32.xlu1 %v3658_v7, %s5477_s11 }
 0xb50   :  { %3715 = vrot.lane.b32.xlu0 %v3658_v7, %s5477_s11  ;;  %3717 = vrot.lane.b32.xlu1 %v3658_v7, %s5477_s11 }
 0xb54   :  { %3721 = vrot.lane.b32.xlu1 %v3658_v7, %s5477_s11  ;;  %3727 = vrot.lane.b32.xlu0 %v3669_v15, %s5477_s11 }
 0xb58   :  { %3731 = vrot.lane.b32.xlu0 %v3669_v15, %s5477_s11  ;;  %3725 = vrot.lane.b32.xlu1 %v3669_v15, %s5477_s11 }
 0xb5c   :  { %3739 = vrot.lane.b32.xlu0 %v3669_v15, %s5477_s11  ;;  %3733 = vrot.lane.b32.xlu1 %v3669_v15, %s5477_s11 }
 0xb60   :  { %3743 = vrot.lane.b32.xlu0 %v3669_v15, %s5477_s11  ;;  %3737 = vrot.lane.b32.xlu1 %v3669_v15, %s5477_s11 }
 0xb64   :  { %3793 = vperm.xlu1 %5382, %v6857_v37   ;;  %3797 = vperm.xlu0 %5383, %v6852_v31  }
 0xb68   :  { %5384 = vset.pattern.permute.xlu0 %v5478_v57  ;;  %5385 = vset.pattern.permute.xlu1 %v5478_v57 }
 0xbba   :  { %v7288_v7 = vpop.permute.xlu1 %3705  ;;  %v7292_v14 = vpop.permute.xlu0 %3703 }
 0xbbb   :  { %9274 = vst [vmem:[#allocation136_spill] sm:$0xff] %v7288_v7  ;;  %9276 = vst [vmem:[#allocation138_spill] sm:$0xff] %v7292_v14 }
 0xbbe   :  { %v7290_v6 = vpop.permute.xlu1 %3709  ;;  %v7296_v51 = vpop.permute.xlu0 %3711 }
 0xbbf   :  { %9275 = vst [vmem:[#allocation137_spill] sm:$0xff] %v7290_v6  ;;  %9278 = vst [vmem:[#allocation140_spill] sm:$0xff] %v7296_v51 }
 0xbc2   :  { %v7294_v28 = vpop.permute.xlu1 %3717  ;;  %v7300_v15 = vpop.permute.xlu0 %3715 }
 0xbc3   :  { %9277 = vst [vmem:[#allocation139_spill] sm:$0xff] %v7294_v28  ;;  %9280 = vst [vmem:[#allocation142_spill] sm:$0xff] %v7300_v15 }
 0xbc6   :  { %v7298_v63 = vpop.permute.xlu1 %3721  ;;  %v7304_v25 = vpop.permute.xlu0 %3727 }
 0xbc7   :  { %9279 = vst [vmem:[#allocation141_spill] sm:$0xff] %v7298_v63  ;;  %9282 = vst [vmem:[#allocation144_spill] sm:$0xff] %v7304_v25 }
 0xbca   :  { %v7302_v1 = vpop.permute.xlu1 %3725  ;;  %v7308_v57 = vpop.permute.xlu0 %3731 }
 0xbcb   :  { %9281 = vst [vmem:[#allocation143_spill] sm:$0xff] %v7302_v1  ;;  %9284 = vst [vmem:[#allocation146_spill] sm:$0xff] %v7308_v57 }
 0xbce   :  { %v7306_v48 = vpop.permute.xlu1 %3733  ;;  %v7312_v6 = vpop.permute.xlu0 %3739 }
 0xbcf   :  { %9283 = vst [vmem:[#allocation145_spill] sm:$0xff] %v7306_v48  ;;  %9286 = vst [vmem:[#allocation148_spill] sm:$0xff] %v7312_v6 }
 0xbd2   :  { %v7310_v7 = vpop.permute.xlu1 %3737  ;;  %v7319_v63 = vpop.permute.xlu0 %3743 }
 0xbd3   :  { %9285 = vst [vmem:[#allocation147_spill] sm:$0xff] %v7310_v7  ;;  %9288 = vst [vmem:[#allocation150_spill] sm:$0xff] %v7319_v63  ;;  %v5480_v63 = vmov 12  }
 0xbe3   :  { %v7314_v14 = vpop.permute.xlu1 %3793  ;;  %v7323_v48 = vpop.permute.xlu0 %3797 }
 0xbe4   :  { %9287 = vst [vmem:[#allocation149_spill] sm:$0xff] %v7314_v14  ;;  %v3801_v28 = vmul.f32 0.0, %v7314_v14  ;;  %9289 = vst [vmem:[#allocation151_spill] sm:$0xff] %v7323_v48  ;;  %v3812_v6 = vmul.f32 0.0, %v7323_v48 }
 0xbe6   :  { %3848 = vrot.lane.b32.xlu0 %v3801_v28, %s5479_s12  ;;  %3846 = vrot.lane.b32.xlu1 %v3801_v28, %s5479_s12 }
 0xbea   :  { %3852 = vrot.lane.b32.xlu0 %v3801_v28, %s5479_s12  ;;  %3854 = vrot.lane.b32.xlu1 %v3801_v28, %s5479_s12 }
 0xbee   :  { %3860 = vrot.lane.b32.xlu0 %v3801_v28, %s5479_s12  ;;  %3858 = vrot.lane.b32.xlu1 %v3801_v28, %s5479_s12 }
 0xbf2   :  { %3864 = vrot.lane.b32.xlu0 %v3801_v28, %s5479_s12  ;;  %3870 = vrot.lane.b32.xlu1 %v3812_v6, %s5479_s12 }
 0xbf6   :  { %3868 = vrot.lane.b32.xlu0 %v3812_v6, %s5479_s12  ;;  %3874 = vrot.lane.b32.xlu1 %v3812_v6, %s5479_s12 }
 0xbfa   :  { %3876 = vrot.lane.b32.xlu0 %v3812_v6, %s5479_s12  ;;  %3882 = vrot.lane.b32.xlu1 %v3812_v6, %s5479_s12 }
 0xbfe   :  { %3880 = vrot.lane.b32.xlu0 %v3812_v6, %s5479_s12  ;;  %3886 = vrot.lane.b32.xlu1 %v3812_v6, %s5479_s12 }
 0xc02   :  { %3936 = vperm.xlu0 %5384, %v6857_v37   ;;  %3940 = vperm.xlu1 %5385, %v6852_v31  }
 0xc06   :  { %5386 = vset.pattern.permute.xlu1 %v5480_v63  ;;  %5392 = vset.pattern.permute.xlu0 %v5480_v63 }
 0xc58   :  { %v7338_v28 = vpop.permute.xlu0 %3848  ;;  %v7342_v15 = vpop.permute.xlu1 %3846 }
 0xc59   :  { %9290 = vst [vmem:[#allocation152_spill] sm:$0xff] %v7338_v28  ;;  %9292 = vst [vmem:[#allocation154_spill] sm:$0xff] %v7342_v15 }
 0xc5c   :  { %v7340_v7 = vpop.permute.xlu0 %3852  ;;  %v7346_v57 = vpop.permute.xlu1 %3854 }
 0xc5d   :  { %9291 = vst [vmem:[#allocation153_spill] sm:$0xff] %v7340_v7  ;;  %9294 = vst [vmem:[#allocation156_spill] sm:$0xff] %v7346_v57 }
 0xc60   :  { %v7344_v51 = vpop.permute.xlu0 %3860  ;;  %v7350_v6 = vpop.permute.xlu1 %3858 }
 0xc61   :  { %9293 = vst [vmem:[#allocation155_spill] sm:$0xff] %v7344_v51  ;;  %9296 = vst [vmem:[#allocation158_spill] sm:$0xff] %v7350_v6 }
 0xc64   :  { %v7348_v25 = vpop.permute.xlu0 %3864  ;;  %v7354_v48 = vpop.permute.xlu1 %3870 }
 0xc65   :  { %9295 = vst [vmem:[#allocation157_spill] sm:$0xff] %v7348_v25  ;;  %9298 = vst [vmem:[#allocation160_spill] sm:$0xff] %v7354_v48 }
 0xc68   :  { %v7352_v1 = vpop.permute.xlu0 %3868  ;;  %v7358_v63 = vpop.permute.xlu1 %3874 }
 0xc69   :  { %9297 = vst [vmem:[#allocation159_spill] sm:$0xff] %v7352_v1  ;;  %9300 = vst [vmem:[#allocation162_spill] sm:$0xff] %v7358_v63 }
 0xc6c   :  { %v7356_v14 = vpop.permute.xlu0 %3876  ;;  %v7362_v7 = vpop.permute.xlu1 %3882 }
 0xc6d   :  { %9299 = vst [vmem:[#allocation161_spill] sm:$0xff] %v7356_v14  ;;  %9302 = vst [vmem:[#allocation164_spill] sm:$0xff] %v7362_v7 }
 0xc70   :  { %v7360_v28 = vpop.permute.xlu0 %3880  ;;  %v7369_v25 = vpop.permute.xlu1 %3886 }
 0xc71   :  { %9301 = vst [vmem:[#allocation163_spill] sm:$0xff] %v7360_v28  ;;  %9304 = vst [vmem:[#allocation166_spill] sm:$0xff] %v7369_v25  ;;  %v5426_v25 = vld [vmem:[#allocation2 + $0x10] sm:$0xff] }
 0xc72   :  { %v5387_v28 = vpack.i.bf16 %v5426_v25, %v6670_v22 }
 0xc81   :  { %v7364_v15 = vpop.permute.xlu0 %3936  ;;  %v7373_v14 = vpop.permute.xlu1 %3940 }
 0xc82   :  { %9303 = vst [vmem:[#allocation165_spill] sm:$0xff] %v7364_v15  ;;  %v3944_v51 = vmul.f32 0.0, %v7364_v15  ;;  %9305 = vst [vmem:[#allocation167_spill] sm:$0xff] %v7373_v14  ;;  %v3955_v7 = vmul.f32 0.0, %v7373_v14 }
 0xc84   :  { %3989 = vrot.lane.b32.xlu0 %v3944_v51, %s5481_s13  ;;  %3991 = vrot.lane.b32.xlu1 %v3944_v51, %s5481_s13 }
 0xc88   :  { %3997 = vrot.lane.b32.xlu0 %v3944_v51, %s5481_s13  ;;  %3995 = vrot.lane.b32.xlu1 %v3944_v51, %s5481_s13 }
 0xc8c   :  { %4001 = vrot.lane.b32.xlu0 %v3944_v51, %s5481_s13  ;;  %4003 = vrot.lane.b32.xlu1 %v3944_v51, %s5481_s13 }
 0xc90   :  { %4007 = vrot.lane.b32.xlu1 %v3944_v51, %s5481_s13  ;;  %4013 = vrot.lane.b32.xlu0 %v3955_v7, %s5481_s13  ;;  %v5482_v51 = vmov 13  }
 0xc94   :  { %4017 = vrot.lane.b32.xlu0 %v3955_v7, %s5481_s13  ;;  %4011 = vrot.lane.b32.xlu1 %v3955_v7, %s5481_s13 }
 0xc98   :  { %4025 = vrot.lane.b32.xlu0 %v3955_v7, %s5481_s13  ;;  %4019 = vrot.lane.b32.xlu1 %v3955_v7, %s5481_s13 }
 0xc9c   :  { %4029 = vrot.lane.b32.xlu0 %v3955_v7, %s5481_s13  ;;  %4023 = vrot.lane.b32.xlu1 %v3955_v7, %s5481_s13 }
 0xca0   :  { %5388 = vrot.lane.b32.xlu0 %v5387_v28, %s5464_s1  ;;  %4079 = vperm.xlu1 %5386, %v6857_v37  }
 0xca4   :  { %4083 = vperm.xlu0 %5392, %v6852_v31   ;;  %5394 = vset.pattern.permute.xlu1 %v5482_v51 }
 0xca8   :  { %5393 = vset.pattern.permute.xlu0 %v5482_v51 }
 0xcf6   :  { %v7390_v6 = vpop.permute.xlu1 %3991  ;;  %v7398_v7 = vpop.permute.xlu0 %3989 }
 0xcf7   :  { %9306 = vst [vmem:[#allocation168_spill] sm:$0xff] %v7390_v6  ;;  %9310 = vst [vmem:[#allocation172_spill] sm:$0xff] %v7398_v7  ;;  %v9322_v7 = vunpack.i.l.bf16 %v6507_v46 }
 0xcfa   :  { %v7392_v57 = vpop.permute.xlu1 %3995  ;;  %v7402_v28 = vpop.permute.xlu0 %3997 }
 0xcfb   :  { %9307 = vst [vmem:[#allocation169_spill] sm:$0xff] %v7392_v57  ;;  %9312 = vst [vmem:[#allocation174_spill] sm:$0xff] %v7402_v28  ;;  %v9320_v28 = vunpack.i.l.bf16 %v6675_v17  ;;  %v9325_v17 = vunpack.i.l.bf16 %v6509_v2 }
 0xcfe   :  { %v7394_v63 = vpop.permute.xlu1 %4003  ;;  %v7406_v15 = vpop.permute.xlu0 %4001 }
 0xcff   :  { %9308 = vst [vmem:[#allocation170_spill] sm:$0xff] %v7394_v63  ;;  %9314 = vst [vmem:[#allocation176_spill] sm:$0xff] %v7406_v15  ;;  %v5297_v15 = vunpack.i.l.bf16 %v6683_v20 }
 0xd02   :  { %v7396_v48 = vpop.permute.xlu1 %4007  ;;  %v7410_v51 = vpop.permute.xlu0 %4013 }
 0xd03   :  { %9309 = vst [vmem:[#allocation171_spill] sm:$0xff] %v7396_v48  ;;  %9316 = vst [vmem:[#allocation178_spill] sm:$0xff] %v7410_v51 }
 0xd06   :  { %v7400_v25 = vpop.permute.xlu1 %4011  ;;  %v7417_v48 = vpop.permute.xlu0 %4017 }
 0xd07   :  { %9311 = vst [vmem:[#allocation173_spill] sm:$0xff] %v7400_v25  ;;  %9318 = vst [vmem:[#allocation180_spill] sm:$0xff] %v7417_v48  ;;  %v9321_v48 = vunpack.i.l.bf16 %v6679_v24 }
 0xd09   :  { %v1960_v51 = vpack.c.bf16 %v9321_v48, %v9320_v28  ;;  %v9326_v48 = vunpack.i.h.bf16 %v6709_v10  ;;  %v5327_v28 = vunpack.i.l.bf16 %v6752_v52 }
 0xd0a   :  { %v7404_v1 = vpop.permute.xlu1 %4019  ;;  %v7423_v57 = vpop.permute.xlu0 %4025 }
 0xd0b   :  { %9313 = vst [vmem:[#allocation175_spill] sm:$0xff] %v7404_v1  ;;  %9319 = vst [vmem:[#allocation181_spill] sm:$0xff] %v7423_v57  ;;  %v1959_v1 = vpack.c.bf16 %v6670_v22, %v6767_v36  ;;  %v1812_v24 = vsel %vm262_vm3, %v9326_v48, %v9325_v17 }
 0xd0e   :  { %v7408_v14 = vpop.permute.xlu1 %4023 }
 0xd0f   :  { %9315 = vst [vmem:[#allocation177_spill] sm:$0xff] %v7408_v14  ;;  %v5308_v14 = vunpack.i.h.bf16 %v6697_v62 }
 0xd11   :  { %v1971_v25 = vpack.c.bf16 %v5308_v14, %v5297_v15  ;;  %v1917_v57 = vsel %vm1906_vm12, %v5308_v14, %v9322_v7  ;;  %v9327_v14 = vpack.c.bf16 %v6693_v60, %v6688_v55  ;;  %v5318_v7 = vunpack.i.h.bf16 %v6714_v45 }
 0xd12   :  { %v5342_v55 = vunpack.i.l.bf16 %v6780_v50  ;;  %v9332_v60 = vpack.c.bf16 %v6728_v54, %v6736_v42 }
 0xd1f   :  { %v7412_v6 = vpop.permute.xlu1 %4079 }
 0xd20   :  { %9317 = vst [vmem:[#allocation179_spill] sm:$0xff] %v7412_v6  ;;  %v4087_v63 = vmul.f32 0.0, %v7412_v6  ;;  %v7438_v6 = vpop.permute.xlu0 %4029 }
 0xd21   :  { %9323 = vst [vmem:[#allocation182_spill] sm:$0xff] %v7438_v6 }
 0xd22   :  { %4134 = vrot.lane.b32.xlu0 %v4087_v63, %s5483_s14  ;;  %4132 = vrot.lane.b32.xlu1 %v4087_v63, %s5483_s14 }
 0xd24   :  { %v5389_v10 = vpop.permute.xlu0 %5388 }
 0xd26   :  { %4138 = vrot.lane.b32.xlu0 %v4087_v63, %s5483_s14  ;;  %4140 = vrot.lane.b32.xlu1 %v4087_v63, %s5483_s14 }
 0xd2a   :  { %4146 = vrot.lane.b32.xlu0 %v4087_v63, %s5483_s14  ;;  %4144 = vrot.lane.b32.xlu1 %v4087_v63, %s5483_s14 }
 0xd2e   :  { %4150 = vrot.lane.b32.xlu0 %v4087_v63, %s5483_s14  ;;  %2053 = vrot.lane.b32.xlu1 %v1959_v1, %s5465_s19  ;;  %v9324_v63 = vunpack.i.h.bf16 %v6683_v20  ;;  %v9328_v20 = vunpack.i.l.bf16 %v6499_v39 }
 0xd30   :  { %v1907_v1 = vsel %vm1906_vm12, %v5297_v15, %v9324_v63  ;;  %v9329_v15 = vunpack.i.h.bf16 %v6704_v27  ;;  %v9333_v27 = vunpack.i.l.bf16 %v6503_v16 }
 0xd31   :  { %v1972_v22 = vpack.c.bf16 %v1917_v57, %v1907_v1 }
 0xd32   :  { %2077 = vrot.lane.b32.xlu1 %v1971_v25, %s5465_s19  ;;  %2055 = vrot.lane.b32.xlu0 %v1960_v51, %s5465_s19  ;;  %v1803_v57 = vsel %vm262_vm3, %v9329_v15, %v9328_v20  ;;  %v9330_v51 = vunpack.i.h.bf16 %v6507_v46  ;;  %v1910_v17 = vsel %vm1906_vm12, %v5318_v7, %v9333_v27  ;;  %v9334_v46 = vunpack.i.l.bf16 %v6714_v45 }
 0xd33   :  { %v1964_v25 = vpack.c.bf16 %v1812_v24, %v1803_v57  ;;  %v7481_v24 = vpop.permute.xlu0 %4083  ;;  %v9335_v20 = vunpack.i.h.bf16 %v6509_v2  ;;  %v9336_v45 = vunpack.i.h.bf16 %v6499_v39  ;;  %v5337_v2 = vunpack.i.l.bf16 %v6782_v35 }
 0xd34   :  { %v1919_v63 = vsel %vm1906_vm12, %v9330_v51, %v5327_v28  ;;  %v1909_v48 = vsel %vm1906_vm12, %v9334_v46, %v5318_v7  ;;  %v4098_v54 = vmul.f32 0.0, %v7481_v24  ;;  %v5348_v7 = vunpack.i.h.bf16 %v6784_v4 }
 0xd35   :  { %v1814_v15 = vsel %vm262_vm3, %v9335_v20, %v5342_v55  ;;  %v9339_v39 = vunpack.i.h.bf16 %v6778_v5 }
 0xd36   :  { %2079 = vrot.lane.b32.xlu0 %v1972_v22, %s5465_s19  ;;  %2057 = vrot.lane.b32.xlu1 %v9327_v14, %s5465_s19  ;;  %v9331_v22 = vunpack.i.h.bf16 %v6752_v52  ;;  %v5332_v52 = vunpack.i.l.bf16 %v6778_v5 }
 0xd38   :  { %v1920_v1 = vsel %vm1906_vm12, %v5327_v28, %v9331_v22  ;;  %v1974_v28 = vpack.c.bf16 %v1919_v63, %v1909_v48  ;;  %v1805_v42 = vsel %vm262_vm3, %v9336_v45, %v5332_v52  ;;  %v9338_v63 = vunpack.i.l.bf16 %v6515_v29 }
 0xd39   :  { %v1975_v14 = vpack.c.bf16 %v1920_v1, %v1910_v17  ;;  %v1966_v57 = vpack.c.bf16 %v1814_v15, %v1805_v42  ;;  %v1806_v1 = vsel %vm262_vm3, %v5332_v52, %v9339_v39  ;;  %v5390_v48 = vunpack.i.l.bf16 %v5389_v10 }
 0xd3a   :  { %2063 = vrot.lane.b32.xlu0 %v1964_v25, %s5465_s19  ;;  %2061 = vrot.lane.b32.xlu1 %v9332_v60, %s5465_s19  ;;  %v9337_v25 = vunpack.i.h.bf16 %v6780_v50  ;;  %v1923_v22 = vsel %vm1906_vm12, %v5348_v7, %v9338_v63  ;;  %v9340_v60 = vunpack.i.h.bf16 %v6782_v35  ;;  %v5358_v52 = vunpack.i.h.bf16 %v6820_v23 }
 0xd3b   :  { %v9343_v35 = vunpack.i.h.bf16 %v6794_v21 }
 0xd3c   :  { %v1815_v51 = vsel %vm262_vm3, %v5342_v55, %v9337_v25  ;;  %v1913_v27 = vsel %vm1906_vm12, %v5337_v2, %v9340_v60  ;;  %v9341_v55 = vunpack.i.l.bf16 %v6784_v4  ;;  %v9345_v4 = vunpack.i.h.bf16 %v6515_v29 }
 0xd3d   :  { %v1978_v17 = vpack.c.bf16 %v1923_v22, %v1913_v27  ;;  %v1967_v50 = vpack.c.bf16 %v1815_v51, %v1806_v1  ;;  %v5307_v29 = vunpack.i.l.bf16 %v6697_v62 }
 0xd3e   :  { %2083 = vrot.lane.b32.xlu0 %v1974_v28, %s5465_s19  ;;  %2085 = vrot.lane.b32.xlu1 %v1975_v14, %s5465_s19  ;;  %v1922_v46 = vsel %vm1906_vm12, %v9341_v55, %v5348_v7  ;;  %v9342_v28 = vunpack.i.h.bf16 %v6503_v16  ;;  %v9344_v14 = vunpack.i.h.bf16 %v6786_v56  ;;  %v1925_v45 = vsel %vm1906_vm12, %v9345_v4, %v5390_v48 }
 0xd3f   :  { %v9346_v16 = vunpack.i.l.bf16 %v6820_v23  ;;  %v5391_v7 = vunpack.i.h.bf16 %v5389_v10  ;;  %v9347_v56 = vpack.c.bf16 %v6807_v40, %v6818_v49  ;;  %v1916_v23 = vsel %vm1906_vm12, %v5358_v52, %v5307_v29 }
 0xd40   :  { %v1912_v5 = vsel %vm1906_vm12, %v9342_v28, %v5337_v2  ;;  %v1970_v20 = vpack.c.bf16 %v9344_v14, %v9343_v35  ;;  %v5484_v49 = vmov 14   ;;  %v2107_v4 = vsel %vm2099_vm11, %v6788_v38, %v6539_v18 }
 0xd41   :  { %v1977_v15 = vpack.c.bf16 %v1922_v46, %v1912_v5  ;;  %v1915_v42 = vsel %vm1906_vm12, %v9346_v16, %v5358_v52  ;;  %v1926_v21 = vsel %vm1906_vm12, %v5390_v48, %v5391_v7  ;;  %v7572_v5 = vld [vmem:[%s9002_s3 + $0x8] sm:$0xff]   ;;  %v2105_v52 = vsel %vm2099_vm11, %v6513_v9, %v6537_v12  ;;  %s5485_s3 = smov 115  }
 0xd42   :  { %2067 = vrot.lane.b32.xlu0 %v1966_v57, %s5465_s19  ;;  %4156 = vrot.lane.b32.xlu1 %v4098_v54, %s5483_s14  ;;  %v1980_v57 = vpack.c.bf16 %v1925_v45, %v1915_v42  ;;  %v1981_v2 = vpack.c.bf16 %v1926_v21, %v1916_v23 }
 0xd46   :  { %4154 = vrot.lane.b32.xlu0 %v4098_v54, %s5483_s14  ;;  %4160 = vrot.lane.b32.xlu1 %v4098_v54, %s5483_s14 }
 0xd4a   :  { %2091 = vrot.lane.b32.xlu0 %v1978_v17, %s5465_s19  ;;  %2069 = vrot.lane.b32.xlu1 %v1967_v50, %s5465_s19 }
 0xd4e   :  { %2075 = vrot.lane.b32.xlu0 %v1970_v20, %s5465_s19  ;;  %2089 = vrot.lane.b32.xlu1 %v1977_v15, %s5465_s19  ;;  %v2104_v15 = vsel %vm2099_vm11, %v6757_v61, %v6513_v9  ;;  %v2106_v61 = vsel %vm2099_vm11, %v6537_v12, %v6788_v38 }
 0xd52   :  { %2095 = vrot.lane.b32.xlu0 %v1980_v57, %s5465_s19  ;;  %2073 = vrot.lane.b32.xlu1 %v9347_v56, %s5465_s19 }
 0xd56   :  { %4162 = vrot.lane.b32.xlu0 %v4098_v54, %s5483_s14  ;;  %4168 = vrot.lane.b32.xlu1 %v4098_v54, %s5483_s14 }
 0xd5a   :  { %4166 = vrot.lane.b32.xlu0 %v4098_v54, %s5483_s14  ;;  %2097 = vrot.lane.b32.xlu1 %v1981_v2, %s5465_s19 }
 0xd5e   :  { %4222 = vperm.xlu0 %5393, %v6857_v37   ;;  %4172 = vrot.lane.b32.xlu1 %v4098_v54, %s5483_s14 }
 0xd62   :  { %4226 = vperm.xlu1 %5394, %v6852_v31   ;;  %5396 = vset.pattern.permute.xlu0 %v5484_v49 }
 0xd66   :  { %5395 = vset.pattern.permute.xlu1 %v5484_v49 }
 0xd94   :  { %v7546_v62 = vpop.permute.xlu0 %4134  ;;  %v7548_v40 = vpop.permute.xlu1 %4132 }
 0xd95   :  { %9348 = vst [vmem:[#allocation183_spill] sm:$0xff] %v7546_v62 }
 0xd98   :  { %v7550_v10 = vpop.permute.xlu0 %4138  ;;  %v7552_v25 = vpop.permute.xlu1 %4140 }
 0xd99   :  { %9349 = vst [vmem:[#allocation184_spill] sm:$0xff] %v7550_v10  ;;  %9350 = vst [vmem:[#allocation185_spill] sm:$0xff] %v7552_v25 }
 0xd9c   :  { %v7554_v51 = vpop.permute.xlu0 %4146  ;;  %v7556_v63 = vpop.permute.xlu1 %4144 }
 0xd9d   :  { %9351 = vst [vmem:[#allocation186_spill] sm:$0xff] %v7554_v51  ;;  %9352 = vst [vmem:[#allocation187_spill] sm:$0xff] %v7556_v63 }
 0xda0   :  { %v7558_v37 = vpop.permute.xlu0 %4150  ;;  %v2054_v54 = vpop.permute.xlu1 %2053 }
 0xda1   :  { %9353 = vst [vmem:[#allocation188_spill] sm:$0xff] %v7558_v37  ;;  %v2109_v49 = vsel %vm2099_vm11, %v6517_v19, %v2054_v54 }
 0xda4   :  { %v2078_v22 = vpop.permute.xlu1 %2077  ;;  %v2056_v31 = vpop.permute.xlu0 %2055 }
 0xda8   :  { %v2080_v39 = vpop.permute.xlu0 %2079  ;;  %v2058_v1 = vpop.permute.xlu1 %2057 }
 0xda9   :  { %v2111_v60 = vsel %vm2099_vm11, %v2058_v1, %v6776_v11  ;;  %v2110_v27 = vsel %vm2099_vm11, %v2056_v31, %v2058_v1  ;;  %v2121_v17 = vsel %vm2099_vm11, %v2080_v39, %v6864_v8  ;;  %v2120_v28 = vsel %vm2099_vm11, %v2078_v22, %v2080_v39 }
 0xdaa   :  { %2165 = vmatprep.subr.bf16.mxu1 %v2111_v60  ;;  %v2108_v39 = vsel %vm2099_vm11, %v6539_v18, %v6517_v19 }
 0xdab   :  { %2166 = vmatpush1.bf16.msra.mxu1 %v2110_v27 }
 0xdac   :  { %v2064_v50 = vpop.permute.xlu0 %2063  ;;  %2167 = vmatprep.subr.bf16.mxu1 %v2121_v17  ;;  %v2062_v55 = vpop.permute.xlu1 %2061 }
 0xdad   :  { %v2113_v46 = vsel %vm2099_vm11, %v2062_v55, %v2064_v50  ;;  %v2112_v48 = vsel %vm2099_vm11, %v6776_v11, %v2062_v55  ;;  %v2114_v9 = vsel %vm2099_vm11, %v2064_v50, %v6743_v58 }
 0xdae   :  { %2208 = vmatprep.subr.bf16.mxu0 %v2113_v46 }
 0xdaf   :  { %2168 = vmatpush1.bf16.msra.mxu1 %v2120_v28  ;;  %2209 = vmatpush1.bf16.msra.mxu0 %v2112_v48  ;;  %v5427_v28 = vld [vmem:[%s9004_s5] sm:$0xff] }
 0xdb0   :  { %v2084_v35 = vpop.permute.xlu0 %2083  ;;  %2249 = vmatprep.subr.bf16.mxu1 %v2105_v52  ;;  %v2086_v14 = vpop.permute.xlu1 %2085  ;;  %v4941_v52 = vld [vmem:[%s9003_s4 + $0x18] sm:$0xff]  ;;  %s5486_s4 = smov 114  }
 0xdb1   :  { %v2123_v20 = vsel %vm2099_vm11, %v2084_v35, %v2086_v14  ;;  %v2122_v11 = vsel %vm2099_vm11, %v6864_v8, %v2084_v35  ;;  %v2124_v2 = vsel %vm2099_vm11, %v2086_v14, %v6866_v41 }
 0xdb2   :  { %4943 = vmatmul.mubr.msk.bf16.vlgmr.msra.gmra.mrb[20].mxu1 %vm1402_vm10, %v7572_v5  ;;  %2210 = vmatprep.subr.bf16.mxu0 %v2123_v20 }
 0xdb3   :  { %2211 = vmatpush1.bf16.msra.mxu0 %v2122_v11  ;;  %2250 = vmatpush1.bf16.msra.mxu1 %v2104_v15 }
 0xdb4   :  { %v2068_v45 = vpop.permute.xlu0 %2067  ;;  %2292 = vmatprep.subr.bf16.mxu0 %v2107_v4  ;;  %v7588_v16 = vpop.permute.xlu1 %4156  ;;  %2281 = vmatprep.mubr.bf16.mxu1 %v9145_v13 }
 0xdb5   :  { %9354 = vst [vmem:[#allocation189_spill] sm:$0xff] %v7588_v16  ;;  %v2115_v8 = vsel %vm2099_vm11, %v6743_v58, %v2068_v45 }
 0xdb6   :  { %4944 = vmatmul.mubr.msk.bf16.vlgmr.msra.gmra.mrb[20].mxu0 %vm1402_vm10, %v7572_v5  ;;  %2251 = vmatprep.subr.bf16.mxu1 %v2115_v8 }
 0xdb7   :  { %2252 = vmatpush1.bf16.msra.mxu1 %v2114_v9  ;;  %2293 = vmatpush1.bf16.msra.mxu0 %v2106_v61 }
 0xdb8   :  { %v7600_v42 = vpop.permute.xlu0 %4154  ;;  %v7602_v57 = vpop.permute.xlu1 %4160  ;;  %2324 = vmatprep.mubr.bf16.mxu0 %v9145_v13 }
 0xdb9   :  { %9355 = vst [vmem:[#allocation190_spill] sm:$0xff] %v7602_v57 }
 0xdbc   :  { %v2092_v7 = vpop.permute.xlu0 %2091  ;;  %v2070_v56 = vpop.permute.xlu1 %2069 }
 0xdbd   :  { %v2117_v29 = vsel %vm2099_vm11, %v2070_v56, %v6862_v59  ;;  %v2116_v21 = vsel %vm2099_vm11, %v2068_v45, %v2070_v56  ;;  %v2127_v12 = vsel %vm2099_vm11, %v2092_v7, %v6868_v0 }
 0xdbe   :  { %2294 = vmatprep.subr.bf16.mxu0 %v2117_v29 }
 0xdbf   :  { %2295 = vmatpush1.bf16.msra.mxu0 %v2116_v21 }
 0xdc0   :  { %2296 = vmatprep.subr.bf16.mxu0 %v2127_v12  ;;  %v2090_v58 = vpop.permute.xlu1 %2089  ;;  %v2076_v31 = vpop.permute.xlu0 %2075 }
 0xdc1   :  { %v2125_v38 = vsel %vm2099_vm11, %v6866_v41, %v2090_v58  ;;  %v2126_v23 = vsel %vm2099_vm11, %v2090_v58, %v2092_v7 }
 0xdc2   :  { %2253 = vmatprep.subr.bf16.mxu1 %v2125_v38 }
 0xdc3   :  { %2254 = vmatpush1.bf16.msra.mxu1 %v2124_v2  ;;  %2297 = vmatpush1.bf16.msra.mxu0 %v2126_v23 }
 0xdc4   :  { %2335 = vmatprep.subr.bf16.mxu1 %v2109_v49  ;;  %v2074_v22 = vpop.permute.xlu1 %2073  ;;  %v2096_v60 = vpop.permute.xlu0 %2095 }
 0xdc5   :  { %v2119_v41 = vsel %vm2099_vm11, %v2074_v22, %v2076_v31  ;;  %v2118_v1 = vsel %vm2099_vm11, %v6862_v59, %v2074_v22  ;;  %v2128_v19 = vsel %vm2099_vm11, %v6868_v0, %v2096_v60 }
 0xdc6   :  { %4946 = vmatmul.mubr.msk.bf16.vlgmr.msra.gmra.mrb[24].mxu0 %vm1402_vm10, %v7572_v5  ;;  %4945 = vmatmul.mubr.msk.bf16.vlgmr.msra.gmra.mrb[24].mxu1 %vm1402_vm10, %v7572_v5 }
 0xdc7   :  { %2336 = vmatpush1.bf16.msra.mxu1 %v2108_v39  ;;  %2367 = vmatprep.mubr.bf16.mxu1 %v9145_v13 }
 0xdc8   :  { %2337 = vmatprep.subr.bf16.mxu1 %v2119_v41  ;;  %v7626_v54 = vpop.permute.xlu1 %4168  ;;  %v7635_v18 = vpop.permute.xlu0 %4162 }
 0xdc9   :  { %9356 = vst [vmem:[#allocation191_spill] sm:$0xff] %v7626_v54  ;;  %9357 = vst [vmem:[#allocation192_spill] sm:$0xff] %v7635_v18 }
 0xdcb   :  { %2338 = vmatpush1.bf16.msra.mxu1 %v2118_v1 }
 0xdcc   :  { %v2098_v27 = vpop.permute.xlu1 %2097  ;;  %v7637_v50 = vpop.permute.xlu0 %4166 }
 0xdcd   :  { %v2129_v17 = vsel %vm2099_vm11, %v2096_v60, %v2098_v27  ;;  %9358 = vst [vmem:[#allocation193_spill] sm:$0xff] %v7637_v50  ;;  %vm4634_vm11 = vcmask 523264  }
 0xdce   :  { %2339 = vmatprep.subr.bf16.mxu1 %v2129_v17 }
 0xdcf   :  { %2340 = vmatpush1.bf16.msra.mxu1 %v2128_v19 }
 0xdd0   :  { %v7644_v46 = vpop.permute.xlu1 %4172 }
 0xdd1   :  { %9359 = vst [vmem:[#allocation194_spill] sm:$0xff] %v7644_v46 }
 0xdd2   :  { %4947 = vmatmul.mubr.msk.bf16.vlgmr.msra.gmra.mrb[28].mxu1 %vm1402_vm10, %v7572_v5  ;;  %v5428_v5 = vld [vmem:[%s9004_s5 + $0x8] sm:$0xff]  ;;  %s5487_s5 = smov 96   ;;  %vm4645_vm10 = vcmask 785408  }
 0xddd   :  { %v7639_v55 = vpop.permute.xlu0 %4222 }
 0xdde   :  { %v4230_v59 = vmul.f32 0.0, %v7639_v55 }
 0xde0   :  { %4275 = vrot.lane.b32.xlu0 %v4230_v59, %s5485_s3  ;;  %4277 = vrot.lane.b32.xlu1 %v4230_v59, %s5485_s3 }
 0xde1   :  { %v7648_v0 = vpop.permute.xlu1 %4226 }
 0xde2   :  { %9360 = vst [vmem:[#allocation195_spill] sm:$0xff] %v7648_v0  ;;  %v4241_v48 = vmul.f32 0.0, %v7648_v0 }
 0xde4   :  { %4283 = vrot.lane.b32.xlu0 %v4230_v59, %s5485_s3  ;;  %4281 = vrot.lane.b32.xlu1 %v4230_v59, %s5485_s3 }
 0xde8   :  { %4287 = vrot.lane.b32.xlu0 %v4230_v59, %s5485_s3  ;;  %4289 = vrot.lane.b32.xlu1 %v4230_v59, %s5485_s3 }
 0xdec   :  { %4293 = vrot.lane.b32.xlu1 %v4230_v59, %s5485_s3  ;;  %4299 = vrot.lane.b32.xlu0 %v4241_v48, %s5485_s3 }
 0xdf0   :  { %4303 = vrot.lane.b32.xlu0 %v4241_v48, %s5485_s3  ;;  %4297 = vrot.lane.b32.xlu1 %v4241_v48, %s5485_s3 }
 0xdf4   :  { %4311 = vrot.lane.b32.xlu0 %v4241_v48, %s5485_s3  ;;  %4305 = vrot.lane.b32.xlu1 %v4241_v48, %s5485_s3 }
 0xdf8   :  { %4315 = vrot.lane.b32.xlu0 %v4241_v48, %s5485_s3  ;;  %4309 = vrot.lane.b32.xlu1 %v4241_v48, %s5485_s3 }
 0xdfc   :  { %4365 = vperm.xlu1 %5395, %v5427_v28   ;;  %4369 = vperm.xlu0 %5396, %v5428_v5  }
 0xe00   :  { %5397 = vset.pattern.permute.xlu0 %v9145_v13 }
 0xe01   :  { %1992 = vperm.xlu0 %5397, %v4941_v52  }
 0xe05   :  { %2470 = vperm.xlu0 %5397, %v5427_v28  }
 0xe52   :  { %v7671_v35 = vpop.permute.xlu1 %4277  ;;  %v7675_v20 = vpop.permute.xlu0 %4275 }
 0xe53   :  { %9361 = vst [vmem:[#allocation196_spill] sm:$0xff] %v7671_v35  ;;  %v9381_v35 = vld [vmem:[#allocation167_spill] sm:$0xff] }
 0xe56   :  { %v7673_v14 = vpop.permute.xlu1 %4281  ;;  %v7679_v15 = vpop.permute.xlu0 %4283 }
 0xe57   :  { %9362 = vst [vmem:[#allocation197_spill] sm:$0xff] %v7673_v14  ;;  %9364 = vst [vmem:[#allocation199_spill] sm:$0xff] %v7679_v15  ;;  %v9408_v15 = vld [vmem:[#allocation12_spill] sm:$0xff] }
 0xe5a   :  { %v7677_v11 = vpop.permute.xlu1 %4289  ;;  %v7683_v45 = vpop.permute.xlu0 %4287 }
 0xe5b   :  { %9363 = vst [vmem:[#allocation198_spill] sm:$0xff] %v7677_v11  ;;  %9366 = vst [vmem:[#allocation201_spill] sm:$0xff] %v7683_v45 }
 0xe5e   :  { %v7681_v4 = vpop.permute.xlu1 %4293  ;;  %v7687_v9 = vpop.permute.xlu0 %4299 }
 0xe5f   :  { %9365 = vst [vmem:[#allocation200_spill] sm:$0xff] %v7681_v4  ;;  %9367 = vst [vmem:[#allocation202_spill] sm:$0xff] %v7687_v9 }
 0xe62   :  { %v7685_v8 = vpop.permute.xlu1 %4297  ;;  %v7691_v61 = vpop.permute.xlu0 %4303 }
 0xe63   :  { %9369 = vst [vmem:[#allocation204_spill] sm:$0xff] %v7691_v61 }
 0xe66   :  { %v7689_v13 = vpop.permute.xlu1 %4305  ;;  %v7695_v56 = vpop.permute.xlu0 %4311 }
 0xe67   :  { %9368 = vst [vmem:[#allocation203_spill] sm:$0xff] %v7689_v13  ;;  %9371 = vst [vmem:[#allocation206_spill] sm:$0xff] %v7695_v56 }
 0xe6a   :  { %v7693_v7 = vpop.permute.xlu1 %4309  ;;  %v7702_v12 = vpop.permute.xlu0 %4315 }
 0xe6b   :  { %9370 = vst [vmem:[#allocation205_spill] sm:$0xff] %v7693_v7  ;;  %9372 = vst [vmem:[#allocation207_spill] sm:$0xff] %v7702_v12  ;;  %v9395_v7 = vld [vmem:[#allocation10_spill] sm:$0xff] }
 0xe7b   :  { %v7697_v29 = vpop.permute.xlu1 %4365  ;;  %v7706_v58 = vpop.permute.xlu0 %4369 }
 0xe7c   :  { %v4373_v21 = vmul.f32 0.0, %v7697_v29  ;;  %9373 = vst [vmem:[#allocation208_spill] sm:$0xff] %v7706_v58  ;;  %v7709_v23 = vmul.f32 0.0, %v7706_v58 }
 0xe7e   :  { %4420 = vrot.lane.b32.xlu0 %v4373_v21, %s5486_s4  ;;  %4418 = vrot.lane.b32.xlu1 %v4373_v21, %s5486_s4 }
 0xe80   :  { %v7722_v19 = vpop.permute.xlu0 %1992 }
 0xe82   :  { %4424 = vrot.lane.b32.xlu0 %v4373_v21, %s5486_s4  ;;  %4426 = vrot.lane.b32.xlu1 %v4373_v21, %s5486_s4 }
 0xe85   :  { %v2197_v38 = vpop.f32.mrb[20].mxu1 }
 0xe86   :  { %v2198_v2 = vadd.f32 %v2197_v38, %v6519_v53  ;;  %v2199_v49 = vpop.f32.mrb[21].mxu1  ;;  %4432 = vrot.lane.b32.xlu0 %v4373_v21, %s5486_s4  ;;  %4430 = vrot.lane.b32.xlu1 %v4373_v21, %s5486_s4 }
 0xe87   :  { %v2201_v22 = vpop.f32.mrb[22].mxu1 }
 0xe88   :  { %v2378_v31 = vmax.f32 %v2198_v2, 0.0  ;;  %v2203_v39 = vpop.f32.mrb[23].mxu1  ;;  %v2202_v59 = vadd.f32 %v2201_v22, %v7722_v19 }
 0xe89   :  { %v2240_v41 = vpop.f32.mrb[20].mxu0 }
 0xe8a   :  { %v2242_v1 = vpop.f32.mrb[21].mxu0  ;;  %4440 = vrot.lane.b32.xlu0 %v7709_v23, %s5486_s4  ;;  %4436 = vrot.lane.b32.xlu1 %v4373_v21, %s5486_s4  ;;  %v7718_v27 = vadd.f32 %v2378_v31, %v6606_v34  ;;  %v2388_v28 = vmax.f32 %v2202_v59, 0.0  ;;  %v9374_v59 = vld [vmem:[#allocation103_spill] sm:$0xff] }
 0xe8b   :  { %v2244_v60 = vpop.f32.mrb[22].mxu0 }
 0xe8c   :  { %v7720_v17 = vpop.f32.mrb[23].mxu0  ;;  %v2509_v48 = vmul.f32 %v6870_v32, %v7718_v27  ;;  %v2651_v34 = vmul.f32 %v6920_v26, %v7718_v27  ;;  %v2793_v5 = vmul.f32 %v6970_v3, %v7718_v27  ;;  %v2935_v52 = vmul.f32 %v7020_v44, %v7718_v27 }
 0xe8d   :  { %v7742_v21 = vadd.f32 %v2388_v28, %v6609_v47  ;;  %v3077_v38 = vmul.f32 %v7070_v30, %v7718_v27  ;;  %v3219_v2 = vmul.f32 %v7120_v43, %v7718_v27  ;;  %v4229_v6 = vmul.f32 %v7639_v55, %v7718_v27 }
 0xe8e   :  { %4631 = vrot.lane.b32.xlu0 %v7718_v27, %s5487_s5  ;;  %4442 = vrot.lane.b32.xlu1 %v7709_v23, %s5486_s4 }
 0xe8f   :  { %v2662_v47 = vmul.f32 %v6929_v33, %v7742_v21  ;;  %v4240_v54 = vmul.f32 %v7648_v0, %v7742_v21 }
 0xe92   :  { %2554 = vrot.lane.b32.xlu0 %v2509_v48, %s5454_s22  ;;  %2696 = vrot.lane.b32.xlu1 %v2651_v34, %s5456_s0  ;;  %v3360_v48 = vmul.f32 %v9374_v59, %v7718_v27 }
 0xe96   :  { %2838 = vrot.lane.b32.xlu0 %v2793_v5, %s5457_s23  ;;  %2980 = vrot.lane.b32.xlu1 %v2935_v52, %s5458_s24  ;;  %v9375_v5 = vld [vmem:[#allocation59_spill] sm:$0xff] }
 0xe97   :  { %v2946_v52 = vmul.f32 %v9375_v5, %v7742_v21 }
 0xe99   :  { %v7748_v49 = vpop.f32.mrb[24].mxu0  ;;  %v2283_v22 = vpop.f32.mrb[24].mxu1 }
 0xe9a   :  { %v2328_v31 = vpop.f32.mrb[25].mxu0  ;;  %3122 = vrot.lane.b32.xlu0 %v3077_v38, %s5459_s25  ;;  %3264 = vrot.lane.b32.xlu1 %v3219_v2, %s5460_s26  ;;  %v2285_v39 = vpop.f32.mrb[25].mxu1  ;;  %v9376_v38 = vld [vmem:[#allocation117_spill] sm:$0xff] }
 0xe9b   :  { %v7752_v41 = vpop.f32.mrb[26].mxu0  ;;  %v2287_v60 = vpop.f32.mrb[26].mxu1  ;;  %v3515_v2 = vmul.f32 %v9376_v38, %v7718_v27  ;;  %v9377_v22 = vld [vmem:[#allocation89_spill] sm:$0xff] }
 0xe9c   :  { %v2289_v34 = vpop.f32.mrb[27].mxu1  ;;  %v2332_v28 = vpop.f32.mrb[27].mxu0  ;;  %v3230_v31 = vmul.f32 %v9377_v22, %v7742_v21  ;;  %v9378_v39 = vld [vmem:[#allocation133_spill] sm:$0xff] }
 0xe9d   :  { %v3657_v60 = vmul.f32 %v9378_v39, %v7718_v27 }
 0xe9e   :  { %2718 = vrot.lane.b32.xlu0 %v2662_v47, %s5456_s0  ;;  %3400 = vrot.lane.b32.xlu1 %v3360_v48, %s5474_s2 }
 0xea2   :  { %3002 = vrot.lane.b32.xlu0 %v2946_v52, %s5458_s24  ;;  %3559 = vrot.lane.b32.xlu1 %v3515_v2, %s5464_s1  ;;  %v9379_v52 = vld [vmem:[#allocation135_spill] sm:$0xff]  ;;  %v9380_v2 = vld [vmem:[#allocation149_spill] sm:$0xff] }
 0xea3   :  { %v3668_v12 = vmul.f32 %v9379_v52, %v7742_v21  ;;  %v3800_v56 = vmul.f32 %v9380_v2, %v7718_v27 }
 0xea5   :  { %v2369_v34 = vpop.f32.mrb[28].mxu1 }
 0xea6   :  { %v7770_v47 = vpop.f32.mrb[29].mxu1  ;;  %3286 = vrot.lane.b32.xlu0 %v3230_v31, %s5460_s26  ;;  %3701 = vrot.lane.b32.xlu1 %v3657_v60, %s5477_s11  ;;  %v2243_v34 = vadd.f32 %v2242_v1, %v6519_v53  ;;  %v3954_v31 = vmul.f32 %v9381_v35, %v7742_v21  ;;  %v9382_v60 = vld [vmem:[#allocation165_spill] sm:$0xff] }
 0xea7   :  { %v2373_v48 = vpop.f32.mrb[30].mxu1 }
 0xea8   :  { %v7774_v28 = vpop.f32.mrb[31].mxu1  ;;  %v3943_v48 = vmul.f32 %v9382_v60, %v7718_v27  ;;  %v2381_v62 = vmax.f32 %v2243_v34, 0.0 }
 0xeaa   :  { %3723 = vrot.lane.b32.xlu0 %v3668_v12, %s5477_s11  ;;  %3844 = vrot.lane.b32.xlu1 %v3800_v56, %s5479_s12  ;;  %v9383_v12 = vld [vmem:[#allocation179_spill] sm:$0xff]  ;;  %v9384_v56 = vld [vmem:[#allocation8_spill] sm:$0xff] }
 0xeab   :  { %v4086_v46 = vmul.f32 %v9383_v12, %v7718_v27  ;;  %v7796_v1 = vadd.f32 %v2381_v62, %v9384_v56  ;;  %v9387_v56 = vld [vmem:[#allocation44_spill] sm:$0xff] }
 0xead   :  { %9385 = vst [vmem:[#allocation103_spill] sm:$0xff] %v7796_v1  ;;  %v2654_v34 = vmul.f32 %v6920_v26, %v7796_v1  ;;  %v2938_v62 = vmul.f32 %v7020_v44, %v7796_v1  ;;  %v3946_v11 = vmul.f32 %v9382_v60, %v7796_v1  ;;  %v4232_v51 = vmul.f32 %v7639_v55, %v7796_v1 }
 0xeae   :  { %4009 = vrot.lane.b32.xlu0 %v3954_v31, %s5481_s13  ;;  %3987 = vrot.lane.b32.xlu1 %v3943_v48, %s5481_s13  ;;  %v3363_v48 = vmul.f32 %v9374_v59, %v7796_v1 }
 0xeb2   :  { %4295 = vrot.lane.b32.xlu0 %v4240_v54, %s5485_s3  ;;  %4130 = vrot.lane.b32.xlu1 %v4086_v46, %s5483_s14  ;;  %v4372_v54 = vmul.f32 %v7697_v29, %v7718_v27  ;;  %v9386_v46 = vld [vmem:[#allocation14_spill] sm:$0xff] }
 0xeb3   :  { %v2520_v31 = vmul.f32 %v9386_v46, %v7742_v21 }
 0xeb6   :  { %4702 = vrot.lane.b32.xlu0 %v7796_v1, %s5487_s5  ;;  %4273 = vrot.lane.b32.xlu1 %v4229_v6, %s5485_s3  ;;  %v3222_v6 = vmul.f32 %v7120_v43, %v7796_v1 }
 0xeba   :  { %2702 = vrot.lane.b32.xlu0 %v2654_v34, %s5456_s0  ;;  %4642 = vrot.lane.b32.xlu1 %v7742_v21, %s5488_s27  ;;  %v2804_v34 = vmul.f32 %v9387_v56, %v7742_v21 }
 0xebe   :  { %2986 = vrot.lane.b32.xlu0 %v2938_v62, %s5458_s24  ;;  %4416 = vrot.lane.b32.xlu1 %v4372_v54, %s5486_s4  ;;  %v2247_v62 = vadd.f32 %v7720_v17, %v7722_v19  ;;  %v3660_v54 = vmul.f32 %v9378_v39, %v7796_v1  ;;  %v9390_v17 = vld [vmem:[#allocation9_spill] sm:$0xff] }
 0xec2   :  { %3270 = vrot.lane.b32.xlu0 %v3222_v6, %s5460_s26  ;;  %2576 = vrot.lane.b32.xlu1 %v2520_v31, %s5454_s22  ;;  %v9388_v6 = vld [vmem:[#allocation74_spill] sm:$0xff]  ;;  %v2391_v31 = vmax.f32 %v2247_v62, 0.0 }
 0xec3   :  { %v3088_v14 = vmul.f32 %v9388_v6, %v7742_v21 }
 0xec4   :  { %v7841_v4 = vadd.f32 %v2391_v31, %v9390_v17  ;;  %v4383_v17 = vmul.f32 %v7706_v58, %v7742_v21 }
 0xec6   :  { %3406 = vrot.lane.b32.xlu0 %v3363_v48, %s5474_s2  ;;  %2860 = vrot.lane.b32.xlu1 %v2804_v34, %s5457_s23  ;;  %v9389_v48 = vld [vmem:[#allocation105_spill] sm:$0xff]  ;;  %9391 = vst [vmem:[#allocation117_spill] sm:$0xff] %v7841_v4  ;;  %v2523_v62 = vmul.f32 %v9386_v46, %v7841_v4  ;;  %v2807_v31 = vmul.f32 %v9387_v56, %v7841_v4 }
 0xec7   :  { %v3370_v34 = vmul.f32 %v9389_v48, %v7742_v21  ;;  %v3671_v45 = vmul.f32 %v9379_v52, %v7841_v4  ;;  %v3957_v25 = vmul.f32 %v9381_v35, %v7841_v4 }
 0xeca   :  { %3707 = vrot.lane.b32.xlu0 %v3660_v54, %s5477_s11  ;;  %3144 = vrot.lane.b32.xlu1 %v3088_v14, %s5459_s25  ;;  %v9392_v54 = vld [vmem:[#allocation119_spill] sm:$0xff] }
 0xecb   :  { %v3526_v14 = vmul.f32 %v9392_v54, %v7742_v21 }
 0xece   :  { %3993 = vrot.lane.b32.xlu0 %v3946_v11, %s5481_s13  ;;  %3420 = vrot.lane.b32.xlu1 %v3370_v34, %s5474_s2  ;;  %v9393_v11 = vld [vmem:[#allocation151_spill] sm:$0xff]  ;;  %v4097_v34 = vmul.f32 %v7481_v24, %v7742_v21 }
 0xecf   :  { %v3811_v10 = vmul.f32 %v9393_v11, %v7742_v21 }
 0xed2   :  { %4279 = vrot.lane.b32.xlu0 %v4232_v51, %s5485_s3  ;;  %3581 = vrot.lane.b32.xlu1 %v3526_v14, %s5464_s1  ;;  %v3091_v51 = vmul.f32 %v9388_v6, %v7841_v4  ;;  %v2512_v14 = vmul.f32 %v6870_v32, %v7796_v1 }
 0xed6   :  { %2582 = vrot.lane.b32.xlu0 %v2523_v62, %s5454_s22  ;;  %3866 = vrot.lane.b32.xlu1 %v3811_v10, %s5479_s12  ;;  %v3373_v10 = vmul.f32 %v9389_v48, %v7841_v4  ;;  %v3529_v62 = vmul.f32 %v9392_v54, %v7841_v4 }
 0xeda   :  { %2866 = vrot.lane.b32.xlu0 %v2807_v31, %s5457_s23  ;;  %4152 = vrot.lane.b32.xlu1 %v4097_v34, %s5483_s14  ;;  %v2796_v31 = vmul.f32 %v6970_v3, %v7796_v1  ;;  %v3814_v34 = vmul.f32 %v9393_v11, %v7841_v4 }
 0xede   :  { %3150 = vrot.lane.b32.xlu0 %v3091_v51, %s5459_s25  ;;  %4438 = vrot.lane.b32.xlu1 %v4383_v17, %s5486_s4  ;;  %v3080_v51 = vmul.f32 %v7070_v30, %v7796_v1  ;;  %v7885_v17 = vpop.permute.xlu0 %2470 }
 0xee2   :  { %3426 = vrot.lane.b32.xlu0 %v3373_v10, %s5474_s2  ;;  %2560 = vrot.lane.b32.xlu1 %v2512_v14, %s5454_s22  ;;  %v2327_v10 = vadd.f32 %v7748_v49, %v6519_v53  ;;  %v4100_v14 = vmul.f32 %v7481_v24, %v7841_v4  ;;  %v3803_v49 = vmul.f32 %v9380_v2, %v7796_v1 }
 0xee6   :  { %3587 = vrot.lane.b32.xlu0 %v3529_v62, %s5464_s1  ;;  %2844 = vrot.lane.b32.xlu1 %v2796_v31, %s5457_s23  ;;  %v3518_v62 = vmul.f32 %v9376_v38, %v7796_v1  ;;  %v2384_v31 = vmax.f32 %v2327_v10, 0.0 }
 0xee8   :  { %v7906_v13 = vadd.f32 %v2384_v31, %v9395_v7 }
 0xeea   :  { %3872 = vrot.lane.b32.xlu0 %v3814_v34, %s5479_s12  ;;  %3128 = vrot.lane.b32.xlu1 %v3080_v51, %s5459_s25  ;;  %v4386_v51 = vmul.f32 %v7706_v58, %v7841_v4  ;;  %v2515_v7 = vmul.f32 %v6870_v32, %v7906_v13  ;;  %v3083_v50 = vmul.f32 %v7070_v30, %v7906_v13 }
 0xeee   :  { %4158 = vrot.lane.b32.xlu0 %v4100_v14, %s5483_s14  ;;  %3565 = vrot.lane.b32.xlu1 %v3518_v62, %s5464_s1  ;;  %v4089_v62 = vmul.f32 %v9383_v12, %v7796_v1 }
 0xef0   :  { %v7895_v37 = vpop.permute.xlu0 %4420  ;;  %v7897_v34 = vpop.permute.xlu1 %4418 }
 0xef1   :  { %9394 = vst [vmem:[#allocation133_spill] sm:$0xff] %v7895_v37 }
 0xef2   :  { %4444 = vrot.lane.b32.xlu0 %v4386_v51, %s5486_s4  ;;  %3850 = vrot.lane.b32.xlu1 %v3803_v49, %s5479_s12 }
 0xef4   :  { %v7908_v14 = vpop.permute.xlu0 %4424  ;;  %v7910_v10 = vpop.permute.xlu1 %4426 }
 0xef5   :  { %9396 = vst [vmem:[#allocation165_spill] sm:$0xff] %v7908_v14  ;;  %9397 = vst [vmem:[#allocation8_spill] sm:$0xff] %v7910_v10  ;;  %v2799_v14 = vmul.f32 %v6970_v3, %v7906_v13 }
 0xef6   :  { %4768 = vrot.lane.b32.xlu0 %v7906_v13, %s5487_s5  ;;  %4136 = vrot.lane.b32.xlu1 %v4089_v62, %s5483_s14  ;;  %v4375_v62 = vmul.f32 %v7697_v29, %v7796_v1 }
 0xef8   :  { %v7917_v37 = vpop.permute.xlu0 %4432  ;;  %v7919_v51 = vpop.permute.xlu1 %4430 }
 0xef9   :  { %9398 = vst [vmem:[#allocation14_spill] sm:$0xff] %v7917_v37  ;;  %9399 = vst [vmem:[#allocation44_spill] sm:$0xff] %v7919_v51  ;;  %v3233_v51 = vmul.f32 %v9377_v22, %v7841_v4 }
 0xefa   :  { %2566 = vrot.lane.b32.xlu0 %v2515_v7, %s5454_s22  ;;  %4711 = vrot.lane.b32.xlu1 %v7841_v4, %s5488_s27 }
 0xefc   :  { %v7926_v31 = vpop.permute.xlu0 %4440  ;;  %v7928_v49 = vpop.permute.xlu1 %4436 }
 0xefd   :  { %9400 = vst [vmem:[#allocation74_spill] sm:$0xff] %v7928_v49  ;;  %v2665_v49 = vmul.f32 %v6929_v33, %v7841_v4 }
 0xefe   :  { %2850 = vrot.lane.b32.xlu0 %v2799_v14, %s5457_s23  ;;  %4422 = vrot.lane.b32.xlu1 %v4375_v62, %s5486_s4  ;;  %v3521_v14 = vmul.f32 %v9376_v38, %v7906_v13  ;;  %v2949_v62 = vmul.f32 %v9375_v5, %v7841_v4 }
 0xf00   :  { %v7936_v37 = vpop.permute.xlu0 %4631  ;;  %v7938_v7 = vpop.permute.xlu1 %4442 }
 0xf01   :  { %9401 = vst [vmem:[#allocation105_spill] sm:$0xff] %v7936_v37  ;;  %9402 = vst [vmem:[#allocation9_spill] sm:$0xff] %v7938_v7  ;;  %v2331_v7 = vadd.f32 %v7752_v41, %v7722_v19  ;;  %v3806_v37 = vmul.f32 %v9380_v2, %v7906_v13  ;;  %v4092_v41 = vmul.f32 %v9383_v12, %v7906_v13  ;;  %v9420_v12 = vld [vmem:[#allocation16_spill] sm:$0xff] }
 0xf02   :  { %3134 = vrot.lane.b32.xlu0 %v3083_v50, %s5459_s25  ;;  %2724 = vrot.lane.b32.xlu1 %v2665_v49, %s5456_s0  ;;  %v3949_v2 = vmul.f32 %v9382_v60, %v7906_v13 }
 0xf04   :  { %v7946_v18 = vpop.permute.xlu0 %2554  ;;  %v7948_v1 = vpop.permute.xlu1 %2696 }
 0xf05   :  { %9403 = vst [vmem:[#allocation119_spill] sm:$0xff] %v7946_v18  ;;  %9404 = vst [vmem:[#allocation151_spill] sm:$0xff] %v7948_v1 }
 0xf06   :  { %3571 = vrot.lane.b32.xlu0 %v3521_v14, %s5464_s1  ;;  %3008 = vrot.lane.b32.xlu1 %v2949_v62, %s5458_s24  ;;  %v2394_v14 = vmax.f32 %v2331_v7, 0.0  ;;  %v4378_v7 = vmul.f32 %v7697_v29, %v7906_v13 }
 0xf08   :  { %v7958_v50 = vpop.permute.xlu0 %2838  ;;  %v7960_v49 = vpop.permute.xlu1 %2980  ;;  %v7979_v63 = vadd.f32 %v2394_v14, %v9408_v15  ;;  %v4243_v14 = vmul.f32 %v7648_v0, %v7841_v4 }
 0xf09   :  { %9405 = vst [vmem:[#allocation10_spill] sm:$0xff] %v7958_v50  ;;  %9406 = vst [vmem:[#allocation209_spill] sm:$0xff] %v7960_v49 }
 0xf0a   :  { %3856 = vrot.lane.b32.xlu0 %v3806_v37, %s5479_s12  ;;  %3292 = vrot.lane.b32.xlu1 %v3233_v51, %s5460_s26  ;;  %v2668_v15 = vmul.f32 %v6929_v33, %v7979_v63  ;;  %v3960_v58 = vmul.f32 %v9381_v35, %v7979_v63  ;;  %v2597_v35 = vsel %vm122_vm0, %v7946_v18, %v9420_v12 }
 0xf0c   :  { %v7968_v10 = vpop.permute.xlu0 %3122  ;;  %v7970_v62 = vpop.permute.xlu1 %3264 }
 0xf0d   :  { %9407 = vst [vmem:[#allocation210_spill] sm:$0xff] %v7968_v10 }
 0xf0e   :  { %4142 = vrot.lane.b32.xlu0 %v4092_v41, %s5483_s14  ;;  %3729 = vrot.lane.b32.xlu1 %v3671_v45, %s5477_s11 }
 0xf10   :  { %v7981_v37 = vpop.permute.xlu0 %2718  ;;  %v7983_v51 = vpop.permute.xlu1 %3400 }
 0xf11   :  { %9409 = vst [vmem:[#allocation12_spill] sm:$0xff] %v7981_v37  ;;  %9410 = vst [vmem:[#allocation211_spill] sm:$0xff] %v7983_v51 }
 0xf12   :  { %4428 = vrot.lane.b32.xlu0 %v4378_v7, %s5486_s4  ;;  %4015 = vrot.lane.b32.xlu1 %v3957_v25, %s5481_s13  ;;  %v2952_v25 = vmul.f32 %v9375_v5, %v7979_v63  ;;  %v2657_v7 = vmul.f32 %v6920_v26, %v7906_v13 }
 0xf14   :  { %v7991_v41 = vpop.permute.xlu0 %3002  ;;  %v7993_v45 = vpop.permute.xlu1 %3559 }
 0xf15   :  { %9411 = vst [vmem:[#allocation212_spill] sm:$0xff] %v7993_v45 }
 0xf16   :  { %2730 = vrot.lane.b32.xlu0 %v2668_v15, %s5456_s0  ;;  %4301 = vrot.lane.b32.xlu1 %v4243_v14, %s5485_s3  ;;  %v3236_v15 = vmul.f32 %v9377_v22, %v7979_v63  ;;  %v2941_v14 = vmul.f32 %v7020_v44, %v7906_v13  ;;  %v2372_v22 = vadd.f32 %v7770_v47, %v6519_v53 }
 0xf17   :  { %v4246_v53 = vmul.f32 %v7648_v0, %v7979_v63  ;;  %v3663_v47 = vmul.f32 %v9378_v39, %v7906_v13 }
 0xf18   :  { %v8001_v61 = vpop.permute.xlu0 %3286  ;;  %v8003_v9 = vpop.permute.xlu1 %3701 }
 0xf19   :  { %9412 = vst [vmem:[#allocation213_spill] sm:$0xff] %v8003_v9 }
 0xf1a   :  { %3014 = vrot.lane.b32.xlu0 %v2952_v25, %s5458_s24  ;;  %2708 = vrot.lane.b32.xlu1 %v2657_v7, %s5456_s0  ;;  %v3674_v25 = vmul.f32 %v9379_v52, %v7979_v63  ;;  %v3225_v7 = vmul.f32 %v7120_v43, %v7906_v13  ;;  %v3366_v52 = vmul.f32 %v9374_v59, %v7906_v13 }
 0xf1c   :  { %v8011_v57 = vpop.permute.xlu0 %3723  ;;  %v8013_v16 = vpop.permute.xlu1 %3844 }
 0xf1d   :  { %9413 = vst [vmem:[#allocation214_spill] sm:$0xff] %v8013_v16 }
 0xf1e   :  { %3298 = vrot.lane.b32.xlu0 %v3236_v15, %s5460_s26  ;;  %2992 = vrot.lane.b32.xlu1 %v2941_v14, %s5458_s24 }
 0xf20   :  { %v8021_v5 = vpop.permute.xlu0 %4009  ;;  %v8023_v33 = vpop.permute.xlu1 %3987 }
 0xf21   :  { %9414 = vst [vmem:[#allocation215_spill] sm:$0xff] %v8021_v5  ;;  %9415 = vst [vmem:[#allocation216_spill] sm:$0xff] %v8023_v33 }
 0xf22   :  { %3735 = vrot.lane.b32.xlu0 %v3674_v25, %s5477_s11  ;;  %3276 = vrot.lane.b32.xlu1 %v3225_v7, %s5460_s26  ;;  %v2387_v25 = vmax.f32 %v2372_v22, 0.0 }
 0xf24   :  { %v8033_v15 = vpop.permute.xlu0 %4295  ;;  %v8035_v14 = vpop.permute.xlu1 %4130  ;;  %v8059_v22 = vadd.f32 %v2387_v25, %v6767_v36 }
 0xf25   :  { %9416 = vst [vmem:[#allocation217_spill] sm:$0xff] %v8033_v15  ;;  %9417 = vst [vmem:[#allocation218_spill] sm:$0xff] %v8035_v14 }
 0xf26   :  { %4021 = vrot.lane.b32.xlu0 %v3960_v58, %s5481_s13  ;;  %3412 = vrot.lane.b32.xlu1 %v3366_v52, %s5474_s2  ;;  %v2479_v58 = vmul.f32 %v7885_v17, %v7718_v27  ;;  %v9422_v27 = vld [vmem:[#allocation31_spill] sm:$0xff]  ;;  %v2660_v25 = vmul.f32 %v6920_v26, %v8059_v22  ;;  %v2944_v26 = vmul.f32 %v7020_v44, %v8059_v22 }
 0xf27   :  { %v2739_v12 = vsel %vm166_vm1, %v7948_v1, %v9422_v27  ;;  %v9427_v27 = vld [vmem:[#allocation13_spill] sm:$0xff] }
 0xf28   :  { %v8043_v4 = vpop.permute.xlu0 %4702  ;;  %v8045_v7 = vpop.permute.xlu1 %4273  ;;  %v2627_v52 = vadd.f32 %v2597_v35, %v2479_v58  ;;  %v9425_v58 = vld [vmem:[#allocation46_spill] sm:$0xff] }
 0xf29   :  { %9418 = vst [vmem:[#allocation219_spill] sm:$0xff] %v8043_v4  ;;  %9419 = vst [vmem:[#allocation220_spill] sm:$0xff] %v8045_v7  ;;  %v2881_v18 = vsel %vm208_vm2, %v7958_v50, %v9425_v58 }
 0xf2a   :  { %4307 = vrot.lane.b32.xlu0 %v4246_v53, %s5485_s3  ;;  %3713 = vrot.lane.b32.xlu1 %v3663_v47, %s5477_s11  ;;  %v2769_v53 = vadd.f32 %v2739_v12, %v2627_v52  ;;  %v4235_v47 = vmul.f32 %v7639_v55, %v7906_v13  ;;  %v2487_v12 = vmul.f32 %v9427_v27, %v7742_v21  ;;  %v9430_v21 = vld [vmem:[#allocation40_spill] sm:$0xff] }
 0xf2c   :  { %v8061_v4 = vpop.permute.xlu0 %2702  ;;  %v8063_v0 = vpop.permute.xlu1 %4642 }
 0xf2d   :  { %9421 = vst [vmem:[#allocation16_spill] sm:$0xff] %v8061_v4 }
 0xf2e   :  { %4834 = vrot.lane.b32.xlu0 %v8059_v22, %s5487_s5  ;;  %3999 = vrot.lane.b32.xlu1 %v3949_v2, %s5481_s13  ;;  %v2911_v2 = vadd.f32 %v2881_v18, %v2769_v53  ;;  %v9429_v18 = vld [vmem:[#allocation61_spill] sm:$0xff] }
 0xf2f   :  { %v3023_v53 = vsel %vm262_vm3, %v7960_v49, %v9429_v18  ;;  %v9432_v18 = vld [vmem:[#allocation55_spill] sm:$0xff] }
 0xf30   :  { %v8073_v36 = vpop.permute.xlu0 %2986  ;;  %v8075_v35 = vpop.permute.xlu1 %4416 }
 0xf31   :  { %9423 = vst [vmem:[#allocation31_spill] sm:$0xff] %v8073_v36  ;;  %9424 = vst [vmem:[#allocation221_spill] sm:$0xff] %v8075_v35  ;;  %v9428_v36 = vld [vmem:[#allocation25_spill] sm:$0xff] }
 0xf32   :  { %2714 = vrot.lane.b32.xlu0 %v2660_v25, %s5456_s0  ;;  %4285 = vrot.lane.b32.xlu1 %v4235_v47, %s5485_s3  ;;  %v2746_v25 = vsel %vm166_vm1, %v7981_v37, %v9430_v21  ;;  %v3053_v47 = vadd.f32 %v3023_v53, %v2911_v2 }
 0xf34   :  { %v8086_v52 = vpop.permute.xlu0 %3270  ;;  %v8090_v1 = vpop.permute.xlu1 %2576 }
 0xf35   :  { %9426 = vst [vmem:[#allocation46_spill] sm:$0xff] %v8086_v52  ;;  %v2604_v4 = vsel %vm122_vm0, %v8090_v1, %v9428_v36  ;;  %v2526_v36 = vmul.f32 %v9386_v46, %v7979_v63 }
 0xf36   :  { %v2635_v58 = vadd.f32 %v2604_v4, %v2487_v12  ;;  %2998 = vrot.lane.b32.xlu0 %v2944_v26, %s5458_s24  ;;  %4777 = vrot.lane.b32.xlu1 %v7979_v63, %s5488_s27  ;;  %v3228_v4 = vmul.f32 %v7120_v43, %v8059_v22  ;;  %v9431_v12 = vld [vmem:[#allocation76_spill] sm:$0xff] }
 0xf37   :  { %v3165_v26 = vsel %vm306_vm4, %v7968_v10, %v9431_v12  ;;  %v3369_v12 = vmul.f32 %v9374_v59, %v8059_v22 }
 0xf38   :  { %v8106_v44 = vpop.permute.xlu0 %3406  ;;  %v2777_v50 = vadd.f32 %v2746_v25, %v2635_v58  ;;  %v8108_v52 = vpop.permute.xlu1 %2860  ;;  %v9433_v58 = vld [vmem:[#allocation70_spill] sm:$0xff]  ;;  %v3195_v53 = vadd.f32 %v3165_v26, %v3053_v47  ;;  %v9435_v47 = vld [vmem:[#allocation91_spill] sm:$0xff] }
 0xf39   :  { %v2888_v21 = vsel %vm208_vm2, %v8108_v52, %v9432_v18  ;;  %v3030_v43 = vsel %vm262_vm3, %v7991_v41, %v9433_v58  ;;  %v9434_v18 = vld [vmem:[#allocation85_spill] sm:$0xff]  ;;  %v3307_v26 = vsel %vm350_vm5, %v7970_v62, %v9435_v47 }
 0xf3a   :  { %v2919_v2 = vadd.f32 %v2888_v21, %v2777_v50  ;;  %3282 = vrot.lane.b32.xlu0 %v3228_v4, %s5460_s26  ;;  %2588 = vrot.lane.b32.xlu1 %v2526_v36, %s5454_s22  ;;  %v2810_v50 = vmul.f32 %v9387_v56, %v7979_v63  ;;  %v9436_v21 = vld [vmem:[#allocation100_spill] sm:$0xff] }
 0xf3b   :  { %v3314_v59 = vsel %vm350_vm5, %v8001_v61, %v9436_v21 }
 0xf3c   :  { %v8125_v25 = vpop.permute.xlu0 %3707  ;;  %v3061_v49 = vadd.f32 %v3030_v43, %v2919_v2  ;;  %v8127_v37 = vpop.permute.xlu1 %3144  ;;  %v3337_v2 = vadd.f32 %v3307_v26, %v3195_v53  ;;  %v9439_v53 = vld [vmem:[#allocation122_spill] sm:$0xff] }
 0xf3d   :  { %v3172_v4 = vsel %vm306_vm4, %v8127_v37, %v9434_v18 }
 0xf3e   :  { %v3203_v36 = vadd.f32 %v3172_v4, %v3061_v49  ;;  %3418 = vrot.lane.b32.xlu0 %v3369_v12, %s5474_s2  ;;  %2872 = vrot.lane.b32.xlu1 %v2810_v50, %s5457_s23  ;;  %v3666_v49 = vmul.f32 %v9378_v39, %v8059_v22  ;;  %v3094_v12 = vmul.f32 %v9388_v6, %v7979_v63  ;;  %v9437_v50 = vld [vmem:[#allocation108_spill] sm:$0xff]  ;;  %v9438_v4 = vld [vmem:[#allocation114_spill] sm:$0xff] }
 0xf3f   :  { %v3441_v18 = vsel %vm3440_vm13, %v7983_v51, %v9437_v50  ;;  %v3603_v39 = vsel %vm1906_vm12, %v7993_v45, %v9439_v53  ;;  %v3952_v50 = vmul.f32 %v9382_v60, %v8059_v22  ;;  %v9441_v51 = vld [vmem:[#allocation127_spill] sm:$0xff] }
 0xf40   :  { %v8144_v58 = vpop.permute.xlu0 %3993  ;;  %v3345_v43 = vadd.f32 %v3314_v59, %v3203_v36  ;;  %v8146_v10 = vpop.permute.xlu1 %3420  ;;  %v3470_v36 = vadd.f32 %v3441_v18, %v3337_v2  ;;  %v9442_v18 = vld [vmem:[#allocation143_spill] sm:$0xff] }
 0xf41   :  { %v3447_v47 = vsel %vm3440_vm13, %v8146_v10, %v9438_v4  ;;  %v3376_v4 = vmul.f32 %v9389_v48, %v7979_v63  ;;  %v3753_v60 = vsel %vm3745_vm14, %v8011_v57, %v9442_v18 }
 0xf42   :  { %3719 = vrot.lane.b32.xlu0 %v3666_v49, %s5477_s11  ;;  %3156 = vrot.lane.b32.xlu1 %v3094_v12, %s5459_s25  ;;  %v3478_v26 = vadd.f32 %v3447_v47, %v3345_v43  ;;  %v9440_v49 = vld [vmem:[#allocation138_spill] sm:$0xff]  ;;  %v3634_v2 = vadd.f32 %v3603_v39, %v3470_v36  ;;  %v4238_v36 = vmul.f32 %v7639_v55, %v8059_v22 }
 0xf43   :  { %v3746_v12 = vsel %vm3745_vm14, %v8003_v9, %v9440_v49  ;;  %v9443_v47 = vld [vmem:[#allocation154_spill] sm:$0xff] }
 0xf44   :  { %v8163_v21 = vpop.permute.xlu0 %4279  ;;  %v8165_v59 = vpop.permute.xlu1 %3581  ;;  %v3889_v45 = vsel %vm3888_vm15, %v8013_v16, %v9443_v47  ;;  %v3777_v49 = vadd.f32 %v3746_v12, %v3634_v2  ;;  %v3817_v47 = vmul.f32 %v9393_v11, %v7979_v63 }
 0xf45   :  { %v3610_v53 = vsel %vm1906_vm12, %v8165_v59, %v9441_v51 }
 0xf46   :  { %v3642_v43 = vadd.f32 %v3610_v53, %v3478_v26  ;;  %4005 = vrot.lane.b32.xlu0 %v3952_v50, %s5481_s13  ;;  %3432 = vrot.lane.b32.xlu1 %v3376_v4, %s5474_s2  ;;  %v3532_v26 = vmul.f32 %v9392_v54, %v7979_v63  ;;  %v9444_v50 = vld [vmem:[#allocation172_spill] sm:$0xff]  ;;  %v9445_v53 = vld [vmem:[#allocation159_spill] sm:$0xff]  ;;  %v3920_v12 = vadd.f32 %v3889_v45, %v3777_v49 }
 0xf47   :  { %v4032_v4 = vsel %vm4031_vm6, %v8023_v33, %v9444_v50  ;;  %v2376_v45 = vadd.f32 %v7774_v28, %v7722_v19  ;;  %v4318_v50 = vsel %vm4317_vm8, %v8045_v7, %v7675_v20  ;;  %v4325_v19 = vsel %vm4317_vm8, %v8033_v15, %v7685_v8  ;;  %v9461_v33 = vld [vmem:[#allocation29_spill] sm:$0xff] }
 0xf48   :  { %v8185_v9 = vpop.permute.xlu0 %2582  ;;  %v3785_v51 = vadd.f32 %v3753_v60, %v3642_v43  ;;  %v8187_v39 = vpop.permute.xlu1 %3866  ;;  %v9446_v43 = vld [vmem:[#allocation173_spill] sm:$0xff]  ;;  %v4175_v60 = vsel %vm4174_vm7, %v8035_v14, %v7548_v40  ;;  %v4063_v49 = vadd.f32 %v4032_v4, %v3920_v12  ;;  %v4461_v28 = vsel %vm4460_vm9, %v8075_v35, %v7897_v34  ;;  %v9449_v34 = vld [vmem:[#allocation11_spill] sm:$0xff] }
 0xf49   :  { %v3896_v18 = vsel %vm3888_vm15, %v8187_v39, %v9445_v53  ;;  %v4039_v55 = vsel %vm4031_vm6, %v8021_v5, %v9446_v43  ;;  %v2397_v20 = vmax.f32 %v2376_v45, 0.0  ;;  %v4103_v43 = vmul.f32 %v7481_v24, %v7979_v63 }
 0xf4a   :  { %v3928_v2 = vadd.f32 %v3896_v18, %v3785_v51  ;;  %4291 = vrot.lane.b32.xlu0 %v4238_v36, %s5485_s3  ;;  %3593 = vrot.lane.b32.xlu1 %v3532_v26, %s5464_s1  ;;  %v4206_v53 = vadd.f32 %v4175_v60, %v4063_v49 }
 0xf4c   :  { %v8211_v51 = vpop.permute.xlu0 %2866  ;;  %v4071_v36 = vadd.f32 %v4039_v55, %v3928_v2  ;;  %v8213_v26 = vpop.permute.xlu1 %4152  ;;  %v4349_v4 = vadd.f32 %v4318_v50, %v4206_v53  ;;  %v4381_v50 = vmul.f32 %v7697_v29, %v8059_v22 }
 0xf4d   :  { %9447 = vst [vmem:[#allocation13_spill] sm:$0xff] %v8213_v26  ;;  %v4182_v40 = vsel %vm4174_vm7, %v8213_v26, %v7600_v42 }
 0xf4e   :  { %v4214_v18 = vadd.f32 %v4182_v40, %v4071_v36  ;;  %4448 = vrot.lane.b32.xlu0 %v7709_v23, %s5486_s4  ;;  %3878 = vrot.lane.b32.xlu1 %v3817_v47, %s5479_s12  ;;  %v4492_v60 = vadd.f32 %v4461_v28, %v4349_v4  ;;  %v8243_v47 = vadd.f32 %v2397_v20, %v9449_v34  ;;  %v9452_v34 = vld [vmem:[#allocation179_spill] sm:$0xff] }
 0xf4f   :  { %v3086_v20 = vmul.f32 %v7070_v30, %v8059_v22 }
 0xf50   :  { %v8230_v12 = vpop.permute.xlu0 %3150  ;;  %v4357_v42 = vadd.f32 %v4325_v19, %v4214_v18  ;;  %v8232_v2 = vpop.permute.xlu1 %4438  ;;  %v2529_v18 = vmul.f32 %v9386_v46, %v8243_v47  ;;  %v2802_v19 = vmul.f32 %v6970_v3, %v8059_v22  ;;  %v2813_v28 = vmul.f32 %v9387_v56, %v8243_v47 }
 0xf51   :  { %9448 = vst [vmem:[#allocation25_spill] sm:$0xff] %v8232_v2  ;;  %v4468_v55 = vsel %vm4460_vm9, %v8232_v2, %v7926_v31  ;;  %v2518_v31 = vmul.f32 %v6870_v32, %v8059_v22  ;;  %v3097_v4 = vmul.f32 %v9388_v6, %v8243_v47  ;;  %v9459_v2 = vld [vmem:[#allocation52_spill] sm:$0xff] }
 0xf52   :  { %v4500_v8 = vadd.f32 %v4468_v55, %v4357_v42  ;;  %4452 = vrot.lane.b32.xlu0 %v7709_v23, %s5486_s4  ;;  %4164 = vrot.lane.b32.xlu1 %v4103_v43, %s5483_s14  ;;  %v3524_v42 = vmul.f32 %v9376_v38, %v8059_v22  ;;  %v3379_v43 = vmul.f32 %v9389_v48, %v8243_v47  ;;  %v9451_v55 = vld [vmem:[#allocation149_spill] sm:$0xff] }
 0xf54   :  { %v8245_v45 = vadd.f32 %v4500_v8, %v4492_v60  ;;  %v8247_v49 = vpop.permute.xlu0 %3426  ;;  %v8249_v36 = vpop.permute.xlu1 %2560  ;;  %v3809_v60 = vmul.f32 %v9451_v55, %v8059_v22  ;;  %v3535_v8 = vmul.f32 %v9392_v54, %v8243_v47  ;;  %v9455_v55 = vld [vmem:[#allocation117_spill] sm:$0xff] }
 0xf56   :  { %9450 = vst [vmem:[#allocation61_spill] sm:$0xff] %v8245_v45  ;;  %4434 = vrot.lane.b32.xlu0 %v4381_v50, %s5486_s4  ;;  %2572 = vrot.lane.b32.xlu1 %v2518_v31, %s5454_s22  ;;  %v4095_v50 = vmul.f32 %v9452_v34, %v8059_v22  ;;  %v9458_v45 = vld [vmem:[#allocation39_spill] sm:$0xff] }
 0xf58   :  { %v8257_v40 = vpop.permute.xlu0 %3587  ;;  %v8259_v53 = vpop.permute.xlu1 %2844 }
 0xf5a   :  { %2594 = vrot.lane.b32.xlu0 %v2529_v18, %s5454_s22  ;;  %2856 = vrot.lane.b32.xlu1 %v2802_v19, %s5457_s23  ;;  %v3820_v18 = vmul.f32 %v9393_v11, %v8243_v47  ;;  %s5489_s22 = smov 7  }
 0xf5c   :  { %v8267_v29 = vpop.permute.xlu0 %3872  ;;  %v8269_v32 = vpop.permute.xlu1 %3128 }
 0xf5e   :  { %2878 = vrot.lane.b32.xlu0 %v2813_v28, %s5457_s23  ;;  %3140 = vrot.lane.b32.xlu1 %v3086_v20, %s5459_s25  ;;  %v4106_v28 = vmul.f32 %v7481_v24, %v8243_v47  ;;  %v9453_v20 = vld [vmem:[#allocation22_spill] sm:$0xff] }
 0xf60   :  { %v8277_v46 = vpop.permute.xlu0 %4158  ;;  %v8279_v3 = vpop.permute.xlu1 %3565 }
 0xf62   :  { %3162 = vrot.lane.b32.xlu0 %v3097_v4, %s5459_s25  ;;  %3577 = vrot.lane.b32.xlu1 %v3524_v42, %s5464_s1  ;;  %v2605_v4 = vsel %vm122_vm0, %v9453_v20, %v8185_v9  ;;  %v9454_v42 = vld [vmem:[#allocation24_spill] sm:$0xff]  ;;  %v9457_v20 = vld [vmem:[#allocation37_spill] sm:$0xff] }
 0xf63   :  { %v2606_v11 = vsel %vm122_vm0, %v8185_v9, %v9454_v42 }
 0xf64   :  { %v8287_v56 = vpop.permute.xlu0 %4444  ;;  %v8289_v30 = vpop.permute.xlu1 %3850 }
 0xf66   :  { %3438 = vrot.lane.b32.xlu0 %v3379_v43, %s5474_s2  ;;  %3862 = vrot.lane.b32.xlu1 %v3809_v60, %s5479_s12  ;;  %v8329_v43 = vmul.f32 0.0, %v9427_v27  ;;  %v2489_v60 = vmul.f32 %v9427_v27, %v9455_v55 }
 0xf68   :  { %v8297_v6 = vpop.permute.xlu0 %4768  ;;  %v8299_v38 = vpop.permute.xlu1 %4136  ;;  %v2636_v24 = vadd.f32 %v2605_v4, %v8329_v43  ;;  %v2889_v4 = vsel %vm208_vm2, %v9459_v2, %v8211_v51 }
 0xf6a   :  { %3599 = vrot.lane.b32.xlu0 %v3535_v8, %s5464_s1  ;;  %4148 = vrot.lane.b32.xlu1 %v4095_v50, %s5483_s14  ;;  %v2637_v8 = vadd.f32 %v2606_v11, %v2489_v60  ;;  %v9460_v11 = vld [vmem:[#allocation54_spill] sm:$0xff] }
 0xf6b   :  { %v2890_v60 = vsel %vm208_vm2, %v8211_v51, %v9460_v11  ;;  %v9464_v51 = vld [vmem:[#allocation82_spill] sm:$0xff] }
 0xf6c   :  { %v8307_v48 = vpop.permute.xlu0 %2566  ;;  %v8309_v31 = vpop.permute.xlu1 %4711 }
 0xf6e   :  { %3884 = vrot.lane.b32.xlu0 %v3820_v18, %s5479_s12  ;;  %4843 = vrot.lane.b32.xlu1 %v8243_v47, %s5488_s27  ;;  %v9456_v18 = vld [vmem:[#allocation208_spill] sm:$0xff] }
 0xf6f   :  { %v4389_v9 = vmul.f32 %v9456_v18, %v7979_v63 }
 0xf70   :  { %v8316_v54 = vpop.permute.xlu0 %2850  ;;  %v8318_v19 = vpop.permute.xlu1 %4422 }
 0xf72   :  { %4170 = vrot.lane.b32.xlu0 %v4106_v28, %s5483_s14  ;;  %4446 = vrot.lane.b32.xlu1 %v7709_v23, %s5486_s4 }
 0xf74   :  { %v8337_v34 = vpop.permute.xlu0 %3134  ;;  %v2725_v50 = vpop.permute.xlu1 %2724 }
 0xf75   :  { %v2747_v42 = vsel %vm166_vm1, %v9457_v20, %v2725_v50  ;;  %v2748_v55 = vsel %vm166_vm1, %v2725_v50, %v9458_v45  ;;  %v2671_v45 = vmul.f32 %v9461_v33, %v8243_v47  ;;  %v9463_v50 = vld [vmem:[#allocation69_spill] sm:$0xff] }
 0xf76   :  { %v2778_v35 = vadd.f32 %v2747_v42, %v2636_v24  ;;  %v2779_v28 = vadd.f32 %v2748_v55, %v2637_v8  ;;  %4450 = vrot.lane.b32.xlu1 %v4389_v9, %s5486_s4  ;;  %v9462_v24 = vld [vmem:[#allocation67_spill] sm:$0xff]  ;;  %v3173_v55 = vsel %vm306_vm4, %v9464_v51, %v8230_v12 }
 0xf78   :  { %v8352_v7 = vpop.permute.xlu0 %3571  ;;  %v2920_v14 = vadd.f32 %v2889_v4, %v2778_v35  ;;  %v2921_v15 = vadd.f32 %v2890_v60, %v2779_v28  ;;  %v3009_v20 = vpop.permute.xlu1 %3008  ;;  %v9465_v35 = vld [vmem:[#allocation84_spill] sm:$0xff] }
 0xf79   :  { %v3031_v8 = vsel %vm262_vm3, %v9462_v24, %v3009_v20  ;;  %v3032_v9 = vsel %vm262_vm3, %v3009_v20, %v9463_v50  ;;  %v3174_v28 = vsel %vm306_vm4, %v8230_v12, %v9465_v35  ;;  %v9466_v24 = vld [vmem:[#allocation59_spill] sm:$0xff] }
 0xf7a   :  { %v3062_v42 = vadd.f32 %v3031_v8, %v2920_v14  ;;  %v3063_v2 = vadd.f32 %v3032_v9, %v2921_v15  ;;  %2736 = vrot.lane.b32.xlu1 %v2671_v45, %s5456_s0  ;;  %v2955_v20 = vmul.f32 %v9466_v24, %v8243_v47  ;;  %v9467_v14 = vld [vmem:[#allocation97_spill] sm:$0xff]  ;;  %v9468_v45 = vld [vmem:[#allocation99_spill] sm:$0xff] }
 0xf7b   :  { %v9469_v12 = vld [vmem:[#allocation111_spill] sm:$0xff] }
 0xf7c   :  { %v8367_v4 = vpop.permute.xlu0 %3856  ;;  %v3204_v33 = vadd.f32 %v3173_v55, %v3062_v42  ;;  %v3205_v11 = vadd.f32 %v3174_v28, %v3063_v2  ;;  %v3293_v60 = vpop.permute.xlu1 %3292  ;;  %v3448_v51 = vsel %vm3440_vm13, %v9469_v12, %v8247_v49  ;;  %v9470_v42 = vld [vmem:[#allocation113_spill] sm:$0xff] }
 0xf7d   :  { %v3315_v15 = vsel %vm350_vm5, %v9467_v14, %v3293_v60  ;;  %v3316_v8 = vsel %vm350_vm5, %v3293_v60, %v9468_v45  ;;  %v3449_v2 = vsel %vm3440_vm13, %v8247_v49, %v9470_v42  ;;  %v9471_v14 = vld [vmem:[#allocation89_spill] sm:$0xff]  ;;  %v9474_v49 = vld [vmem:[#allocation144_spill] sm:$0xff] }
 0xf7e   :  { %v3346_v50 = vadd.f32 %v3315_v15, %v3204_v33  ;;  %v3347_v9 = vadd.f32 %v3316_v8, %v3205_v11  ;;  %3020 = vrot.lane.b32.xlu1 %v2955_v20, %s5458_s24  ;;  %v3239_v60 = vmul.f32 %v9471_v14, %v8243_v47  ;;  %v9472_v33 = vld [vmem:[#allocation128_spill] sm:$0xff]  ;;  %v9473_v20 = vld [vmem:[#allocation130_spill] sm:$0xff] }
 0xf7f   :  { %v3611_v11 = vsel %vm1906_vm12, %v9472_v33, %v8257_v40  ;;  %v3612_v15 = vsel %vm1906_vm12, %v8257_v40, %v9473_v20  ;;  %v9476_v33 = vld [vmem:[#allocation135_spill] sm:$0xff]  ;;  %v9477_v40 = vld [vmem:[#allocation160_spill] sm:$0xff] }
 0xf80   :  { %v3479_v55 = vadd.f32 %v3448_v51, %v3346_v50  ;;  %v3480_v35 = vadd.f32 %v3449_v2, %v3347_v9  ;;  %v8382_v28 = vpop.permute.xlu0 %4142  ;;  %v3730_v24 = vpop.permute.xlu1 %3729  ;;  %v9475_v9 = vld [vmem:[#allocation146_spill] sm:$0xff]  ;;  %v3677_v16 = vmul.f32 %v9476_v33, %v8243_v47  ;;  %v9481_v33 = vld [vmem:[#allocation167_spill] sm:$0xff] }
 0xf81   :  { %v3754_v50 = vsel %vm3745_vm14, %v9474_v49, %v3730_v24  ;;  %v3755_v12 = vsel %vm3745_vm14, %v3730_v24, %v9475_v9  ;;  %v9479_v24 = vld [vmem:[#allocation178_spill] sm:$0xff] }
 0xf82   :  { %v3643_v45 = vadd.f32 %v3611_v11, %v3479_v55  ;;  %v3644_v8 = vadd.f32 %v3612_v15, %v3480_v35  ;;  %3304 = vrot.lane.b32.xlu1 %v3239_v60, %s5460_s26  ;;  %v3897_v55 = vsel %vm3888_vm15, %v9477_v40, %v8267_v29  ;;  %v9478_v35 = vld [vmem:[#allocation162_spill] sm:$0xff]  ;;  %v3963_v40 = vmul.f32 %v9481_v33, %v8243_v47 }
 0xf83   :  { %v3898_v60 = vsel %vm3888_vm15, %v8267_v29, %v9478_v35  ;;  %v9482_v29 = vld [vmem:[#allocation189_spill] sm:$0xff]  ;;  %v9485_v35 = vld [vmem:[#allocation20_spill] sm:$0xff] }
 0xf84   :  { %v3786_v51 = vadd.f32 %v3754_v50, %v3643_v45  ;;  %v3787_v42 = vadd.f32 %v3755_v12, %v3644_v8  ;;  %v8397_v2 = vpop.permute.xlu0 %4428  ;;  %v4016_v14 = vpop.permute.xlu1 %4015  ;;  %v9480_v45 = vld [vmem:[#allocation180_spill] sm:$0xff] }
 0xf85   :  { %v4040_v15 = vsel %vm4031_vm6, %v9479_v24, %v4016_v14  ;;  %v4041_v8 = vsel %vm4031_vm6, %v4016_v14, %v9480_v45  ;;  %v9486_v45 = vld [vmem:[#allocation202_spill] sm:$0xff] }
 0xf86   :  { %v3929_v11 = vadd.f32 %v3897_v55, %v3786_v51  ;;  %v3930_v20 = vadd.f32 %v3898_v60, %v3787_v42  ;;  %3741 = vrot.lane.b32.xlu1 %v3677_v16, %s5477_s11  ;;  %v4183_v51 = vsel %vm4174_vm7, %v9482_v29, %v8277_v46  ;;  %v9483_v42 = vld [vmem:[#allocation190_spill] sm:$0xff]  ;;  %v2601_v60 = vsel %vm122_vm0, %v8307_v48, %v9485_v35  ;;  %v9488_v29 = vld [vmem:[#allocation195_spill] sm:$0xff] }
 0xf87   :  { %v4184_v16 = vsel %vm4174_vm7, %v8277_v46, %v9483_v42  ;;  %v9484_v55 = vld [vmem:[#allocation18_spill] sm:$0xff]  ;;  %v4249_v42 = vmul.f32 %v9488_v29, %v8243_v47  ;;  %v4646_v29 = vsel %vm4645_vm10, %v8063_v0, 0.0 }
 0xf88   :  { %v4072_v49 = vadd.f32 %v4040_v15, %v3929_v11  ;;  %v4073_v50 = vadd.f32 %v4041_v8, %v3930_v20  ;;  %v8412_v9 = vpop.permute.xlu0 %2730  ;;  %v4302_v12 = vpop.permute.xlu1 %4301  ;;  %v2600_v14 = vsel %vm122_vm0, %v9484_v55, %v8307_v48  ;;  %v8429_v11 = vmul.f32 0.0, %v7885_v17  ;;  %v9487_v8 = vld [vmem:[#allocation204_spill] sm:$0xff] }
 0xf89   :  { %v2483_v20 = vmul.f32 %v7885_v17, %v7906_v13  ;;  %v4326_v46 = vsel %vm4317_vm8, %v9486_v45, %v4302_v12  ;;  %v4327_v33 = vsel %vm4317_vm8, %v4302_v12, %v9487_v8 }
 0xf8a   :  { %v4215_v24 = vadd.f32 %v4183_v51, %v4072_v49  ;;  %v4216_v15 = vadd.f32 %v4184_v16, %v4073_v50  ;;  %4027 = vrot.lane.b32.xlu1 %v3963_v40, %s5481_s13  ;;  %v2630_v48 = vadd.f32 %v2600_v14, %v8429_v11  ;;  %v9490_v50 = vld [vmem:[#allocation33_spill] sm:$0xff]  ;;  %v9491_v51 = vld [vmem:[#allocation35_spill] sm:$0xff]  ;;  %v9492_v14 = vld [vmem:[#allocation48_spill] sm:$0xff] }
 0xf8b   :  { %v2631_v55 = vadd.f32 %v2601_v60, %v2483_v20  ;;  %v2884_v60 = vsel %vm208_vm2, %v9492_v14, %v8316_v54  ;;  %v9493_v20 = vld [vmem:[#allocation50_spill] sm:$0xff] }
 0xf8c   :  { %v8441_v35 = vadd.f32 %v4326_v46, %v4215_v24  ;;  %v8443_v26 = vadd.f32 %v4327_v33, %v4216_v15  ;;  %v8445_v13 = vpop.permute.xlu0 %3014  ;;  %v2709_v49 = vpop.permute.xlu1 %2708  ;;  %v2885_v24 = vsel %vm208_vm2, %v8316_v54, %v9493_v20  ;;  %v9496_v54 = vld [vmem:[#allocation78_spill] sm:$0xff]  ;;  %v9498_v20 = vld [vmem:[#allocation219_spill] sm:$0xff] }
 0xf8d   :  { %v2742_v40 = vsel %vm166_vm1, %v9490_v50, %v2709_v49  ;;  %v2743_v16 = vsel %vm166_vm1, %v2709_v49, %v9491_v51  ;;  %v3168_v51 = vsel %vm306_vm4, %v9496_v54, %v8337_v34  ;;  %v9502_v54 = vld [vmem:[#allocation112_spill] sm:$0xff] }
 0xf8e   :  { %9489 = vst [vmem:[#allocation40_spill] sm:$0xff] %v8441_v35  ;;  %v2772_v12 = vadd.f32 %v2742_v40, %v2630_v48  ;;  %v2773_v45 = vadd.f32 %v2743_v16, %v2631_v55  ;;  %4313 = vrot.lane.b32.xlu1 %v4249_v42, %s5485_s3  ;;  %v9494_v48 = vld [vmem:[#allocation63_spill] sm:$0xff]  ;;  %v9495_v42 = vld [vmem:[#allocation65_spill] sm:$0xff]  ;;  %v9497_v16 = vld [vmem:[#allocation80_spill] sm:$0xff] }
 0xf90   :  { %v8458_v15 = vpop.permute.xlu0 %3298  ;;  %v2914_v46 = vadd.f32 %v2884_v60, %v2772_v12  ;;  %v2915_v8 = vadd.f32 %v2885_v24, %v2773_v45  ;;  %v2993_v33 = vpop.permute.xlu1 %2992  ;;  %v3169_v12 = vsel %vm306_vm4, %v8337_v34, %v9497_v16  ;;  %v4705_v24 = vsel %vm4634_vm11, %v9498_v20, 0.0 }
 0xf91   :  { %v3026_v55 = vsel %vm262_vm3, %v9494_v48, %v2993_v33  ;;  %v3027_v49 = vsel %vm262_vm3, %v2993_v33, %v9495_v42  ;;  %4647 = vadd.xlane.f32.xlu0 %v4646_v29  ;;  %v9499_v33 = vld [vmem:[#allocation93_spill] sm:$0xff]  ;;  %v4771_v34 = vsel %vm4634_vm11, %v8297_v6, 0.0 }
 0xf92   :  { %v3056_v50 = vadd.f32 %v3026_v55, %v2914_v46  ;;  %v3057_v40 = vadd.f32 %v3027_v49, %v2915_v8  ;;  %v9500_v8 = vld [vmem:[#allocation95_spill] sm:$0xff] }
 0xf94   :  { %v8472_v45 = vpop.permute.xlu0 %3735  ;;  %v3198_v0 = vadd.f32 %v3168_v51, %v3056_v50  ;;  %v3199_v14 = vadd.f32 %v3169_v12, %v3057_v40  ;;  %v3277_v60 = vpop.permute.xlu1 %3276  ;;  %v9501_v50 = vld [vmem:[#allocation110_spill] sm:$0xff] }
 0xf95   :  { %v3310_v46 = vsel %vm350_vm5, %v9499_v33, %v3277_v60  ;;  %v3311_v29 = vsel %vm350_vm5, %v3277_v60, %v9500_v8  ;;  %4706 = vadd.xlane.f32.xlu0 %v4705_v24  ;;  %v9503_v60 = vld [vmem:[#allocation124_spill] sm:$0xff] }
 0xf96   :  { %v3340_v48 = vadd.f32 %v3310_v46, %v3198_v0  ;;  %v3341_v55 = vadd.f32 %v3311_v29, %v3199_v14  ;;  %v3606_v0 = vsel %vm1906_vm12, %v9503_v60, %v8352_v7  ;;  %v9504_v14 = vld [vmem:[#allocation126_spill] sm:$0xff]  ;;  %v9505_v8 = vld [vmem:[#allocation140_spill] sm:$0xff] }
 0xf97   :  { %v3607_v6 = vsel %vm1906_vm12, %v8352_v7, %v9504_v14  ;;  %v9509_v14 = vld [vmem:[#allocation174_spill] sm:$0xff] }
 0xf98   :  { %v8482_v42 = vpop.permute.xlu0 %4021  ;;  %v3413_v49 = vpop.permute.xlu1 %3412 }
 0xf99   :  { %v3444_v40 = vsel %vm3440_vm13, %v9501_v50, %v3413_v49  ;;  %v3445_v51 = vsel %vm3440_vm13, %v3413_v49, %v9502_v54  ;;  %4772 = vadd.xlane.f32.xlu0 %v4771_v34  ;;  %v9506_v49 = vld [vmem:[#allocation142_spill] sm:$0xff]  ;;  %v9507_v50 = vld [vmem:[#allocation156_spill] sm:$0xff] }
 0xf9a   :  { %v3473_v16 = vadd.f32 %v3444_v40, %v3340_v48  ;;  %v3474_v12 = vadd.f32 %v3445_v51, %v3341_v55  ;;  %v3892_v40 = vsel %vm3888_vm15, %v9507_v50, %v8367_v4  ;;  %v9508_v54 = vld [vmem:[#allocation158_spill] sm:$0xff] }
 0xf9b   :  { %v3893_v7 = vsel %vm3888_vm15, %v8367_v4, %v9508_v54  ;;  %v9512_v4 = vld [vmem:[#allocation187_spill] sm:$0xff] }
 0xf9c   :  { %v8494_v20 = vpop.permute.xlu0 %4307  ;;  %v3637_v24 = vadd.f32 %v3606_v0, %v3473_v16  ;;  %v3638_v33 = vadd.f32 %v3607_v6, %v3474_v12  ;;  %v3714_v46 = vpop.permute.xlu1 %3713  ;;  %v9513_v54 = vld [vmem:[#allocation199_spill] sm:$0xff] }
 0xf9d   :  { %v3749_v29 = vsel %vm3745_vm14, %v9505_v8, %v3714_v46  ;;  %v3750_v48 = vsel %vm3745_vm14, %v3714_v46, %v9506_v49  ;;  %v9510_v46 = vld [vmem:[#allocation176_spill] sm:$0xff] }
 0xf9e   :  { %v3780_v55 = vadd.f32 %v3749_v29, %v3637_v24  ;;  %v3781_v34 = vadd.f32 %v3750_v48, %v3638_v33  ;;  %v9511_v29 = vld [vmem:[#allocation185_spill] sm:$0xff]  ;;  %v4179_v48 = vsel %vm4174_vm7, %v8382_v28, %v9512_v4 }
 0xf9f   :  { %v4178_v49 = vsel %vm4174_vm7, %v9511_v29, %v8382_v28 }
 0xfa0   :  { %v4835_v51 = vpop.permute.xlu0 %4834  ;;  %v3923_v16 = vadd.f32 %v3892_v40, %v3780_v55  ;;  %v3924_v12 = vadd.f32 %v3893_v7, %v3781_v34  ;;  %v4000_v60 = vpop.permute.xlu1 %3999 }
 0xfa1   :  { %v4837_v0 = vsel %vm4634_vm11, %v4835_v51, 0.0  ;;  %v4035_v6 = vsel %vm4031_vm6, %v9509_v14, %v4000_v60  ;;  %v4036_v24 = vsel %vm4031_vm6, %v4000_v60, %v9510_v46  ;;  %v9514_v51 = vld [vmem:[#allocation201_spill] sm:$0xff] }
 0xfa2   :  { %v4066_v33 = vadd.f32 %v4035_v6, %v3923_v16  ;;  %v4067_v8 = vadd.f32 %v4036_v24, %v3924_v12  ;;  %4838 = vadd.xlane.f32.xlu0 %v4837_v0  ;;  %v9515_v0 = vld [vmem:[#allocation8_spill] sm:$0xff] }
 0xfa3   :  { %v4464_v14 = vsel %vm4460_vm9, %v9515_v0, %v8397_v2  ;;  %v9516_v6 = vld [vmem:[#allocation44_spill] sm:$0xff] }
 0xfa4   :  { %v8517_v55 = vpop.permute.xlu0 %2714  ;;  %v4209_v34 = vadd.f32 %v4178_v49, %v4066_v33  ;;  %v4210_v50 = vadd.f32 %v4179_v48, %v4067_v8  ;;  %v4286_v40 = vpop.permute.xlu1 %4285  ;;  %v4465_v28 = vsel %vm4460_vm9, %v8397_v2, %v9516_v6  ;;  %v2491_v49 = vmul.f32 %v9427_v27, %v7979_v63  ;;  %v9517_v48 = vld [vmem:[#allocation27_spill] sm:$0xff] }
 0xfa5   :  { %v4321_v7 = vsel %vm4317_vm8, %v9513_v54, %v4286_v40  ;;  %v4322_v16 = vsel %vm4317_vm8, %v4286_v40, %v9514_v51  ;;  %v9521_v6 = vld [vmem:[#allocation19_spill] sm:$0xff] }
 0xfa6   :  { %v4352_v12 = vadd.f32 %v4321_v7, %v4209_v34  ;;  %v4353_v60 = vadd.f32 %v4322_v16, %v4210_v50  ;;  %v9518_v50 = vld [vmem:[#allocation28_spill] sm:$0xff]  ;;  %v9519_v7 = vld [vmem:[#allocation42_spill] sm:$0xff]  ;;  %v9520_v16 = vld [vmem:[#allocation43_spill] sm:$0xff] }
 0xfa7   :  { %v2749_v51 = vsel %vm166_vm1, %v9519_v7, %v8412_v9  ;;  %v9525_v7 = vld [vmem:[#allocation103_spill] sm:$0xff] }
 0xfa8   :  { %v8529_v46 = vadd.f32 %v4464_v14, %v4352_v12  ;;  %v8531_v24 = vadd.f32 %v4465_v28, %v4353_v60  ;;  %v8533_v33 = vpop.permute.xlu0 %2998  ;;  %v4778_v8 = vpop.permute.xlu1 %4777  ;;  %v2750_v12 = vsel %vm166_vm1, %v8412_v9, %v9520_v16  ;;  %v2599_v28 = vsel %vm122_vm0, %v8249_v36, %v9521_v6 }
 0xfa9   :  { %v2481_v9 = vmul.f32 %v7885_v17, %v9525_v7 }
 0xfac   :  { %v8535_v29 = vpop.permute.xlu0 %3282  ;;  %v2589_v4 = vpop.permute.xlu1 %2588 }
 0xfad   :  { %v2607_v34 = vsel %vm122_vm0, %v9517_v48, %v2589_v4  ;;  %v2608_v40 = vsel %vm122_vm0, %v2589_v4, %v9518_v50  ;;  %v9522_v4 = vld [vmem:[#allocation57_spill] sm:$0xff]  ;;  %v9523_v48 = vld [vmem:[#allocation58_spill] sm:$0xff] }
 0xfae   :  { %v2638_v2 = vadd.f32 %v2607_v34, %v8329_v43  ;;  %v2639_v54 = vadd.f32 %v2608_v40, %v2491_v49  ;;  %v9524_v50 = vld [vmem:[#allocation105_spill] sm:$0xff] }
 0xfaf   :  { %v4635_v40 = vsel %vm4634_vm11, %v9524_v50, 0.0  ;;  %v9528_v50 = vld [vmem:[#allocation87_spill] sm:$0xff] }
 0xfb0   :  { %v8550_v60 = vpop.permute.xlu0 %3418  ;;  %v2780_v63 = vadd.f32 %v2749_v51, %v2638_v2  ;;  %v2781_v0 = vadd.f32 %v2750_v12, %v2639_v54  ;;  %v2873_v14 = vpop.permute.xlu1 %2872  ;;  %v9526_v54 = vld [vmem:[#allocation72_spill] sm:$0xff]  ;;  %v9527_v12 = vld [vmem:[#allocation73_spill] sm:$0xff] }
 0xfb1   :  { %v2891_v49 = vsel %vm208_vm2, %v9522_v4, %v2873_v14  ;;  %v2892_v34 = vsel %vm208_vm2, %v2873_v14, %v9523_v48  ;;  %v3033_v51 = vsel %vm262_vm3, %v9526_v54, %v8445_v13  ;;  %v3034_v6 = vsel %vm262_vm3, %v8445_v13, %v9527_v12 }
 0xfb2   :  { %v2922_v16 = vadd.f32 %v2891_v49, %v2780_v63  ;;  %v2923_v2 = vadd.f32 %v2892_v34, %v2781_v0  ;;  %4636 = vadd.xlane.f32.xlu1 %v4635_v40  ;;  %v2629_v4 = vadd.f32 %v2599_v28, %v2481_v9  ;;  %v9529_v63 = vld [vmem:[#allocation88_spill] sm:$0xff]  ;;  %v4714_v49 = vsel %vm4645_vm10, %v8309_v31, 0.0  ;;  %v9530_v28 = vld [vmem:[#allocation34_spill] sm:$0xff] }
 0xfb3   :  { %v4392_v13 = vmul.f32 %v9456_v18, %v8243_v47  ;;  %v9531_v9 = vld [vmem:[#allocation16_spill] sm:$0xff] }
 0xfb4   :  { %v3064_v35 = vadd.f32 %v3033_v51, %v2922_v16  ;;  %v3065_v14 = vadd.f32 %v3034_v6, %v2923_v2  ;;  %v3157_v48 = vpop.permute.xlu1 %3156  ;;  %v8569_v5 = vpop.permute.xlu0 %3719  ;;  %v2741_v16 = vsel %vm166_vm1, %v9531_v9, %v9530_v28  ;;  %v9532_v2 = vld [vmem:[#allocation102_spill] sm:$0xff]  ;;  %v9533_v51 = vld [vmem:[#allocation104_spill] sm:$0xff]  ;;  %v4568_v28 = vld [vmem:[#allocation4] sm:$0x1] }
 0xfb5   :  { %v3175_v7 = vsel %vm306_vm4, %v9528_v50, %v3157_v48  ;;  %v3176_v0 = vsel %vm306_vm4, %v3157_v48, %v9529_v63  ;;  %v3317_v54 = vsel %vm350_vm5, %v9532_v2, %v8458_v15  ;;  %v3318_v12 = vsel %vm350_vm5, %v8458_v15, %v9533_v51  ;;  %v9534_v48 = vld [vmem:[#allocation49_spill] sm:$0xff] }
 0xfb6   :  { %v3206_v34 = vadd.f32 %v3175_v7, %v3064_v35  ;;  %v3207_v40 = vadd.f32 %v3176_v0, %v3065_v14  ;;  %4715 = vadd.xlane.f32.xlu1 %v4714_v49  ;;  %v2771_v6 = vadd.f32 %v2741_v16, %v2629_v4  ;;  %v2883_v18 = vsel %vm208_vm2, %v8259_v53, %v9534_v48  ;;  %v9535_v7 = vld [vmem:[#allocation116_spill] sm:$0xff]  ;;  %v9536_v0 = vld [vmem:[#allocation118_spill] sm:$0xff]  ;;  %v9537_v16 = vld [vmem:[#allocation129_spill] sm:$0xff] }
 0xfb7   :  { %v4780_v50 = vsel %vm4645_vm10, %v4778_v8, 0.0  ;;  %v9539_v48 = vld [vmem:[#allocation64_spill] sm:$0xff] }
 0xfb8   :  { %4456 = vrot.lane.b32.xlu0 %v4392_v13, %s5486_s4  ;;  %v3348_v31 = vadd.f32 %v3317_v54, %v3206_v34  ;;  %v3349_v35 = vadd.f32 %v3318_v12, %v3207_v40  ;;  %v3433_v14 = vpop.permute.xlu1 %3432  ;;  %v8597_v13 = vpop.permute.xlu0 %4005  ;;  %v2913_v34 = vadd.f32 %v2883_v18, %v2771_v6  ;;  %v9538_v54 = vld [vmem:[#allocation131_spill] sm:$0xff] }
 0xfb9   :  { %v3450_v63 = vsel %vm3440_vm13, %v9535_v7, %v3433_v14  ;;  %v3451_v49 = vsel %vm3440_vm13, %v3433_v14, %v9536_v0  ;;  %v9540_v7 = vld [vmem:[#allocation31_spill] sm:$0xff] }
 0xfba   :  { %v3481_v15 = vadd.f32 %v3450_v63, %v3348_v31  ;;  %v3482_v4 = vadd.f32 %v3451_v49, %v3349_v35  ;;  %4781 = vadd.xlane.f32.xlu1 %v4780_v50  ;;  %v3025_v14 = vsel %vm262_vm3, %v9540_v7, %v9539_v48  ;;  %v9541_v31 = vld [vmem:[#allocation145_spill] sm:$0xff]  ;;  %v9542_v50 = vld [vmem:[#allocation147_spill] sm:$0xff] }
 0xfbb   :  { %v3756_v35 = vsel %vm3745_vm14, %v9541_v31, %v8472_v45  ;;  %v3757_v6 = vsel %vm3745_vm14, %v8472_v45, %v9542_v50  ;;  %v3055_v18 = vadd.f32 %v3025_v14, %v2913_v34  ;;  %v9546_v45 = vld [vmem:[#allocation175_spill] sm:$0xff] }
 0xfbc   :  { %4571 = vperm.xlu0 %5397, %v4568_v28   ;;  %v3594_v40 = vpop.permute.xlu1 %3593  ;;  %v9543_v28 = vld [vmem:[#allocation79_spill] sm:$0xff]  ;;  %v4042_v34 = vsel %vm4031_vm6, %v9546_v45, %v8482_v42 }
 0xfbd   :  { %v3613_v2 = vsel %vm1906_vm12, %v9537_v16, %v3594_v40  ;;  %v3614_v8 = vsel %vm1906_vm12, %v3594_v40, %v9538_v54  ;;  %v9544_v40 = vld [vmem:[#allocation161_spill] sm:$0xff]  ;;  %v9552_v45 = vld [vmem:[#allocation203_spill] sm:$0xff] }
 0xfbe   :  { %v3645_v51 = vadd.f32 %v3613_v2, %v3481_v15  ;;  %v3646_v12 = vadd.f32 %v3614_v8, %v3482_v4  ;;  %v3167_v15 = vsel %vm306_vm4, %v8269_v32, %v9543_v28  ;;  %v8615_v4 = vpop.permute.xlu0 %4291  ;;  %v9545_v2 = vld [vmem:[#allocation163_spill] sm:$0xff] }
 0xfbf   :  { %v3197_v14 = vadd.f32 %v3167_v15, %v3055_v18  ;;  %v9553_v18 = vld [vmem:[#allocation205_spill] sm:$0xff] }
 0xfc0   :  { %v3788_v63 = vadd.f32 %v3756_v35, %v3645_v51  ;;  %v3789_v0 = vadd.f32 %v3757_v6, %v3646_v12  ;;  %v3879_v49 = vpop.permute.xlu1 %3878  ;;  %v9547_v51 = vld [vmem:[#allocation177_spill] sm:$0xff]  ;;  %v9548_v6 = vld [vmem:[#allocation192_spill] sm:$0xff]  ;;  %v4329_v15 = vsel %vm4317_vm8, %v8494_v20, %v9553_v18 }
 0xfc1   :  { %v3899_v16 = vsel %vm3888_vm15, %v9544_v40, %v3879_v49  ;;  %v3900_v54 = vsel %vm3888_vm15, %v3879_v49, %v9545_v2  ;;  %v4043_v12 = vsel %vm4031_vm6, %v8482_v42, %v9547_v51  ;;  %v9549_v40 = vld [vmem:[#allocation193_spill] sm:$0xff]  ;;  %v9551_v2 = vld [vmem:[#allocation46_spill] sm:$0xff]  ;;  %v4328_v42 = vsel %vm4317_vm8, %v9552_v45, %v8494_v20 }
 0xfc2   :  { %v3931_v8 = vadd.f32 %v3899_v16, %v3788_v63  ;;  %v3932_v48 = vadd.f32 %v3900_v54, %v3789_v0  ;;  %v9550_v16 = vld [vmem:[#allocation94_spill] sm:$0xff] }
 0xfc3   :  { %v3309_v54 = vsel %vm350_vm5, %v9551_v2, %v9550_v16 }
 0xfc4   :  { %v4074_v31 = vadd.f32 %v4042_v34, %v3931_v8  ;;  %v4075_v35 = vadd.f32 %v4043_v12, %v3932_v48  ;;  %v4165_v50 = vpop.permute.xlu1 %4164  ;;  %v8640_v8 = vpop.permute.xlu0 %4448  ;;  %v2485_v48 = vmul.f32 %v7885_v17, %v8059_v22  ;;  %v3339_v34 = vadd.f32 %v3309_v54, %v3197_v14  ;;  %v9557_v54 = vld [vmem:[#allocation51_spill] sm:$0xff] }
 0xfc5   :  { %v4185_v28 = vsel %vm4174_vm7, %v9548_v6, %v4165_v50  ;;  %v4186_v49 = vsel %vm4174_vm7, %v4165_v50, %v9549_v40  ;;  %v9555_v40 = vld [vmem:[#allocation107_spill] sm:$0xff] }
 0xfc6   :  { %v4217_v63 = vadd.f32 %v4185_v28, %v4074_v31  ;;  %v4218_v0 = vadd.f32 %v4186_v49, %v4075_v35  ;;  %v9554_v35 = vld [vmem:[#allocation21_spill] sm:$0xff]  ;;  %v3443_v20 = vsel %vm3440_vm13, %v8106_v44, %v9555_v40  ;;  %v9556_v49 = vld [vmem:[#allocation36_spill] sm:$0xff] }
 0xfc7   :  { %v2744_v17 = vsel %vm166_vm1, %v9556_v49, %v8517_v55  ;;  %v3472_v14 = vadd.f32 %v3443_v20, %v3339_v34 }
 0xfc8   :  { %v2573_v51 = vpop.permute.xlu1 %2572  ;;  %v8644_v12 = vadd.f32 %v4328_v42, %v4217_v63  ;;  %v8646_v31 = vadd.f32 %v4329_v15, %v4218_v0  ;;  %v8658_v16 = vpop.permute.xlu0 %4452  ;;  %v9558_v15 = vld [vmem:[#allocation121_spill] sm:$0xff] }
 0xfc9   :  { %v2602_v50 = vsel %vm122_vm0, %v9554_v35, %v2573_v51  ;;  %v2633_v6 = vadd.f32 %v2573_v51, %v2485_v48  ;;  %v3605_v48 = vsel %vm1906_vm12, %v8279_v3, %v9558_v15  ;;  %v9559_v51 = vld [vmem:[#allocation66_spill] sm:$0xff] }
 0xfca   :  { %v2632_v28 = vadd.f32 %v2602_v50, %v8429_v11  ;;  %v3028_v35 = vsel %vm262_vm3, %v9559_v51, %v8533_v33  ;;  %v3636_v34 = vadd.f32 %v3605_v48, %v3472_v14  ;;  %v9564_v51 = vld [vmem:[#allocation125_spill] sm:$0xff] }
 0xfcb   :  { %v2775_v22 = vadd.f32 %v8517_v55, %v2633_v6 }
 0xfcc   :  { %v2774_v63 = vadd.f32 %v2744_v17, %v2632_v28  ;;  %v2857_v0 = vpop.permute.xlu1 %2856  ;;  %v9560_v28 = vld [vmem:[#allocation81_spill] sm:$0xff] }
 0xfcd   :  { %v2886_v45 = vsel %vm208_vm2, %v9557_v54, %v2857_v0  ;;  %v2917_v42 = vadd.f32 %v2857_v0, %v2775_v22  ;;  %v9561_v17 = vld [vmem:[#allocation137_spill] sm:$0xff]  ;;  %v4435_v54 = vpop.permute.xlu0 %4434 }
 0xfce   :  { %v2916_v18 = vadd.f32 %v2886_v45, %v2774_v63  ;;  %v3748_v22 = vsel %vm3745_vm14, %v8125_v25, %v9561_v17  ;;  %v9562_v63 = vld [vmem:[#allocation96_spill] sm:$0xff] }
 0xfcf   :  { %v3059_v55 = vadd.f32 %v8533_v33, %v2917_v42  ;;  %v3312_v0 = vsel %vm350_vm5, %v9562_v63, %v8535_v29  ;;  %v3779_v33 = vadd.f32 %v3748_v22, %v3636_v34 }
 0xfd0   :  { %v3058_v50 = vadd.f32 %v3028_v35, %v2916_v18  ;;  %v3141_v6 = vpop.permute.xlu1 %3140  ;;  %v9563_v18 = vld [vmem:[#allocation109_spill] sm:$0xff] }
 0xfd1   :  { %v3170_v40 = vsel %vm306_vm4, %v9560_v28, %v3141_v6  ;;  %v3201_v20 = vadd.f32 %v3141_v6, %v3059_v55  ;;  %v3446_v15 = vsel %vm3440_vm13, %v9563_v18, %v8550_v60  ;;  %v9566_v28 = vld [vmem:[#allocation123_spill] sm:$0xff] }
 0xfd2   :  { %v3200_v49 = vadd.f32 %v3170_v40, %v3058_v50  ;;  %v9565_v50 = vld [vmem:[#allocation153_spill] sm:$0xff] }
 0xfd3   :  { %v3343_v45 = vadd.f32 %v8535_v29, %v3201_v20  ;;  %v3891_v6 = vsel %vm3888_vm15, %v8289_v30, %v9565_v50  ;;  %v9567_v20 = vld [vmem:[#allocation141_spill] sm:$0xff]  ;;  %v9572_v50 = vld [vmem:[#allocation171_spill] sm:$0xff] }
 0xfd4   :  { %v3342_v14 = vadd.f32 %v3312_v0, %v3200_v49  ;;  %v3578_v42 = vpop.permute.xlu1 %3577  ;;  %v3922_v40 = vadd.f32 %v3891_v6, %v3779_v33  ;;  %v3752_v49 = vsel %vm3745_vm14, %v8569_v5, %v9567_v20  ;;  %v2595_v0 = vpop.permute.xlu0 %2594  ;;  %v4038_v6 = vsel %vm4031_vm6, %v8597_v13, %v9572_v50 }
 0xfd5   :  { %v3476_v48 = vadd.f32 %v8550_v60, %v3343_v45  ;;  %v3609_v35 = vsel %vm1906_vm12, %v3578_v42, %v9564_v51  ;;  %v3608_v29 = vsel %vm1906_vm12, %v9566_v28, %v3578_v42  ;;  %v9568_v60 = vld [vmem:[#allocation139_spill] sm:$0xff]  ;;  %v9570_v51 = vld [vmem:[#allocation169_spill] sm:$0xff] }
 0xfd6   :  { %v3475_v55 = vadd.f32 %v3446_v15, %v3342_v14  ;;  %v3751_v63 = vsel %vm3745_vm14, %v9568_v60, %v8569_v5  ;;  %v9569_v14 = vld [vmem:[#allocation157_spill] sm:$0xff]  ;;  %v4034_v33 = vsel %vm4031_vm6, %v8144_v58, %v9570_v51  ;;  %v9571_v42 = vld [vmem:[#allocation155_spill] sm:$0xff]  ;;  %v9577_v51 = vld [vmem:[#allocation200_spill] sm:$0xff] }
 0xfd7   :  { %v3640_v34 = vadd.f32 %v3609_v35, %v3476_v48 }
 0xfd8   :  { %v3639_v17 = vadd.f32 %v3608_v29, %v3475_v55  ;;  %v3863_v22 = vpop.permute.xlu1 %3862  ;;  %v4065_v55 = vadd.f32 %v4034_v33, %v3922_v40  ;;  %v9573_v29 = vld [vmem:[#allocation170_spill] sm:$0xff]  ;;  %v2879_v40 = vpop.permute.xlu0 %2878  ;;  %v4324_v33 = vsel %vm4317_vm8, %v8615_v4, %v9577_v51 }
 0xfd9   :  { %v3783_v45 = vadd.f32 %v3752_v49, %v3640_v34  ;;  %v3895_v18 = vsel %vm3888_vm15, %v3863_v22, %v9569_v14  ;;  %v3894_v48 = vsel %vm3888_vm15, %v9571_v42, %v3863_v22  ;;  %v4037_v34 = vsel %vm4031_vm6, %v9573_v29, %v8597_v13 }
 0xfda   :  { %v3782_v15 = vadd.f32 %v3751_v63, %v3639_v17  ;;  %v9574_v17 = vld [vmem:[#allocation188_spill] sm:$0xff] }
 0xfdb   :  { %v3926_v35 = vadd.f32 %v3895_v18, %v3783_v45  ;;  %v9575_v63 = vld [vmem:[#allocation184_spill] sm:$0xff]  ;;  %v9576_v45 = vld [vmem:[#allocation186_spill] sm:$0xff] }
 0xfdc   :  { %v3925_v5 = vadd.f32 %v3894_v48, %v3782_v15  ;;  %v4149_v28 = vpop.permute.xlu1 %4148  ;;  %v4177_v22 = vsel %vm4174_vm7, %v8299_v38, %v9575_v63  ;;  %v9578_v48 = vld [vmem:[#allocation198_spill] sm:$0xff] }
 0xfdd   :  { %v4069_v20 = vadd.f32 %v4038_v6, %v3926_v35  ;;  %v4181_v60 = vsel %vm4174_vm7, %v4149_v28, %v9574_v17  ;;  %v4180_v14 = vsel %vm4174_vm7, %v9576_v45, %v4149_v28  ;;  %v4208_v15 = vadd.f32 %v4177_v22, %v4065_v55  ;;  %v9580_v28 = vld [vmem:[#allocation197_spill] sm:$0xff]  ;;  %v9582_v17 = vld [vmem:[#allocation14_spill] sm:$0xff] }
 0xfde   :  { %v4068_v49 = vadd.f32 %v4037_v34, %v3925_v5  ;;  %v4323_v35 = vsel %vm4317_vm8, %v9578_v48, %v8615_v4  ;;  %v9579_v5 = vld [vmem:[#allocation74_spill] sm:$0xff]  ;;  %v4320_v55 = vsel %vm4317_vm8, %v8163_v21, %v9580_v28 }
 0xfdf   :  { %v4212_v18 = vadd.f32 %v4181_v60, %v4069_v20  ;;  %v4467_v29 = vsel %vm4460_vm9, %v4435_v54, %v9579_v5  ;;  %v9581_v20 = vld [vmem:[#allocation165_spill] sm:$0xff]  ;;  %v4466_v60 = vsel %vm4460_vm9, %v9582_v17, %v4435_v54  ;;  %v4351_v63 = vadd.f32 %v4320_v55, %v4208_v15  ;;  %v9583_v54 = vld [vmem:[#allocation23_spill] sm:$0xff]  ;;  %v9587_v17 = vld [vmem:[#allocation12_spill] sm:$0xff] }
 0xfe0   :  { %v4211_v13 = vadd.f32 %v4180_v14, %v4068_v49  ;;  %v4844_v42 = vpop.permute.xlu1 %4843  ;;  %v4463_v49 = vsel %vm4460_vm9, %v8318_v19, %v9581_v20  ;;  %v3163_v14 = vpop.permute.xlu0 %3162  ;;  %v2603_v15 = vsel %vm122_vm0, %v9583_v54, %v8090_v1  ;;  %v9585_v20 = vld [vmem:[#allocation17_spill] sm:$0xff]  ;;  %v9591_v54 = vld [vmem:[#allocation71_spill] sm:$0xff] }
 0xfe1   :  { %v4355_v50 = vadd.f32 %v4324_v33, %v4212_v18  ;;  %v4846_v6 = vsel %vm4645_vm10, %v4844_v42, 0.0  ;;  %v4494_v51 = vadd.f32 %v4463_v49, %v4351_v63  ;;  %v9589_v63 = vld [vmem:[#allocation56_spill] sm:$0xff] }
 0xfe2   :  { %v4354_v34 = vadd.f32 %v4323_v35, %v4211_v13  ;;  %4847 = vadd.xlane.f32.xlu1 %v4846_v6  ;;  %v2493_v13 = vmul.f32 %v9427_v27, %v8243_v47  ;;  %v9584_v35 = vld [vmem:[#allocation26_spill] sm:$0xff] }
 0xfe3   :  { %v8732_v4 = vadd.f32 %v4467_v29, %v4355_v50  ;;  %v2609_v50 = vsel %vm122_vm0, %v9584_v35, %v2595_v0 }
 0xfe4   :  { %v4447_v22 = vpop.permute.xlu1 %4446  ;;  %v8734_v45 = vadd.f32 %v4466_v60, %v4354_v34  ;;  %v2641_v47 = vadd.f32 %v2595_v0, %v2493_v13  ;;  %v3439_v29 = vpop.permute.xlu0 %3438  ;;  %v2634_v34 = vadd.f32 %v2603_v15, %v8329_v43  ;;  %v2640_v28 = vadd.f32 %v2609_v50, %v8329_v43  ;;  %v9588_v60 = vld [vmem:[#allocation38_spill] sm:$0xff] }
 0xfe5   :  { %v4470_v18 = vsel %vm4460_vm9, %v8287_v56, %v4447_v22  ;;  %v2745_v43 = vsel %vm166_vm1, %v9588_v60, %v9587_v17  ;;  %v9598_v60 = vld [vmem:[#allocation68_spill] sm:$0xff] }
 0xfe6   :  { %v4502_v33 = vadd.f32 %v4470_v18, %v8443_v26 }
 0xfe8   :  { %v8741_v42 = vadd.f32 %v4502_v33, %v4494_v51  ;;  %v4451_v48 = vpop.permute.xlu1 %4450 }
 0xfe9   :  { %v4471_v6 = vsel %vm4460_vm9, %v8640_v8, %v4451_v48  ;;  %v4472_v5 = vsel %vm4460_vm9, %v4451_v48, %v8658_v16  ;;  %v2598_v16 = vsel %vm122_vm0, %v9585_v20, %v8249_v36  ;;  %v9590_v36 = vld [vmem:[#allocation53_spill] sm:$0xff]  ;;  %v3600_v48 = vpop.permute.xlu0 %3599 }
 0xfea   :  { %v4503_v26 = vadd.f32 %v4471_v6, %v8644_v12  ;;  %v4504_v27 = vadd.f32 %v4472_v5, %v8646_v31  ;;  %v9586_v12 = vld [vmem:[#allocation41_spill] sm:$0xff]  ;;  %v2628_v18 = vadd.f32 %v2598_v16, %v8429_v11  ;;  %v2887_v13 = vsel %vm208_vm2, %v9590_v36, %v8108_v52  ;;  %v9592_v6 = vld [vmem:[#allocation32_spill] sm:$0xff] }
 0xfeb   :  { %v2740_v5 = vsel %vm166_vm1, %v9592_v6, %v9531_v9  ;;  %v9595_v16 = vld [vmem:[#allocation101_spill] sm:$0xff] }
 0xfec   :  { %v8757_v1 = vadd.f32 %v4503_v26, %v8529_v46  ;;  %v8760_v55 = vadd.f32 %v4504_v27, %v8531_v24  ;;  %v2737_v8 = vpop.permute.xlu1 %2736  ;;  %v2893_v46 = vsel %vm208_vm2, %v9589_v63, %v2879_v40  ;;  %v2776_v24 = vadd.f32 %v2745_v43, %v2634_v34  ;;  %v9599_v43 = vld [vmem:[#allocation115_spill] sm:$0xff] }
 0xfed   :  { %v2751_v31 = vsel %vm166_vm1, %v9586_v12, %v2737_v8  ;;  %v2783_v0 = vadd.f32 %v2737_v8, %v2641_v47  ;;  %v2770_v34 = vadd.f32 %v2740_v5, %v2628_v18  ;;  %v9594_v8 = vld [vmem:[#allocation47_spill] sm:$0xff]  ;;  %v3452_v63 = vsel %vm3440_vm13, %v9599_v43, %v3439_v29  ;;  %v9600_v18 = vld [vmem:[#allocation134_spill] sm:$0xff] }
 0xfee   :  { %v2782_v49 = vadd.f32 %v2751_v31, %v2640_v28  ;;  %v2918_v47 = vadd.f32 %v2887_v13, %v2776_v24  ;;  %v2882_v20 = vsel %vm208_vm2, %v9594_v8, %v8259_v53  ;;  %v9601_v13 = vld [vmem:[#allocation83_spill] sm:$0xff]  ;;  %v9608_v8 = vld [vmem:[#allocation166_spill] sm:$0xff] }
 0xfef   :  { %v2925_v22 = vadd.f32 %v2879_v40, %v2783_v0  ;;  %v9593_v40 = vld [vmem:[#allocation86_spill] sm:$0xff]  ;;  %v9596_v0 = vld [vmem:[#allocation119_spill] sm:$0xff]  ;;  %v2912_v24 = vadd.f32 %v2882_v20, %v2770_v34  ;;  %v9607_v34 = vld [vmem:[#allocation148_spill] sm:$0xff] }
 0xff0   :  { %v2924_v51 = vadd.f32 %v2893_v46, %v2782_v49  ;;  %v3021_v33 = vpop.permute.xlu1 %3020  ;;  %v3177_v26 = vsel %vm306_vm4, %v9593_v40, %v3163_v14  ;;  %v9597_v49 = vld [vmem:[#allocation15_spill] sm:$0xff]  ;;  %v3885_v46 = vpop.permute.xlu0 %3884  ;;  %v9605_v40 = vld [vmem:[#allocation30_spill] sm:$0xff] }
 0xff1   :  { %v3035_v15 = vsel %vm262_vm3, %v9591_v54, %v3021_v33  ;;  %v3067_v35 = vadd.f32 %v3021_v33, %v2925_v22  ;;  %v2596_v17 = vsel %vm122_vm0, %v9597_v49, %v9596_v0  ;;  %v3171_v54 = vsel %vm306_vm4, %v9601_v13, %v8127_v37  ;;  %v9604_v5 = vld [vmem:[#allocation151_spill] sm:$0xff]  ;;  %v9616_v13 = vld [vmem:[#allocation194_spill] sm:$0xff] }
 0xff2   :  { %v3066_v50 = vadd.f32 %v3035_v15, %v2924_v51  ;;  %v3616_v51 = vsel %vm1906_vm12, %v3600_v48, %v9600_v18  ;;  %v3902_v20 = vsel %vm3888_vm15, %v3885_v46, %v9608_v8  ;;  %vm4507_vm0 = vcmask 1048520  }
 0xff3   :  { %4454 = vrot.lane.b32.xlu1 %v7709_v23, %s5486_s4  ;;  %v3209_v27 = vadd.f32 %v3163_v14, %v3067_v35  ;;  %v3029_v14 = vsel %vm262_vm3, %v9598_v60, %v7991_v41  ;;  %v9602_v41 = vld [vmem:[#allocation132_spill] sm:$0xff] }
 0xff4   :  { %v3208_v52 = vadd.f32 %v3177_v26, %v3066_v50  ;;  %v3305_v28 = vpop.permute.xlu1 %3304  ;;  %v3060_v53 = vadd.f32 %v3029_v14, %v2918_v47  ;;  %v3615_v15 = vsel %vm1906_vm12, %v9602_v41, %v3600_v48  ;;  %v9603_v50 = vld [vmem:[#allocation150_spill] sm:$0xff]  ;;  %v2738_v26 = vsel %vm166_vm1, %v9605_v40, %v9604_v5  ;;  %v4171_v49 = vpop.permute.xlu0 %4170 }
 0xff5   :  { %v3319_v12 = vsel %vm350_vm5, %v9595_v16, %v3305_v28  ;;  %v3351_v31 = vadd.f32 %v3305_v28, %v3209_v27  ;;  %v9606_v27 = vld [vmem:[#allocation62_spill] sm:$0xff]  ;;  %vm4652_vm1 = vcmask 7168  }
 0xff6   :  { %v3350_v9 = vadd.f32 %v3319_v12, %v3208_v52  ;;  %v3024_v47 = vsel %vm262_vm3, %v9606_v27, %v9540_v7  ;;  %v3202_v48 = vadd.f32 %v3171_v54, %v3060_v53  ;;  %v9609_v12 = vld [vmem:[#allocation77_spill] sm:$0xff]  ;;  %v4188_v54 = vsel %vm4174_vm7, %v4171_v49, %v9616_v13  ;;  %v9620_v27 = vld [vmem:[#allocation60_spill] sm:$0xff]  ;;  %v9635_v13 = vld [vmem:[#allocation183_spill] sm:$0xff] }
 0xff7   :  { %v3484_v22 = vadd.f32 %v3439_v29, %v3351_v31  ;;  %4458 = vrot.lane.b32.xlu1 %v7709_v23, %s5486_s4  ;;  %v2626_v23 = vadd.f32 %v2596_v17, %v8429_v11  ;;  %v3054_v28 = vadd.f32 %v3024_v47, %v2912_v24  ;;  %v3166_v31 = vsel %vm306_vm4, %v9609_v12, %v8269_v32  ;;  %v9611_v17 = vld [vmem:[#allocation182_spill] sm:$0xff] }
 0xff8   :  { %v3483_v33 = vadd.f32 %v3452_v63, %v3350_v9  ;;  %v3742_v36 = vpop.permute.xlu1 %3741  ;;  %v9610_v9 = vld [vmem:[#allocation164_spill] sm:$0xff]  ;;  %v9612_v63 = vld [vmem:[#allocation10_spill] sm:$0xff] }
 0xff9   :  { %v3648_v35 = vadd.f32 %v3616_v51, %v3484_v22  ;;  %v3759_v29 = vsel %vm3745_vm14, %v3742_v36, %v9603_v50  ;;  %v3758_v37 = vsel %vm3745_vm14, %v9607_v34, %v3742_v36  ;;  %v3901_v0 = vsel %vm3888_vm15, %v9610_v9, %v3885_v46  ;;  %v9613_v22 = vld [vmem:[#allocation45_spill] sm:$0xff]  ;;  %v9614_v24 = vld [vmem:[#allocation98_spill] sm:$0xff] }
 0xffa   :  { %v3647_v6 = vadd.f32 %v3615_v15, %v3483_v33  ;;  %v2768_v14 = vadd.f32 %v2738_v26, %v2626_v23  ;;  %v2880_v53 = vsel %vm208_vm2, %v9613_v22, %v9612_v63  ;;  %v3313_v18 = vsel %vm350_vm5, %v9614_v24, %v8001_v61  ;;  %v9615_v51 = vld [vmem:[#allocation181_spill] sm:$0xff]  ;;  %v9617_v15 = vld [vmem:[#allocation191_spill] sm:$0xff]  ;;  %v9618_v61 = vld [vmem:[#allocation92_spill] sm:$0xff] }
 0xffb   :  { %v3791_v52 = vadd.f32 %v3759_v29, %v3648_v35  ;;  %v3344_v46 = vadd.f32 %v3313_v18, %v3202_v48  ;;  %v3196_v36 = vadd.f32 %v3166_v31, %v3054_v28  ;;  %v4187_v35 = vsel %vm4174_vm7, %v9617_v15, %v4171_v49  ;;  %v9619_v26 = vld [vmem:[#allocation209_spill] sm:$0xff]  ;;  %v9623_v28 = vld [vmem:[#allocation106_spill] sm:$0xff] }
 0xffc   :  { %v3790_v16 = vadd.f32 %v3758_v37, %v3647_v6  ;;  %v4028_v11 = vpop.permute.xlu1 %4027  ;;  %v2910_v29 = vadd.f32 %v2880_v53, %v2768_v14  ;;  %v3308_v6 = vsel %vm350_vm5, %v9618_v61, %v9551_v2  ;;  %v3022_v47 = vsel %vm262_vm3, %v9620_v27, %v9619_v26  ;;  %v9621_v37 = vld [vmem:[#allocation210_spill] sm:$0xff]  ;;  %v9630_v53 = vld [vmem:[#allocation212_spill] sm:$0xff]  ;;  %v9637_v15 = vld [vmem:[#allocation217_spill] sm:$0xff] }
 0xffd   :  { %v3934_v7 = vadd.f32 %v3902_v20, %v3791_v52  ;;  %v4045_v60 = vsel %vm4031_vm6, %v4028_v11, %v9611_v17  ;;  %v4044_v32 = vsel %vm4031_vm6, %v9615_v51, %v4028_v11  ;;  %v3477_v5 = vadd.f32 %v8146_v10, %v3344_v46  ;;  %v9622_v52 = vld [vmem:[#allocation75_spill] sm:$0xff]  ;;  %v9624_v10 = vld [vmem:[#allocation120_spill] sm:$0xff]  ;;  %v9625_v9 = vld [vmem:[#allocation90_spill] sm:$0xff] }
 0xffe   :  { %v3933_v43 = vadd.f32 %v3901_v0, %v3790_v16  ;;  %v3338_v40 = vadd.f32 %v3308_v6, %v3196_v36  ;;  %v3052_v34 = vadd.f32 %v3022_v47, %v2910_v29  ;;  %v3164_v48 = vsel %vm306_vm4, %v9622_v52, %v9621_v37  ;;  %v9632_v51 = vld [vmem:[#allocation213_spill] sm:$0xff]  ;;  %v9634_v46 = vld [vmem:[#allocation214_spill] sm:$0xff] }
 0xfff   :  { %v4077_v33 = vadd.f32 %v4045_v60, %v3934_v7  ;;  %v3442_v8 = vsel %vm3440_vm13, %v9623_v28, %v8106_v44  ;;  %v3641_v20 = vadd.f32 %v8165_v59, %v3477_v5  ;;  %v3604_v11 = vsel %vm1906_vm12, %v9624_v10, %v8279_v3  ;;  %v9626_v7 = vld [vmem:[#allocation136_spill] sm:$0xff]  ;;  %v9627_v60 = vld [vmem:[#allocation211_spill] sm:$0xff]  ;;  %v9638_v61 = vld [vmem:[#allocation218_spill] sm:$0xff] }
0x1000   :  { %v4076_v41 = vadd.f32 %v4044_v32, %v3933_v43  ;;  %v3471_v16 = vadd.f32 %v3442_v8, %v3338_v40  ;;  %v3194_v2 = vadd.f32 %v3164_v48, %v3052_v34  ;;  %v3306_v0 = vsel %vm350_vm5, %v9625_v9, %v7970_v62  ;;  %v9628_v43 = vld [vmem:[#allocation152_spill] sm:$0xff]  ;;  %v9633_v32 = vld [vmem:[#allocation13_spill] sm:$0xff] }
0x1001   :  { %v8839_v50 = vadd.f32 %v4188_v54, %v4077_v33  ;;  %v3784_v12 = vadd.f32 %v8011_v57, %v3641_v20  ;;  %v3747_v44 = vsel %vm3745_vm14, %v9626_v7, %v8125_v25  ;;  %v3890_v3 = vsel %vm3888_vm15, %v9628_v43, %v8289_v30  ;;  %v9629_v57 = vld [vmem:[#allocation215_spill] sm:$0xff]  ;;  %v9631_v62 = vld [vmem:[#allocation168_spill] sm:$0xff]  ;;  %v9640_v40 = vld [vmem:[#allocation9_spill] sm:$0xff] }
0x1002   :  { %v8841_v23 = vadd.f32 %v4187_v35, %v4076_v41  ;;  %v3635_v31 = vadd.f32 %v3604_v11, %v3471_v16  ;;  %v3336_v49 = vadd.f32 %v3306_v0, %v3194_v2  ;;  %v4033_v18 = vsel %vm4031_vm6, %v9631_v62, %v8144_v58  ;;  %v9636_v54 = vld [vmem:[#allocation216_spill] sm:$0xff]  ;;  %v9641_v27 = vld [vmem:[#allocation133_spill] sm:$0xff] }
0x1003   :  { %v3927_v59 = vadd.f32 %v8187_v39, %v3784_v12  ;;  %v4176_v30 = vsel %vm4174_vm7, %v9635_v13, %v8299_v38  ;;  %v9639_v58 = vld [vmem:[#allocation196_spill] sm:$0xff]  ;;  %v4469_v26 = vsel %vm4460_vm9, %v9640_v40, %v8287_v56  ;;  %v4462_v47 = vsel %vm4460_vm9, %v9641_v27, %v8318_v19  ;;  %v9643_v37 = vld [vmem:[#allocation25_spill] sm:$0xff] }
0x1004   :  { %v3778_v17 = vadd.f32 %v3747_v44, %v3635_v31  ;;  %v3469_v14 = vadd.f32 %v9627_v60, %v3336_v49  ;;  %v4319_v5 = vsel %vm4317_vm8, %v9639_v58, %v8163_v21  ;;  %v9642_v38 = vld [vmem:[#allocation220_spill] sm:$0xff]  ;;  %v9645_v16 = vld [vmem:[#allocation221_spill] sm:$0xff]  ;;  %v4532_v43 = vrot.slane %v8741_v42, 4 }
0x1005   :  { %v4070_v63 = vadd.f32 %v9629_v57, %v3927_v59  ;;  %v9644_v28 = vld [vmem:[#allocation40_spill] sm:$0xff]  ;;  %v9646_v9 = vld [vmem:[#allocation61_spill] sm:$0xff]  ;;  %vm4592_vm2 = vcmask 56320  }
0x1006   :  { %v3921_v22 = vadd.f32 %v3890_v3, %v3778_v17  ;;  %v3633_v24 = vadd.f32 %v9630_v53, %v3469_v14  ;;  %v4501_v8 = vadd.f32 %v4469_v26, %v9644_v28  ;;  %v4518_v19 = vrot.slane %v9646_v9, 4  ;;  %v4626_v27 = vld [vmem:[%s9006_s7] sm:$0xff] }
0x1007   :  { %v4213_v39 = vadd.f32 %v9633_v32, %v4070_v63  ;;  %v4574_v3 = vlaneseq }
0x1008   :  { %v3776_v25 = vadd.f32 %v9632_v51, %v3633_v24  ;;  %v4064_v33 = vadd.f32 %v4033_v18, %v3921_v22  ;;  %v4519_v7 = vadd.f32 %v4518_v19, %v9646_v9  ;;  %v4533_v24 = vadd.f32 %v4532_v43, %v8741_v42 }
0x1009   :  { %v4356_v35 = vadd.f32 %v9637_v15, %v4213_v39  ;;  %v4575_v62 = vshrl.u32 %v4574_v3, 7 }
0x100a   :  { %v3919_v36 = vadd.f32 %v9634_v46, %v3776_v25  ;;  %v4207_v29 = vadd.f32 %v4176_v30, %v4064_v33  ;;  %v4520_v60 = vrot.slane %v4519_v7, 2  ;;  %v4534_v25 = vrot.slane %v4533_v24, 2 }
0x100b   :  { %v4499_v52 = vadd.f32 %v9643_v37, %v4356_v35  ;;  %v4576_v32 = vsub.s32 0, %v4575_v62 }
0x100c   :  { %v4062_v41 = vadd.f32 %v9636_v54, %v3919_v36  ;;  %v4350_v48 = vadd.f32 %v4319_v5, %v4207_v29  ;;  %v4521_v22 = vadd.f32 %v4520_v60, %v4519_v7  ;;  %v4535_v13 = vadd.f32 %v4534_v25, %v4533_v24  ;;  %v4314_v5 = vpop.permute.xlu1 %4313  ;;  %v9648_v24 = vld [vmem:[#allocation207_spill] sm:$0xff] }
0x100d   :  { %v4509_v10 = vsel %vm4507_vm0, %v4499_v52, 0.0  ;;  %v4539_v7 = vrot.slane %v8757_v1, 4  ;;  %v4331_v62 = vsel %vm4317_vm8, %v4314_v5, %v9648_v24 }
0x100e   :  { %v4205_v6 = vadd.f32 %v9638_v61, %v4062_v41  ;;  %v4493_v21 = vadd.f32 %v4462_v47, %v4350_v48  ;;  %v4522_v33 = vrot.slane %v4521_v22, 1  ;;  %v4536_v42 = vrot.slane %v4535_v13, 1 }
0x1010   :  { %v4348_v34 = vadd.f32 %v9642_v38, %v4205_v6  ;;  %v4524_v11 = vadd.f32 %v4501_v8, %v4493_v21  ;;  %v4523_v41 = vadd.f32 %v4522_v33, %v4521_v22  ;;  %v4537_v6 = vadd.f32 %v4536_v42, %v4535_v13  ;;  %v4627_v8 = vld [vmem:[%s9006_s7 + $0x8] sm:$0xff]  ;;  %s5490_s7 = smov [#allocation5]  }
0x1011   :  { %v4363_v33 = vadd.f32 %v4331_v62, %v8839_v50  ;;  %v4559_v42 = vsel %vm3440_vm13, %v8732_v4, 0.0  ;;  %s4903_s26 = sshll.u32 %s5490_s7, 4  ;;  %s4904_s26 = int_to_ptr.vmem [resolvable:$true] %s4903_s26 }
0x1012   :  { %v4491_v2 = vadd.f32 %v9645_v16, %v4348_v34  ;;  %v4525_v0 = vrot.slane %v4524_v11, 4  ;;  %s5429_s1 = scalar_lea.vmem %s4904_s26, 64  ;;  %p5434_p1 = scmp.lt.s32.totalorder %s4904_s26, %s4904_s26 }
0x1013   :  { %p5430_p0 = scmp.ne.s32.totalorder %s4904_s26, %s5429_s1  ;;  %p5435_p2 = scmp.lt.s32.totalorder %s5429_s1, %s5429_s1 }
0x1014   :  { %v4508_v56 = vsel %vm4507_vm0, %v4491_v2, 0.0  ;;  %v4526_v44 = vadd.f32 %v4525_v0, %v4524_v11 }
0x1015   :  { %v4510_v12 = vadd.f32 %v4509_v10, %v4508_v56  ;;  %p5436_p3 = por %p5435_p2, %p5434_p1 }
0x1016   :  { %v4527_v14 = vrot.slane %v4526_v44, 2 }
0x1017   :  { %v4511_v49 = vrot.slane %v4510_v12, 4  ;;  %p5437_p4 = pnand %p5436_p3, %p5430_p0 }
0x1018   :  { %v4528_v53 = vadd.f32 %v4527_v14, %v4526_v44  ;;  %v4540_v14 = vadd.f32 %v4539_v7, %v8757_v1 }
0x1019   :  { %v4512_v17 = vadd.f32 %v4511_v49, %v4510_v12 }
0x101a   :  { %v4529_v39 = vrot.slane %v4528_v53, 1  ;;  %v4541_v25 = vrot.slane %v4540_v14, 2 }
0x101b   :  { %v4513_v63 = vrot.slane %v4512_v17, 2 }
0x101c   :  { %v4530_v54 = vadd.f32 %v4529_v39, %v4528_v53  ;;  %v4542_v13 = vadd.f32 %v4541_v25, %v4540_v14 }
0x101d   :  { %v4514_v18 = vadd.f32 %v4513_v63, %v4512_v17 }
0x101e   :  { %v8898_v20 = vpop.xlane.xlu0 %4647 }
0x101f   :  { %v4515_v36 = vrot.slane %v4514_v18, 1  ;;  %v4650_v10 = vmul.f32 0.010416667, %v8898_v20 }
0x1021   :  { %v4516_v29 = vadd.f32 %v4515_v36, %v4514_v18  ;;  %v4665_v12 = vmul.f32 %v4650_v10, %v4627_v8 }
0x1022   :  { %v4707_v31 = vpop.xlane.xlu0 %4706 }
0x1023   :  { %v4708_v38 = vmul.f32 0.015625, %v4707_v31  ;;  %v4666_v49 = vsel %vm4652_vm1, %v4665_v12, 0.0 }
0x1025   :  { %v4718_v37 = vmul.f32 %v4708_v38, %v4626_v27 }
0x1026   :  { %v4773_v59 = vpop.xlane.xlu0 %4772 }
0x1027   :  { %v4719_v21 = vsel %vm4652_vm1, %v4718_v37, 0.0  ;;  %v4774_v31 = vmul.f32 0.015625, %v4773_v59  ;;  %v9647_v59 = vld [vmem:[#allocation206_spill] sm:$0xff] }
0x1028   :  { %v4330_v43 = vsel %vm4317_vm8, %v9647_v59, %v4314_v5 }
0x1029   :  { %v4784_v19 = vmul.f32 %v4774_v31, %v4626_v27  ;;  %v4362_v63 = vadd.f32 %v4330_v43, %v8841_v23 }
0x102b   :  { %v4785_v20 = vsel %vm4652_vm1, %v4784_v19, 0.0 }
0x102f   :  { %v4839_v57 = vpop.xlane.xlu0 %4838 }
0x1030   :  { %v4840_v0 = vmul.f32 0.015625, %v4839_v57  ;;  %v4546_v57 = vrot.slane %v8760_v55, 4 }
0x1032   :  { %v4850_v44 = vmul.f32 %v4840_v0, %v4626_v27  ;;  %v4547_v39 = vadd.f32 %v4546_v57, %v8760_v55  ;;  %v4543_v55 = vrot.slane %v4542_v13, 1 }
0x1033   :  { %v8905_v51 = vpop.permute.xlu0 %4456 }
0x1034   :  { %v4851_v53 = vsel %vm4652_vm1, %v4850_v44, 0.0 }
0x103b   :  { %v4572_v46 = vpop.permute.xlu0 %4571 }
0x103c   :  { %v8907_v30 = vrot.slane %v4572_v46, %v4576_v32 }
0x103e   :  { %v4580_v15 = vadd.f32 %v8907_v30, %v4530_v54  ;;  %v4579_v35 = vadd.f32 %v8907_v30, %v4523_v41  ;;  %v4578_v61 = vadd.f32 %v8907_v30, %v4516_v29  ;;  %v4581_v58 = vadd.f32 %v8907_v30, %v4537_v6 }
0x103f   :  { %v4637_v40 = vpop.xlane.xlu1 %4636 }
0x1040   :  { %4598 = vrot.lane.b32.xlu0 %v4580_v15, %s5489_s22  ;;  %4590 = vrot.lane.b32.xlu1 %v4579_v35, %s5489_s22  ;;  %v4639_v26 = vmul.f32 0.015625, %v4637_v40  ;;  %v4548_v15 = vrot.slane %v4547_v39, 2 }
0x1042   :  { %v4651_v34 = vmul.f32 %v4639_v26, %v4626_v27  ;;  %v4544_v26 = vadd.f32 %v4543_v55, %v4542_v13 }
0x1043   :  { %v4716_v47 = vpop.xlane.xlu1 %4715 }
0x1044   :  { %4588 = vrot.lane.b32.xlu1 %v4578_v61, %s5489_s22  ;;  %v4717_v52 = vmul.f32 0.010416667, %v4716_v47  ;;  %v4653_v48 = vsel %vm4652_vm1, %v4651_v34, 0.0  ;;  %v4582_v47 = vadd.f32 %v8907_v30, %v4544_v26 }
0x1046   :  { %v4731_v16 = vmul.f32 %v4717_v52, %v4627_v8 }
0x1047   :  { %v4782_v28 = vpop.xlane.xlu1 %4781 }
0x1048   :  { %4600 = vrot.lane.b32.xlu1 %v4581_v58, %s5489_s22  ;;  %v4783_v2 = vmul.f32 0.010416667, %v4782_v28  ;;  %v4732_v56 = vsel %vm4652_vm1, %v4731_v16, 0.0  ;;  %v4549_v58 = vadd.f32 %v4548_v15, %v4547_v39 }
0x104a   :  { %v4797_v11 = vmul.f32 %v4783_v2, %v4627_v8  ;;  %v4550_v27 = vrot.slane %v4549_v58, 1 }
0x104c   :  { %v4798_v9 = vsel %vm4652_vm1, %v4797_v11, 0.0  ;;  %v4551_v52 = vadd.f32 %v4550_v27, %v4549_v58 }
0x104e   :  { %v4583_v28 = vadd.f32 %v8907_v30, %v4551_v52 }
0x105f   :  { %4654 = vadd.xlane.f32.xlu0 %v4653_v48 }
0x1063   :  { %4720 = vadd.xlane.f32.xlu0 %v4719_v21 }
0x1067   :  { %4733 = vadd.xlane.f32.xlu0 %v4732_v56 }
0x106b   :  { %4799 = vadd.xlane.f32.xlu0 %v4798_v9 }
0x106c   :  { %4667 = vadd.xlane.f32.xlu1 %v4666_v49 }
0x106f   :  { %v4848_v17 = vpop.xlane.xlu1 %4847 }
0x1070   :  { %v4849_v60 = vmul.f32 0.010416667, %v4848_v17  ;;  %4786 = vadd.xlane.f32.xlu1 %v4785_v20 }
0x1072   :  { %v4863_v3 = vmul.f32 %v4849_v60, %v4627_v8 }
0x1073   :  { %v4455_v22 = vpop.permute.xlu1 %4454 }
0x1074   :  { %v4473_v18 = vsel %vm4460_vm9, %v4455_v22, %v8905_v51  ;;  %4852 = vadd.xlane.f32.xlu1 %v4851_v53  ;;  %v4864_v1 = vsel %vm4652_vm1, %v4863_v3, 0.0 }
0x1075   :  { %v4505_v32 = vadd.f32 %v4473_v18, %v4362_v63  ;;  %4865 = vadd.xlane.f32.xlu0 %v4864_v1 }
0x1077   :  { %v4552_v23 = vadd.f32 %v4505_v32, %v8734_v45  ;;  %v4459_v46 = vpop.permute.xlu1 %4458 }
0x1078   :  { %v4474_v36 = vsel %vm4460_vm9, %v8905_v51, %v4459_v46 }
0x1079   :  { %v4553_v54 = vrot.slane %v4552_v23, 4  ;;  %v4506_v41 = vadd.f32 %v4474_v36, %v4363_v33 }
0x107b   :  { %v4554_v35 = vadd.f32 %v4553_v54, %v4552_v23  ;;  %v4560_v29 = vsel %vm3440_vm13, %v4506_v41, 0.0 }
0x107c   :  { %v4561_v61 = vadd.f32 %v4560_v29, %v4559_v42 }
0x107d   :  { %v4555_v6 = vrot.slane %v4554_v35, 2 }
0x107e   :  { %v4562_v50 = vrot.slane %v4561_v61, 4 }
0x107f   :  { %v4556_v45 = vadd.f32 %v4555_v6, %v4554_v35 }
0x1080   :  { %v4563_v5 = vadd.f32 %v4562_v50, %v4561_v61 }
0x1081   :  { %v4557_v40 = vrot.slane %v4556_v45, 1 }
0x1082   :  { %v4564_v51 = vrot.slane %v4563_v5, 2 }
0x1083   :  { %v4558_v38 = vadd.f32 %v4557_v40, %v4556_v45 }
0x1084   :  { %v4565_v34 = vadd.f32 %v4564_v51, %v4563_v5 }
0x1085   :  { %4608 = vrot.lane.b32.xlu1 %v4582_v47, %s5489_s22  ;;  %v4584_v37 = vadd.f32 %v8907_v30, %v4558_v38 }
0x1086   :  { %v4566_v4 = vrot.slane %v4565_v34, 1 }
0x1088   :  { %v4567_v48 = vadd.f32 %v4566_v4, %v4565_v34 }
0x1089   :  { %4618 = vrot.lane.b32.xlu1 %v4584_v37, %s5489_s22 }
0x108a   :  { %v4585_v8 = vadd.f32 %v8907_v30, %v4567_v48 }
0x108b   :  { %4610 = vrot.lane.b32.xlu0 %v4583_v28, %s5489_s22 }
0x108d   :  { %4620 = vrot.lane.b32.xlu1 %v4585_v8, %s5489_s22 }
0x10b2   :  { %v4591_v16 = vpop.permute.xlu1 %4590  ;;  %v4599_v10 = vpop.permute.xlu0 %4598 }
0x10b6   :  { %v4589_v2 = vpop.permute.xlu1 %4588 }
0x10b7   :  { %v4593_v21 = vsel %vm4592_vm2, %v4589_v2, %v4591_v16 }
0x10b8   :  { %4595 = vst [vmem:[#allocation5] sm:$0x1] %v4593_v21 }
0x10ba   :  { %v4601_v11 = vpop.permute.xlu1 %4600 }
0x10bb   :  { %v4602_v56 = vsel %vm4592_vm2, %v4599_v10, %v4601_v11 }
0x10bc   :  { %4605 = vst [vmem:[#allocation5 + $0x1] sm:$0x1] %v4602_v56 }
0x10ec   :  { %v4655_v12 = vpop.xlane.xlu0 %4654 }
0x10ed   :  { %v4656_v31 = vrot.slane %v4655_v12, 4 }
0x10ef   :  { %v4657_v9 = vadd.f32 %v4656_v31, %v4655_v12 }
0x10f0   :  { %v4721_v19 = vpop.xlane.xlu0 %4720 }
0x10f1   :  { %v4658_v30 = vrot.slane %v4657_v9, 2  ;;  %v4722_v0 = vrot.slane %v4721_v19, 4 }
0x10f3   :  { %v4659_v49 = vadd.f32 %v4658_v30, %v4657_v9  ;;  %v4723_v44 = vadd.f32 %v4722_v0, %v4721_v19 }
0x10f4   :  { %v4734_v7 = vpop.xlane.xlu0 %4733 }
0x10f5   :  { %v4735_v17 = vrot.slane %v4734_v7, 4  ;;  %v4660_v20 = vrot.slane %v4659_v49, 1  ;;  %v4724_v43 = vrot.slane %v4723_v44, 2 }
0x10f7   :  { %v4736_v60 = vadd.f32 %v4735_v17, %v4734_v7  ;;  %v4661_v14 = vadd.f32 %v4660_v20, %v4659_v49  ;;  %v4725_v1 = vadd.f32 %v4724_v43, %v4723_v44 }
0x10f8   :  { %v4800_v59 = vpop.xlane.xlu0 %4799 }
0x10f9   :  { %v4801_v3 = vrot.slane %v4800_v59, 4  ;;  %4951 = vpush %v4661_v14  ;;  %v4668_v57 = vpop.xlane.xlu1 %4667  ;;  %v4737_v63 = vrot.slane %v4736_v60, 2  ;;  %v4726_v36 = vrot.slane %v4725_v1, 1 }
0x10fa   :  { %v4669_v22 = vrot.slane %v4668_v57, 4 }
0x10fb   :  { %v4802_v53 = vadd.f32 %v4801_v3, %v4800_v59  ;;  %v4738_v39 = vadd.f32 %v4737_v63, %v4736_v60  ;;  %v4727_v45 = vadd.f32 %v4726_v36, %v4725_v1 }
0x10fc   :  { %v4670_v24 = vadd.f32 %v4669_v22, %v4668_v57 }
0x10fd   :  { %v4803_v62 = vrot.slane %v4802_v53, 2  ;;  %v4787_v18 = vpop.xlane.xlu1 %4786  ;;  %v4739_v42 = vrot.slane %v4738_v39, 1 }
0x10fe   :  { %v4671_v25 = vrot.slane %v4670_v24, 2  ;;  %v4788_v32 = vrot.slane %v4787_v18, 4 }
0x10ff   :  { %v4804_v13 = vadd.f32 %v4803_v62, %v4802_v53  ;;  %v4740_v51 = vadd.f32 %v4739_v42, %v4738_v39 }
0x1100   :  { %v4789_v33 = vadd.f32 %v4788_v32, %v4787_v18  ;;  %v4672_v23 = vadd.f32 %v4671_v25, %v4670_v24 }
0x1101   :  { %v4853_v46 = vpop.xlane.xlu1 %4852  ;;  %v4805_v5 = vrot.slane %v4804_v13, 1 }
0x1102   :  { %v4790_v54 = vrot.slane %v4789_v33, 2  ;;  %v4854_v41 = vrot.slane %v4853_v46, 4  ;;  %v4866_v15 = vpop.xlane.xlu0 %4865  ;;  %v4673_v35 = vrot.slane %v4672_v23, 1 }
0x1103   :  { %v4867_v29 = vrot.slane %v4866_v15, 4  ;;  %v4806_v52 = vadd.f32 %v4805_v5, %v4804_v13 }
0x1104   :  { %v4855_v61 = vadd.f32 %v4854_v41, %v4853_v46  ;;  %v4674_v55 = vadd.f32 %v4673_v35, %v4672_v23  ;;  %v4791_v6 = vadd.f32 %v4790_v54, %v4789_v33 }
0x1105   :  { %v4868_v50 = vadd.f32 %v4867_v29, %v4866_v15  ;;  %v4609_v58 = vpop.permute.xlu1 %4608 }
0x1106   :  { %v4856_v40 = vrot.slane %v4855_v61, 2  ;;  %v4611_v26 = vpop.permute.xlu0 %4610  ;;  %4953 = vpush %v4674_v55  ;;  %v4792_v27 = vrot.slane %v4791_v6, 1 }
0x1107   :  { %v4869_v47 = vrot.slane %v4868_v50, 2  ;;  %v4612_v38 = vsel %vm4592_vm2, %v4609_v58, %v4611_v26  ;;  %4955 = vpush %v4727_v45 }
0x1108   :  { %4615 = vst [vmem:[#allocation5 + $0x2] sm:$0x1] %v4612_v38  ;;  %4957 = vpush %v4740_v51  ;;  %v4793_v34 = vadd.f32 %v4792_v27, %v4791_v6  ;;  %v4857_v4 = vadd.f32 %v4856_v40, %v4855_v61 }
0x1109   :  { %v4619_v37 = vpop.permute.xlu1 %4618  ;;  %v4870_v48 = vadd.f32 %v4869_v47, %v4868_v50 }
0x110a   :  { %4959 = vpush %v4793_v34  ;;  %v4858_v28 = vrot.slane %v4857_v4, 1 }
0x110b   :  { %4961 = vpush %v4806_v52  ;;  %v4871_v8 = vrot.slane %v4870_v48, 1 }
0x110c   :  { %v4859_v16 = vadd.f32 %v4858_v28, %v4857_v4 }
0x110d   :  { %v4621_v2 = vpop.permute.xlu1 %4620  ;;  %v4872_v21 = vadd.f32 %v4871_v8, %v4870_v48 }
0x110e   :  { %v4622_v10 = vsel %vm4592_vm2, %v4619_v37, %v4621_v2  ;;  %4963 = vpush %v4859_v16 }
0x110f   :  { %4625 = vst [vmem:[#allocation5 + $0x3] sm:$0x1] %v4622_v10  ;;  %4965 = vpush %v4872_v21 }
0x1110   :  { %5440 = shalt.err (!%p5437_p4)
}
0x1111   :  { %s5441_s30 = scalar_lea.hbm %s9008_s9, 64 }
0x1112   :  { %p5442_p5 = scmp.ne.s32.totalorder %s9008_s9, %s5441_s30  ;;  %p5445_p6 = scmp.lt.u32.totalorder %s5441_s30, %s9008_s9 }
0x1114   :  { %p5447_p7 = pnand %p5445_p6, %p5442_p5 }
0x1116   :  { %5450 = shalt.err (!%p5447_p7)
}
0x1117   :  { %s5491_s14 = smov 16   ;;  %s5492_s15 = smov 1   ;;  %v4628_v11 = vld [vmem:[%s9007_s8] sm:$0x3]  ;;  %vm4698_vm3 = vcmask 0  }
0x1118   :  { %4909 = dma.vmem_to_hbm [thread:$0]  %s4904_s26, 64, %s9008_s9, [#allocation6], %s5491_s14, %s5491_s14, %s5492_s15  }
0x112a   :  { %s4952_s17 = spop %4951 }
0x112b   :  { %v4663_v56 = vstv %s4952_s17 }
0x112c   :  { %v4664_v30 = vadd.f32 %v4663_v56, %v4628_v11 }
0x1137   :  { %s4954_s18 = spop %4953 }
0x1138   :  { %v4676_v12 = vstv %s4954_s18  ;;  %s4956_s20 = spop %4955 }
0x1139   :  { %v4677_v31 = vadd.f32 %v4676_v12, %v4628_v11  ;;  %v4729_v9 = vstv %s4956_s20  ;;  %s4958_s21 = spop %4957 }
0x113a   :  { %v4742_v19 = vstv %s4958_s21  ;;  %v4730_v7 = vadd.f32 %v4729_v9, %v4628_v11 }
0x113b   :  { %v4679_v0 = vrot.slane %v4677_v31, 1  ;;  %v4743_v49 = vadd.f32 %v4742_v19, %v4628_v11  ;;  %s4960_s4 = spop %4959 }
0x113c   :  { %s4962_s5 = spop %4961  ;;  %v4795_v20 = vstv %s4960_s4 }
0x113d   :  { %v8977_v44 = vmax.f32 %v4664_v30, %v4679_v0  ;;  %v4745_v17 = vrot.slane %v4743_v49, 1  ;;  %v4808_v60 = vstv %s4962_s5  ;;  %v4796_v57 = vadd.f32 %v4795_v20, %v4628_v11 }
0x113e   :  { %v4809_v14 = vadd.f32 %v4808_v60, %v4628_v11 }
0x113f   :  { %v4682_v59 = vsub.f32 %v4664_v30, %v8977_v44  ;;  %v4686_v43 = vrot.slane %v8977_v44, 7  ;;  %v8981_v3 = vmax.f32 %v4730_v7, %v4745_v17  ;;  %s4964_s8 = spop %4963 }
0x1140   :  { %v4811_v63 = vrot.slane %v4809_v14, 1  ;;  %s4966_s9 = spop %4965  ;;  %v4861_v39 = vstv %s4964_s8 }
0x1141   :  { %v4688_v22 = vsub.f32 %v4677_v31, %v4686_v43  ;;  %v4748_v53 = vsub.f32 %v4730_v7, %v8981_v3  ;;  %v4752_v24 = vrot.slane %v8981_v3, 7  ;;  %v4683_v62 = vmul.f32 1.442695, %v4682_v59 }
0x1142   :  { %v4813_v18 = vmax.f32 %v4796_v57, %v4811_v63  ;;  %v4874_v1 = vstv %s4966_s9  ;;  %v4862_v41 = vadd.f32 %v4861_v39, %v4628_v11 }
0x1143   :  { %v4689_v25 = vmul.f32 1.442695, %v4688_v22  ;;  %v4754_v32 = vsub.f32 %v4743_v49, %v4752_v24  ;;  %v4875_v46 = vadd.f32 %v4874_v1, %v4628_v11  ;;  %v4749_v36 = vmul.f32 1.442695, %v4748_v53 }
0x1144   :  { %v4814_v33 = vsub.f32 %v4796_v57, %v4813_v18  ;;  %v4818_v23 = vrot.slane %v4813_v18, 7 }
0x1145   :  { %5401 = vpow2.f32 %v4689_v25  ;;  %v4755_v13 = vmul.f32 1.442695, %v4754_v32  ;;  %v4877_v15 = vrot.slane %v4875_v46, 1 }
0x1146   :  { %5403 = vpow2.f32 %v4683_v62  ;;  %v4820_v54 = vsub.f32 %v4809_v14, %v4818_v23  ;;  %v4815_v35 = vmul.f32 1.442695, %v4814_v33 }
0x1147   :  { %5405 = vpow2.f32 %v4755_v13  ;;  %v4879_v29 = vmax.f32 %v4862_v41, %v4877_v15 }
0x1148   :  { %v4821_v42 = vmul.f32 1.442695, %v4820_v54  ;;  %5407 = vpow2.f32 %v4749_v36 }
0x1149   :  { %v4880_v61 = vsub.f32 %v4862_v41, %v4879_v29  ;;  %v4884_v55 = vrot.slane %v4879_v29, 7 }
0x114a   :  { %5409 = vpow2.f32 %v4821_v42 }
0x114b   :  { %5411 = vpow2.f32 %v4815_v35  ;;  %v4886_v6 = vsub.f32 %v4875_v46, %v4884_v55  ;;  %v4881_v50 = vmul.f32 1.442695, %v4880_v61 }
0x114d   :  { %v4887_v58 = vmul.f32 1.442695, %v4886_v6 }
0x114f   :  { %v5402_v45 = vpop.eup %5401  ;;  %5413 = vpow2.f32 %v4887_v58 }
0x1150   :  { %v5404_v5 = vpop.eup %5403  ;;  %v4692_v40 = vrot.slane %v5402_v45, 1  ;;  %5415 = vpow2.f32 %v4881_v50 }
0x1151   :  { %v5406_v26 = vpop.eup %5405 }
0x1152   :  { %v4694_v51 = vadd.f32 %v5404_v5, %v4692_v40  ;;  %v4758_v27 = vrot.slane %v5406_v26, 1  ;;  %v5408_v47 = vpop.eup %5407 }
0x1154   :  { %v5410_v38 = vpop.eup %5409  ;;  %5417 = vlog2.f32 %v4694_v51  ;;  %v4760_v34 = vadd.f32 %v5408_v47, %v4758_v27 }
0x1155   :  { %v4824_v4 = vrot.slane %v5410_v38, 1  ;;  %v5412_v37 = vpop.eup %5411 }
0x1156   :  { %5419 = vlog2.f32 %v4760_v34 }
0x1157   :  { %v4826_v52 = vadd.f32 %v5412_v37, %v4824_v4 }
0x1159   :  { %5421 = vlog2.f32 %v4826_v52  ;;  %v5414_v48 = vpop.eup %5413 }
0x115a   :  { %v4890_v28 = vrot.slane %v5414_v48, 1  ;;  %v5416_v8 = vpop.eup %5415 }
0x115c   :  { %v4892_v16 = vadd.f32 %v5416_v8, %v4890_v28 }
0x115e   :  { %v5418_v2 = vpop.eup %5417  ;;  %5423 = vlog2.f32 %v4892_v16 }
0x115f   :  { %v4696_v21 = vmul.f32 0.6931472, %v5418_v2 }
0x1160   :  { %v5420_v10 = vpop.eup %5419 }
0x1161   :  { %v4697_v11 = vadd.f32 %v4696_v21, %v8977_v44  ;;  %v4762_v56 = vmul.f32 0.6931472, %v5420_v10 }
0x1163   :  { %v5422_v12 = vpop.eup %5421  ;;  %4699 = vst.msk [vmem:[%s9009_s10] sm:$0x1] %vm4698_vm3, %v4697_v11  ;;  %v4763_v31 = vadd.f32 %v4762_v56, %v8981_v3 }
0x1164   :  { %v4828_v9 = vmul.f32 0.6931472, %v5422_v12 }
0x1165   :  { %4948 = vst.msk [vmem:[%s9009_s10 + $0x1] sm:$0x1] %vm4698_vm3, %v4763_v31 }
0x1166   :  { %v4829_v19 = vadd.f32 %v4828_v9, %v4813_v18 }
0x1168   :  { %4949 = vst.msk [vmem:[%s9009_s10 + $0x2] sm:$0x1] %vm4698_vm3, %v4829_v19  ;;  %v5424_v30 = vpop.eup %5423 }
0x1169   :  { %v4894_v0 = vmul.f32 0.6931472, %v5424_v30 }
0x116b   :  { %v4895_v49 = vadd.f32 %v4894_v0, %v4879_v29 }
0x116d   :  { %4950 = vst.msk [vmem:[%s9009_s10 + $0x3] sm:$0x1] %vm4698_vm3, %v4895_v49 }
0x116e   :  { %5451 = dma.done.wait [#allocation6], 64  }
0x116f   :  { %5452 = vsyncadd [#allocation6], 4294967232 }
0x1170   :  { %4917 = vsyncpa [#allocation6], 1 }

</bundles_post_ra>
